<compile_context>
chip_gen: v7x
topology: tpu7x:2x2x1
jax: 0.10.0
libtpu: 0.0.40
codegen_flags: <defaults>
</compile_context>

<pallas_src>
import jax
import jax.numpy as jnp
from jax.experimental import pallas as pl
from jax.experimental.pallas import tpu as pltpu


# ----------------------------- Pallas kernels ------------------------------

def _lstm_fused_kernel(g_ref, whh_ref, out_ref, h_ref, c_ref):
    """Recurrent part only (gates were pre-projected): TU steps per grid step.

    Grid = (direction, time_block).  h/c persist in VMEM scratch across the
    inner ("arbitrary") time axis and are re-zeroed at the start of each
    direction (outer "parallel" axis).
    """
    @pl.when(pl.program_id(1) == 0)
    def _():
        h_ref[...] = jnp.zeros_like(h_ref)
        c_ref[...] = jnp.zeros_like(c_ref)

    whh = whh_ref[0]                        # (H, 4H)
    H = h_ref.shape[-1]
    TU = g_ref.shape[1]
    h = h_ref[...]
    c = c_ref[...]
    for i in range(TU):                     # static unroll over the time block
        z = g_ref[0, i] + jnp.dot(h, whh, preferred_element_type=jnp.float32)
        ig = jax.nn.sigmoid(z[:, 0:H])
        fg = jax.nn.sigmoid(z[:, H:2 * H])
        gg = jnp.tanh(z[:, 2 * H:3 * H])
        og = jax.nn.sigmoid(z[:, 3 * H:4 * H])
        c = fg * c + ig * gg
        h = og * jnp.tanh(c)
        out_ref[0, i] = h
    h_ref[...] = h
    c_ref[...] = c


def lstm_fused(gates, whh, tu=8):
    """gates: (D, T, B, 4H) pre-projected inputs; whh: (D, H, 4H) -> (D, T, B, H)."""
    D, T, B, G4 = gates.shape
    H = G4 // 4
    tu = min(tu, T)
    Tp = pl.cdiv(T, tu) * tu
    if Tp != T:
        gates = jnp.pad(gates, ((0, 0), (0, Tp - T), (0, 0), (0, 0)))
    out = pl.pallas_call(
        _lstm_fused_kernel,
        out_shape=jax.ShapeDtypeStruct((D, Tp, B, H), jnp.float32),
        grid_spec=pltpu.PrefetchScalarGridSpec(
            num_scalar_prefetch=0,
            grid=(D, Tp // tu),
            in_specs=[
                pl.BlockSpec((1, tu, B, G4), lambda d, t: (d, t, 0, 0)),
                pl.BlockSpec((1, H, G4), lambda d, t: (d, 0, 0)),
            ],
            out_specs=pl.BlockSpec((1, tu, B, H), lambda d, t: (d, t, 0, 0)),
            scratch_shapes=[pltpu.VMEM((B, H), jnp.float32),
                            pltpu.VMEM((B, H), jnp.float32)],
        ),
        compiler_params=pltpu.CompilerParams(
            dimension_semantics=("parallel", "arbitrary")),
    )(gates, whh)
    return out[:, :T] if Tp != T else out


def _batched_linear_kernel(x_ref, w_ref, b_ref, o_ref):
    o_ref[0] = (jnp.dot(x_ref[0], w_ref[0],
                        preferred_element_type=jnp.float32) + b_ref[0])


def batched_linear(x, w, b):
    """x: (D, N, I); w: (D, I, O); b: (D, 1, O) -> (D, N, O)."""
    D, N, I = x.shape
    O = w.shape[-1]
    return pl.pallas_call(
        _batched_linear_kernel,
        out_shape=jax.ShapeDtypeStruct((D, N, O), jnp.float32),
        grid_spec=pltpu.PrefetchScalarGridSpec(
            num_scalar_prefetch=0,
            grid=(D,),
            in_specs=[pl.BlockSpec((1, N, I), lambda d: (d, 0, 0)),
                      pl.BlockSpec((1, I, O), lambda d: (d, 0, 0)),
                      pl.BlockSpec((1, 1, O), lambda d: (d, 0, 0))],
            out_specs=pl.BlockSpec((1, N, O), lambda d: (d, 0, 0)),
        ),
        compiler_params=pltpu.CompilerParams(
            dimension_semantics=("parallel",)),
    )(x, w, b)


def linear(x, w, b):
    """x: (N, I); w: (I, O); b: (1, O) -> (N, O)."""
    return batched_linear(x[None], w[None], b[None])[0]


def _head_kernel(x_ref, w_ref, b_ref, score_ref, pred_ref):
    """Fused final linear -> softmax(dim=-1) -> (max prob, argmax)."""
    logits = (jnp.dot(x_ref[...], w_ref[...],
                      preferred_element_type=jnp.float32) + b_ref[...])
    m = jnp.max(logits, axis=-1, keepdims=True)
    denom = jnp.sum(jnp.exp(logits - m), axis=-1, keepdims=True)
    # max softmax prob == exp(0)/sum == 1/sum  (bit-exact, no (N,C) divide)
    score_ref[...] = pl.reciprocal(denom)
    C = logits.shape[-1]
    lane = jax.lax.broadcasted_iota(jnp.int32, logits.shape, 1)
    pred_ref[...] = jnp.min(jnp.where(logits == m, lane, C),
                            axis=-1, keepdims=True)


def head(x, w, b):
    """x: (N, I); w: (I, C); b: (1, C) -> (scores (N,1) f32, preds (N,1) i32)."""
    N, I = x.shape
    C = w.shape[1]
    return pl.pallas_call(
        _head_kernel,
        out_shape=(jax.ShapeDtypeStruct((N, 1), jnp.float32),
                   jax.ShapeDtypeStruct((N, 1), jnp.int32)),
        grid_spec=pltpu.PrefetchScalarGridSpec(
            num_scalar_prefetch=0,
            grid=(1,),
            in_specs=[pl.BlockSpec((N, I), lambda i: (0, 0)),
                      pl.BlockSpec((I, C), lambda i: (0, 0)),
                      pl.BlockSpec((1, C), lambda i: (0, 0))],
            out_specs=(pl.BlockSpec((N, 1), lambda i: (0, 0)),
                       pl.BlockSpec((N, 1), lambda i: (0, 0))),
        ),
    )(x, w, b)


# ------------------------------- glue / model -------------------------------

def export_model_forward(params, inputForward, inputIndicesForward,
                         inputBackward, inputIndicesBackward,
                         characterLengths, lengths):
    T_c, B = inputForward.shape

    # character embedding lookups (gather -> glue), stacked per direction
    enc = jnp.stack([jnp.take(params["fwd_emb"], inputForward, axis=0),
                     jnp.take(params["bwd_emb"], inputBackward, axis=0)])
    E = enc.shape[-1]                                              # (2,T_c,B,E)

    # hoisted input projection: one batched MXU matmul for both directions
    char_wih = jnp.stack([params["fwd_wih"], params["bwd_wih"]])   # (2,E,4Hc)
    char_b = jnp.stack([params["fwd_b"], params["bwd_b"]])         # (2,1,4Hc)
    H_c = params["fwd_whh"].shape[0]
    gates = batched_linear(enc.reshape(2, T_c * B, E), char_wih, char_b)
    gates = gates.reshape(2, T_c, B, 4 * H_c)

    # fused fwd/bwd character LSTM recurrence
    char_whh = jnp.stack([params["fwd_whh"], params["bwd_whh"]])
    char_out = lstm_fused(gates, char_whh, tu=8)                   # (2,T_c,B,Hc)

    # pad_packed_sequence zero-masking past each example's character length
    char_mask = (jnp.arange(T_c)[:, None] < characterLengths[None, :])
    char_out = char_out * char_mask[None, :, :, None].astype(jnp.float32)

    # both character projections fused into one batched matmul
    proj_w = jnp.stack([params["fwd_proj_w"], params["bwd_proj_w"]])
    proj_b = jnp.stack([params["fwd_proj_b"], params["bwd_proj_b"]])
    proj = batched_linear(char_out.reshape(2, T_c * B, H_c), proj_w, proj_b)

    # index_select of word-boundary character states (gather -> glue)
    fwd_embs = jnp.take(proj[0], inputIndicesForward, axis=0)      # (B*T_w, P)
    bwd_embs = jnp.take(proj[1], inputIndicesBackward, axis=0)
    stacked = jnp.concatenate([fwd_embs, bwd_embs], axis=1)        # (B*T_w, 2P)

    # embedding2nn
    sent_flat = linear(stacked, params["e2n_w"], params["e2n_b"])
    T_w = inputIndicesForward.shape[0] // B
    D2 = sent_flat.shape[-1]
    sent = sent_flat.reshape(B, T_w, D2)                           # (B,T_w,2P)

    # word-level bi-LSTM with packed-sequence semantics: backward direction is
    # a forward scan over each row reversed within its own length.
    t_idx = jnp.arange(T_w)[None, :]
    L = lengths[:, None]
    rev_idx = jnp.where(t_idx < L, L - 1 - t_idx, t_idx)           # (B,T_w)
    sent_rev = jnp.take_along_axis(sent, rev_idx[:, :, None], axis=1)
    word_in = jnp.stack([jnp.transpose(sent, (1, 0, 2)),
                         jnp.transpose(sent_rev, (1, 0, 2))])      # (2,T_w,B,2P)

    rnn_wih = jnp.stack([params["rnnf_wih"], params["rnnb_wih"]])
    rnn_b = jnp.stack([params["rnnf_b"], params["rnnb_b"]])
    H_w = params["rnnf_whh"].shape[0]
    wgates = batched_linear(word_in.reshape(2, T_w * B, D2), rnn_wih, rnn_b)
    wgates = wgates.reshape(2, T_w, B, 4 * H_w)
    rnn_whh = jnp.stack([params["rnnf_whh"], params["rnnb_whh"]])
    word_out = lstm_fused(wgates, rnn_whh, tu=8)                   # (2,T_w,B,Hw)

    rnn_fwd = jnp.transpose(word_out[0], (1, 0, 2))                # (B,T_w,Hw)
    rnn_bwd = jnp.transpose(word_out[1], (1, 0, 2))
    rnn_bwd = jnp.take_along_axis(rnn_bwd, rev_idx[:, :, None], axis=1)

    rnn_out = jnp.concatenate([rnn_fwd, rnn_bwd], axis=-1)         # (B,T_w,2Hw)
    word_mask = (t_idx < L)[:, :, None].astype(jnp.float32)
    rnn_out = rnn_out * word_mask                                  # pad_packed

    # final linear + softmax + max (fused Pallas head)
    flat = rnn_out.reshape(B * T_w, rnn_out.shape[-1])
    scores, preds = head(flat, params["lin_w"], params["lin_b"])
    # TODO(synk): PyTorch returns int64 predictions; we keep int32 on TPU.
    return scores.reshape(B, T_w), preds.reshape(B, T_w)


def init_params(key, V, E, H_C, P, H_W, C):
    ks = iter(jax.random.split(key, 24))

    def w(shape, scale=0.1):
        return scale * jax.random.normal(next(ks), shape, dtype=jnp.float32)

    D2 = 2 * P
    return dict(
        fwd_emb=w((V, E)), bwd_emb=w((V, E)),
        fwd_wih=w((E, 4 * H_C)), fwd_whh=w((H_C, 4 * H_C)), fwd_b=w((1, 4 * H_C)),
        bwd_wih=w((E, 4 * H_C)), bwd_whh=w((H_C, 4 * H_C)), bwd_b=w((1, 4 * H_C)),
        fwd_proj_w=w((H_C, P)), fwd_proj_b=w((1, P)),
        bwd_proj_w=w((H_C, P)), bwd_proj_b=w((1, P)),
        e2n_w=w((D2, D2)), e2n_b=w((1, D2)),
        rnnf_wih=w((D2, 4 * H_W)), rnnf_whh=w((H_W, 4 * H_W)), rnnf_b=w((1, 4 * H_W)),
        rnnb_wih=w((D2, 4 * H_W)), rnnb_whh=w((H_W, 4 * H_W)), rnnb_b=w((1, 4 * H_W)),
        lin_w=w((2 * H_W, C)), lin_b=w((1, C)),
    )


if __name__ == "__main__":
    # small, shape-consistent sizes
    V, E, H_C, P, H_W, C = 24, 16, 32, 32, 32, 10
    B, T_C, T_W = 2, 16, 8

    key = jax.random.PRNGKey(0)
    pkey, ikey = jax.random.split(key)
    params = init_params(pkey, V, E, H_C, P, H_W, C)

    k = jax.random.split(ikey, 4)
    inputForward = jax.random.randint(k[0], (T_C, B), 0, V, dtype=jnp.int32)
    inputBackward = jax.random.randint(k[1], (T_C, B), 0, V, dtype=jnp.int32)
    inputIndicesForward = jax.random.randint(
        k[2], (B * T_W,), 0, T_C * B, dtype=jnp.int32)
    inputIndicesBackward = jax.random.randint(
        k[3], (B * T_W,), 0, T_C * B, dtype=jnp.int32)
    # enforce_sorted=True -> descending lengths
    characterLengths = jnp.array([16, 12], dtype=jnp.int32)
    lengths = jnp.array([8, 6], dtype=jnp.int32)

    fwd = jax.jit(export_model_forward)
    scores, preds = fwd(params, inputForward, inputIndicesForward,
                        inputBackward, inputIndicesBackward,
                        characterLengths, lengths)
    jax.block_until_ready((scores, preds))
    assert scores.shape == (B, T_W) and scores.dtype == jnp.float32
    assert preds.shape == (B, T_W) and preds.dtype == jnp.int32
    print("KERNEL_OK")
</pallas_src>

<mosaic_0001>
module attributes {stable_mosaic.version = 11 : i64} {
  func.func @_batched_linear_kernel(%arg0: i32, %arg1: memref<1x32x32xf32, #tpu.memory_space<vmem>>, %arg2: memref<1x32x32xf32, #tpu.memory_space<vmem>>, %arg3: memref<1x1x32xf32, #tpu.memory_space<vmem>>, %arg4: memref<1x32x32xf32, #tpu.memory_space<vmem>>) attributes {dimension_semantics = [#tpu.dimension_semantics<parallel>], iteration_bounds = array<i64: 2>, scalar_prefetch = 0 : i64, scratch_operands = 0 : i64, tpu.core_type = #tpu.core_type<tc>, window_params = [{transform_indices = @transform_0, window_bounds = array<i64: 1, 32, 32>}, {transform_indices = @transform_1, window_bounds = array<i64: 1, 32, 32>}, {transform_indices = @transform_2, window_bounds = array<i64: 1, 1, 32>}, {transform_indices = @transform_3, window_bounds = array<i64: 1, 32, 32>}]} {
    %c0 = arith.constant 0 : index
    %c0_0 = arith.constant 0 : index
    %c0_1 = arith.constant 0 : index
    %0 = vector.load %arg1[%c0, %c0_0, %c0_1] : memref<1x32x32xf32, #tpu.memory_space<vmem>>, vector<1x32x32xf32>
    %1 = vector.shape_cast %0 : vector<1x32x32xf32> to vector<32x32xf32>
    %c0_2 = arith.constant 0 : index
    %c0_3 = arith.constant 0 : index
    %c0_4 = arith.constant 0 : index
    %2 = vector.load %arg2[%c0_2, %c0_3, %c0_4] : memref<1x32x32xf32, #tpu.memory_space<vmem>>, vector<1x32x32xf32>
    %3 = vector.shape_cast %2 : vector<1x32x32xf32> to vector<32x32xf32>
    %cst = arith.constant dense<0.000000e+00> : vector<32x32xf32>
    %4 = tpu.matmul %1, %3, %cst {dimension_numbers = #tpu.dot_dimension_numbers<[1], [0], [0], [1], [0, 0, 1, 1], [], []>} : vector<32x32xf32>, vector<32x32xf32>, vector<32x32xf32> -> vector<32x32xf32>
    %c0_5 = arith.constant 0 : index
    %c0_6 = arith.constant 0 : index
    %c0_7 = arith.constant 0 : index
    %5 = vector.load %arg3[%c0_5, %c0_6, %c0_7] : memref<1x1x32xf32, #tpu.memory_space<vmem>>, vector<1x1x32xf32>
    %6 = vector.shape_cast %5 : vector<1x1x32xf32> to vector<1x32xf32>
    %7 = vector.broadcast %6 : vector<1x32xf32> to vector<32x32xf32>
    %8 = arith.addf %4, %7 : vector<32x32xf32>
    %c0_8 = arith.constant 0 : index
    %c0_9 = arith.constant 0 : index
    %c0_10 = arith.constant 0 : index
    %9 = vector.load %arg4[%c0_8, %c0_9, %c0_10] : memref<1x32x32xf32, #tpu.memory_space<vmem>>, vector<1x32x32xf32>
    %10 = vector.shape_cast %9 : vector<1x32x32xf32> to vector<32x32xf32>
    %11 = vector.shape_cast %8 : vector<32x32xf32> to vector<1x32x32xf32>
    tpu.vector_store %arg4[%c0_8, %c0_9, %c0_10], %11 {strides = array<i32>} : memref<1x32x32xf32, #tpu.memory_space<vmem>>, vector<1x32x32xf32>,
    return
  }
  func.func @transform_0(%arg0: i32) -> (i32, i32, i32) {
    %c0_i32 = arith.constant 0 : i32
    %c0_i32_0 = arith.constant 0 : i32
    %c0_i32_1 = arith.constant 0 : i32
    return %arg0, %c0_i32, %c0_i32_0 : i32, i32, i32
  }
  func.func @transform_1(%arg0: i32) -> (i32, i32, i32) {
    %c0_i32 = arith.constant 0 : i32
    %c0_i32_0 = arith.constant 0 : i32
    %c0_i32_1 = arith.constant 0 : i32
    return %arg0, %c0_i32, %c0_i32_0 : i32, i32, i32
  }
  func.func @transform_2(%arg0: i32) -> (i32, i32, i32) {
    %c0_i32 = arith.constant 0 : i32
    %c0_i32_0 = arith.constant 0 : i32
    %c0_i32_1 = arith.constant 0 : i32
    return %arg0, %c0_i32, %c0_i32_0 : i32, i32, i32
  }
  func.func @transform_3(%arg0: i32) -> (i32, i32, i32) {
    %c0_i32 = arith.constant 0 : i32
    %c0_i32_0 = arith.constant 0 : i32
    %c0_i32_1 = arith.constant 0 : i32
    return %arg0, %c0_i32, %c0_i32_0 : i32, i32, i32
  }
}

module attributes {stable_mosaic.version = 11 : i64} {
  func.func @_batched_linear_kernel(%arg0: i32, %arg1: memref<1x32x16xf32, #tpu.memory_space<vmem>>, %arg2: memref<1x16x128xf32, #tpu.memory_space<vmem>>, %arg3: memref<1x1x128xf32, #tpu.memory_space<vmem>>, %arg4: memref<1x32x128xf32, #tpu.memory_space<vmem>>) attributes {dimension_semantics = [#tpu.dimension_semantics<parallel>], iteration_bounds = array<i64: 2>, scalar_prefetch = 0 : i64, scratch_operands = 0 : i64, tpu.core_type = #tpu.core_type<tc>, window_params = [{transform_indices = @transform_0, window_bounds = array<i64: 1, 32, 16>}, {transform_indices = @transform_1, window_bounds = array<i64: 1, 16, 128>}, {transform_indices = @transform_2, window_bounds = array<i64: 1, 1, 128>}, {transform_indices = @transform_3, window_bounds = array<i64: 1, 32, 128>}]} {
    %c0 = arith.constant 0 : index
    %c0_0 = arith.constant 0 : index
    %c0_1 = arith.constant 0 : index
    %0 = vector.load %arg1[%c0, %c0_0, %c0_1] : memref<1x32x16xf32, #tpu.memory_space<vmem>>, vector<1x32x16xf32>
    %1 = vector.shape_cast %0 : vector<1x32x16xf32> to vector<32x16xf32>
    %c0_2 = arith.constant 0 : index
    %c0_3 = arith.constant 0 : index
    %c0_4 = arith.constant 0 : index
    %2 = vector.load %arg2[%c0_2, %c0_3, %c0_4] : memref<1x16x128xf32, #tpu.memory_space<vmem>>, vector<1x16x128xf32>
    %3 = vector.shape_cast %2 : vector<1x16x128xf32> to vector<16x128xf32>
    %cst = arith.constant dense<0.000000e+00> : vector<32x128xf32>
    %4 = tpu.matmul %1, %3, %cst {dimension_numbers = #tpu.dot_dimension_numbers<[1], [0], [0], [1], [0, 0, 1, 1], [], []>} : vector<32x16xf32>, vector<16x128xf32>, vector<32x128xf32> -> vector<32x128xf32>
    %c0_5 = arith.constant 0 : index
    %c0_6 = arith.constant 0 : index
    %c0_7 = arith.constant 0 : index
    %5 = vector.load %arg3[%c0_5, %c0_6, %c0_7] : memref<1x1x128xf32, #tpu.memory_space<vmem>>, vector<1x1x128xf32>
    %6 = vector.shape_cast %5 : vector<1x1x128xf32> to vector<1x128xf32>
    %7 = vector.broadcast %6 : vector<1x128xf32> to vector<32x128xf32>
    %8 = arith.addf %4, %7 : vector<32x128xf32>
    %c0_8 = arith.constant 0 : index
    %c0_9 = arith.constant 0 : index
    %c0_10 = arith.constant 0 : index
    %9 = vector.load %arg4[%c0_8, %c0_9, %c0_10] : memref<1x32x128xf32, #tpu.memory_space<vmem>>, vector<1x32x128xf32>
    %10 = vector.shape_cast %9 : vector<1x32x128xf32> to vector<32x128xf32>
    %11 = vector.shape_cast %8 : vector<32x128xf32> to vector<1x32x128xf32>
    tpu.vector_store %arg4[%c0_8, %c0_9, %c0_10], %11 {strides = array<i32>} : memref<1x32x128xf32, #tpu.memory_space<vmem>>, vector<1x32x128xf32>,
    return
  }
  func.func @transform_0(%arg0: i32) -> (i32, i32, i32) {
    %c0_i32 = arith.constant 0 : i32
    %c0_i32_0 = arith.constant 0 : i32
    %c0_i32_1 = arith.constant 0 : i32
    return %arg0, %c0_i32, %c0_i32_0 : i32, i32, i32
  }
  func.func @transform_1(%arg0: i32) -> (i32, i32, i32) {
    %c0_i32 = arith.constant 0 : i32
    %c0_i32_0 = arith.constant 0 : i32
    %c0_i32_1 = arith.constant 0 : i32
    return %arg0, %c0_i32, %c0_i32_0 : i32, i32, i32
  }
  func.func @transform_2(%arg0: i32) -> (i32, i32, i32) {
    %c0_i32 = arith.constant 0 : i32
    %c0_i32_0 = arith.constant 0 : i32
    %c0_i32_1 = arith.constant 0 : i32
    return %arg0, %c0_i32, %c0_i32_0 : i32, i32, i32
  }
  func.func @transform_3(%arg0: i32) -> (i32, i32, i32) {
    %c0_i32 = arith.constant 0 : i32
    %c0_i32_0 = arith.constant 0 : i32
    %c0_i32_1 = arith.constant 0 : i32
    return %arg0, %c0_i32, %c0_i32_0 : i32, i32, i32
  }
}

module attributes {stable_mosaic.version = 11 : i64} {
  func.func @_lstm_fused_kernel(%arg0: i32, %arg1: i32, %arg2: memref<1x8x2x128xf32, #tpu.memory_space<vmem>>, %arg3: memref<1x32x128xf32, #tpu.memory_space<vmem>>, %arg4: memref<1x8x2x32xf32, #tpu.memory_space<vmem>>, %arg5: memref<2x32xf32, #tpu.memory_space<vmem>>, %arg6: memref<2x32xf32, #tpu.memory_space<vmem>>) attributes {dimension_semantics = [#tpu.dimension_semantics<parallel>, #tpu.dimension_semantics<arbitrary>], iteration_bounds = array<i64: 2, 2>, scalar_prefetch = 0 : i64, scratch_operands = 2 : i64, tpu.core_type = #tpu.core_type<tc>, window_params = [{transform_indices = @transform_0, window_bounds = array<i64: 1, 8, 2, 128>}, {transform_indices = @transform_1, window_bounds = array<i64: 1, 32, 128>}, {transform_indices = @transform_2, window_bounds = array<i64: 1, 8, 2, 32>}]} {
    %c0_i32 = arith.constant 0 : i32
    %0 = arith.cmpi eq, %arg1, %c0_i32 : i32
    %1 = arith.extui %0 : i1 to i32
    %c0_i32_0 = arith.constant 0 : i32
    %2 = arith.cmpi ne, %1, %c0_i32_0 : i32
    scf.if %2 {
      %cst_99 = arith.constant 0.000000e+00 : f32
      %265 = vector.broadcast %cst_99 : f32 to vector<2x32xf32>
      %c0_100 = arith.constant 0 : index
      %c0_101 = arith.constant 0 : index
      %266 = vector.load %arg5[%c0_100, %c0_101] : memref<2x32xf32, #tpu.memory_space<vmem>>, vector<2x32xf32>
      tpu.vector_store %arg5[%c0_100, %c0_101], %265 {strides = array<i32>} : memref<2x32xf32, #tpu.memory_space<vmem>>, vector<2x32xf32>,
      %cst_102 = arith.constant 0.000000e+00 : f32
      %267 = vector.broadcast %cst_102 : f32 to vector<2x32xf32>
      %c0_103 = arith.constant 0 : index
      %c0_104 = arith.constant 0 : index
      %268 = vector.load %arg6[%c0_103, %c0_104] : memref<2x32xf32, #tpu.memory_space<vmem>>, vector<2x32xf32>
      tpu.vector_store %arg6[%c0_103, %c0_104], %267 {strides = array<i32>} : memref<2x32xf32, #tpu.memory_space<vmem>>, vector<2x32xf32>,
    } else {
    }
    %c0 = arith.constant 0 : index
    %c0_1 = arith.constant 0 : index
    %c0_2 = arith.constant 0 : index
    %3 = vector.load %arg3[%c0, %c0_1, %c0_2] : memref<1x32x128xf32, #tpu.memory_space<vmem>>, vector<1x32x128xf32>
    %4 = vector.shape_cast %3 : vector<1x32x128xf32> to vector<32x128xf32>
    %c0_3 = arith.constant 0 : index
    %c0_4 = arith.constant 0 : index
    %5 = vector.load %arg5[%c0_3, %c0_4] : memref<2x32xf32, #tpu.memory_space<vmem>>, vector<2x32xf32>
    %c0_5 = arith.constant 0 : index
    %c0_6 = arith.constant 0 : index
    %6 = vector.load %arg6[%c0_5, %c0_6] : memref<2x32xf32, #tpu.memory_space<vmem>>, vector<2x32xf32>
    %c0_7 = arith.constant 0 : index
    %c0_8 = arith.constant 0 : index
    %c0_9 = arith.constant 0 : index
    %c0_10 = arith.constant 0 : index
    %7 = vector.load %arg2[%c0_7, %c0_8, %c0_9, %c0_10] : memref<1x8x2x128xf32, #tpu.memory_space<vmem>>, vector<1x1x2x128xf32>
    %8 = vector.shape_cast %7 : vector<1x1x2x128xf32> to vector<2x128xf32>
    %cst = arith.constant dense<0.000000e+00> : vector<2x128xf32>
    %9 = tpu.matmul %5, %4, %cst {dimension_numbers = #tpu.dot_dimension_numbers<[1], [0], [0], [1], [0, 0, 1, 1], [], []>} : vector<2x32xf32>, vector<32x128xf32>, vector<2x128xf32> -> vector<2x128xf32>
    %10 = arith.addf %8, %9 : vector<2x128xf32>
    %11 = vector.extract_strided_slice %10 {offsets = [0, 0], sizes = [2, 32], strides = [1, 1]} : vector<2x128xf32> to vector<2x32xf32>
    %12 = arith.negf %11 : vector<2x32xf32>
    %13 = math.exp %12 : vector<2x32xf32>
    %cst_11 = arith.constant 1.000000e+00 : f32
    %14 = vector.broadcast %cst_11 : f32 to vector<2x32xf32>
    %15 = arith.addf %14, %13 : vector<2x32xf32>
    %16 = arith.divf %14, %15 : vector<2x32xf32>
    %17 = vector.extract_strided_slice %10 {offsets = [0, 32], sizes = [2, 32], strides = [1, 1]} : vector<2x128xf32> to vector<2x32xf32>
    %18 = arith.negf %17 : vector<2x32xf32>
    %19 = math.exp %18 : vector<2x32xf32>
    %cst_12 = arith.constant 1.000000e+00 : f32
    %20 = vector.broadcast %cst_12 : f32 to vector<2x32xf32>
    %21 = arith.addf %20, %19 : vector<2x32xf32>
    %22 = arith.divf %20, %21 : vector<2x32xf32>
    %23 = vector.extract_strided_slice %10 {offsets = [0, 64], sizes = [2, 32], strides = [1, 1]} : vector<2x128xf32> to vector<2x32xf32>
    %24 = math.tanh %23 : vector<2x32xf32>
    %25 = vector.extract_strided_slice %10 {offsets = [0, 96], sizes = [2, 32], strides = [1, 1]} : vector<2x128xf32> to vector<2x32xf32>
    %26 = arith.negf %25 : vector<2x32xf32>
    %27 = math.exp %26 : vector<2x32xf32>
    %cst_13 = arith.constant 1.000000e+00 : f32
    %28 = vector.broadcast %cst_13 : f32 to vector<2x32xf32>
    %29 = arith.addf %28, %27 : vector<2x32xf32>
    %30 = arith.divf %28, %29 : vector<2x32xf32>
    %31 = arith.mulf %22, %6 : vector<2x32xf32>
    %32 = arith.mulf %16, %24 : vector<2x32xf32>
    %33 = arith.addf %31, %32 : vector<2x32xf32>
    %34 = math.tanh %33 : vector<2x32xf32>
    %35 = arith.mulf %30, %34 : vector<2x32xf32>
    %c0_14 = arith.constant 0 : index
    %c0_15 = arith.constant 0 : index
    %c0_16 = arith.constant 0 : index
    %c0_17 = arith.constant 0 : index
    %36 = vector.load %arg4[%c0_14, %c0_15, %c0_16, %c0_17] : memref<1x8x2x32xf32, #tpu.memory_space<vmem>>, vector<1x1x2x32xf32>
    %37 = vector.shape_cast %36 : vector<1x1x2x32xf32> to vector<2x32xf32>
    %38 = vector.shape_cast %35 : vector<2x32xf32> to vector<1x1x2x32xf32>
    tpu.vector_store %arg4[%c0_14, %c0_15, %c0_16, %c0_17], %38 {strides = array<i32>} : memref<1x8x2x32xf32, #tpu.memory_space<vmem>>, vector<1x1x2x32xf32>,
    %c0_18 = arith.constant 0 : index
    %c1 = arith.constant 1 : index
    %c0_19 = arith.constant 0 : index
    %c0_20 = arith.constant 0 : index
    %39 = vector.load %arg2[%c0_18, %c1, %c0_19, %c0_20] : memref<1x8x2x128xf32, #tpu.memory_space<vmem>>, vector<1x1x2x128xf32>
    %40 = vector.shape_cast %39 : vector<1x1x2x128xf32> to vector<2x128xf32>
    %cst_21 = arith.constant dense<0.000000e+00> : vector<2x128xf32>
    %41 = tpu.matmul %35, %4, %cst_21 {dimension_numbers = #tpu.dot_dimension_numbers<[1], [0], [0], [1], [0, 0, 1, 1], [], []>} : vector<2x32xf32>, vector<32x128xf32>, vector<2x128xf32> -> vector<2x128xf32>
    %42 = arith.addf %40, %41 : vector<2x128xf32>
    %43 = vector.extract_strided_slice %42 {offsets = [0, 0], sizes = [2, 32], strides = [1, 1]} : vector<2x128xf32> to vector<2x32xf32>
    %44 = arith.negf %43 : vector<2x32xf32>
    %45 = math.exp %44 : vector<2x32xf32>
    %cst_22 = arith.constant 1.000000e+00 : f32
    %46 = vector.broadcast %cst_22 : f32 to vector<2x32xf32>
    %47 = arith.addf %46, %45 : vector<2x32xf32>
    %48 = arith.divf %46, %47 : vector<2x32xf32>
    %49 = vector.extract_strided_slice %42 {offsets = [0, 32], sizes = [2, 32], strides = [1, 1]} : vector<2x128xf32> to vector<2x32xf32>
    %50 = arith.negf %49 : vector<2x32xf32>
    %51 = math.exp %50 : vector<2x32xf32>
    %cst_23 = arith.constant 1.000000e+00 : f32
    %52 = vector.broadcast %cst_23 : f32 to vector<2x32xf32>
    %53 = arith.addf %52, %51 : vector<2x32xf32>
    %54 = arith.divf %52, %53 : vector<2x32xf32>
    %55 = vector.extract_strided_slice %42 {offsets = [0, 64], sizes = [2, 32], strides = [1, 1]} : vector<2x128xf32> to vector<2x32xf32>
    %56 = math.tanh %55 : vector<2x32xf32>
    %57 = vector.extract_strided_slice %42 {offsets = [0, 96], sizes = [2, 32], strides = [1, 1]} : vector<2x128xf32> to vector<2x32xf32>
    %58 = arith.negf %57 : vector<2x32xf32>
    %59 = math.exp %58 : vector<2x32xf32>
    %cst_24 = arith.constant 1.000000e+00 : f32
    %60 = vector.broadcast %cst_24 : f32 to vector<2x32xf32>
    %61 = arith.addf %60, %59 : vector<2x32xf32>
    %62 = arith.divf %60, %61 : vector<2x32xf32>
    %63 = arith.mulf %54, %33 : vector<2x32xf32>
    %64 = arith.mulf %48, %56 : vector<2x32xf32>
    %65 = arith.addf %63, %64 : vector<2x32xf32>
    %66 = math.tanh %65 : vector<2x32xf32>
    %67 = arith.mulf %62, %66 : vector<2x32xf32>
    %c0_25 = arith.constant 0 : index
    %c1_26 = arith.constant 1 : index
    %c0_27 = arith.constant 0 : index
    %c0_28 = arith.constant 0 : index
    %68 = vector.load %arg4[%c0_25, %c1_26, %c0_27, %c0_28] : memref<1x8x2x32xf32, #tpu.memory_space<vmem>>, vector<1x1x2x32xf32>
    %69 = vector.shape_cast %68 : vector<1x1x2x32xf32> to vector<2x32xf32>
    %70 = vector.shape_cast %67 : vector<2x32xf32> to vector<1x1x2x32xf32>
    tpu.vector_store %arg4[%c0_25, %c1_26, %c0_27, %c0_28], %70 {strides = array<i32>} : memref<1x8x2x32xf32, #tpu.memory_space<vmem>>, vector<1x1x2x32xf32>,
    %c0_29 = arith.constant 0 : index
    %c2 = arith.constant 2 : index
    %c0_30 = arith.constant 0 : index
    %c0_31 = arith.constant 0 : index
    %71 = vector.load %arg2[%c0_29, %c2, %c0_30, %c0_31] : memref<1x8x2x128xf32, #tpu.memory_space<vmem>>, vector<1x1x2x128xf32>
    %72 = vector.shape_cast %71 : vector<1x1x2x128xf32> to vector<2x128xf32>
    %cst_32 = arith.constant dense<0.000000e+00> : vector<2x128xf32>
    %73 = tpu.matmul %67, %4, %cst_32 {dimension_numbers = #tpu.dot_dimension_numbers<[1], [0], [0], [1], [0, 0, 1, 1], [], []>} : vector<2x32xf32>, vector<32x128xf32>, vector<2x128xf32> -> vector<2x128xf32>
    %74 = arith.addf %72, %73 : vector<2x128xf32>
    %75 = vector.extract_strided_slice %74 {offsets = [0, 0], sizes = [2, 32], strides = [1, 1]} : vector<2x128xf32> to vector<2x32xf32>
    %76 = arith.negf %75 : vector<2x32xf32>
    %77 = math.exp %76 : vector<2x32xf32>
    %cst_33 = arith.constant 1.000000e+00 : f32
    %78 = vector.broadcast %cst_33 : f32 to vector<2x32xf32>
    %79 = arith.addf %78, %77 : vector<2x32xf32>
    %80 = arith.divf %78, %79 : vector<2x32xf32>
    %81 = vector.extract_strided_slice %74 {offsets = [0, 32], sizes = [2, 32], strides = [1, 1]} : vector<2x128xf32> to vector<2x32xf32>
    %82 = arith.negf %81 : vector<2x32xf32>
    %83 = math.exp %82 : vector<2x32xf32>
    %cst_34 = arith.constant 1.000000e+00 : f32
    %84 = vector.broadcast %cst_34 : f32 to vector<2x32xf32>
    %85 = arith.addf %84, %83 : vector<2x32xf32>
    %86 = arith.divf %84, %85 : vector<2x32xf32>
    %87 = vector.extract_strided_slice %74 {offsets = [0, 64], sizes = [2, 32], strides = [1, 1]} : vector<2x128xf32> to vector<2x32xf32>
    %88 = math.tanh %87 : vector<2x32xf32>
    %89 = vector.extract_strided_slice %74 {offsets = [0, 96], sizes = [2, 32], strides = [1, 1]} : vector<2x128xf32> to vector<2x32xf32>
    %90 = arith.negf %89 : vector<2x32xf32>
    %91 = math.exp %90 : vector<2x32xf32>
    %cst_35 = arith.constant 1.000000e+00 : f32
    %92 = vector.broadcast %cst_35 : f32 to vector<2x32xf32>
    %93 = arith.addf %92, %91 : vector<2x32xf32>
    %94 = arith.divf %92, %93 : vector<2x32xf32>
    %95 = arith.mulf %86, %65 : vector<2x32xf32>
    %96 = arith.mulf %80, %88 : vector<2x32xf32>
    %97 = arith.addf %95, %96 : vector<2x32xf32>
    %98 = math.tanh %97 : vector<2x32xf32>
    %99 = arith.mulf %94, %98 : vector<2x32xf32>
    %c0_36 = arith.constant 0 : index
    %c2_37 = arith.constant 2 : index
    %c0_38 = arith.constant 0 : index
    %c0_39 = arith.constant 0 : index
    %100 = vector.load %arg4[%c0_36, %c2_37, %c0_38, %c0_39] : memref<1x8x2x32xf32, #tpu.memory_space<vmem>>, vector<1x1x2x32xf32>
    %101 = vector.shape_cast %100 : vector<1x1x2x32xf32> to vector<2x32xf32>
    %102 = vector.shape_cast %99 : vector<2x32xf32> to vector<1x1x2x32xf32>
    tpu.vector_store %arg4[%c0_36, %c2_37, %c0_38, %c0_39], %102 {strides = array<i32>} : memref<1x8x2x32xf32, #tpu.memory_space<vmem>>, vector<1x1x2x32xf32>,
    %c0_40 = arith.constant 0 : index
    %c3 = arith.constant 3 : index
    %c0_41 = arith.constant 0 : index
    %c0_42 = arith.constant 0 : index
    %103 = vector.load %arg2[%c0_40, %c3, %c0_41, %c0_42] : memref<1x8x2x128xf32, #tpu.memory_space<vmem>>, vector<1x1x2x128xf32>
    %104 = vector.shape_cast %103 : vector<1x1x2x128xf32> to vector<2x128xf32>
    %cst_43 = arith.constant dense<0.000000e+00> : vector<2x128xf32>
    %105 = tpu.matmul %99, %4, %cst_43 {dimension_numbers = #tpu.dot_dimension_numbers<[1], [0], [0], [1], [0, 0, 1, 1], [], []>} : vector<2x32xf32>, vector<32x128xf32>, vector<2x128xf32> -> vector<2x128xf32>
    %106 = arith.addf %104, %105 : vector<2x128xf32>
    %107 = vector.extract_strided_slice %106 {offsets = [0, 0], sizes = [2, 32], strides = [1, 1]} : vector<2x128xf32> to vector<2x32xf32>
    %108 = arith.negf %107 : vector<2x32xf32>
    %109 = math.exp %108 : vector<2x32xf32>
    %cst_44 = arith.constant 1.000000e+00 : f32
    %110 = vector.broadcast %cst_44 : f32 to vector<2x32xf32>
    %111 = arith.addf %110, %109 : vector<2x32xf32>
    %112 = arith.divf %110, %111 : vector<2x32xf32>
    %113 = vector.extract_strided_slice %106 {offsets = [0, 32], sizes = [2, 32], strides = [1, 1]} : vector<2x128xf32> to vector<2x32xf32>
    %114 = arith.negf %113 : vector<2x32xf32>
    %115 = math.exp %114 : vector<2x32xf32>
    %cst_45 = arith.constant 1.000000e+00 : f32
    %116 = vector.broadcast %cst_45 : f32 to vector<2x32xf32>
    %117 = arith.addf %116, %115 : vector<2x32xf32>
    %118 = arith.divf %116, %117 : vector<2x32xf32>
    %119 = vector.extract_strided_slice %106 {offsets = [0, 64], sizes = [2, 32], strides = [1, 1]} : vector<2x128xf32> to vector<2x32xf32>
    %120 = math.tanh %119 : vector<2x32xf32>
    %121 = vector.extract_strided_slice %106 {offsets = [0, 96], sizes = [2, 32], strides = [1, 1]} : vector<2x128xf32> to vector<2x32xf32>
    %122 = arith.negf %121 : vector<2x32xf32>
    %123 = math.exp %122 : vector<2x32xf32>
    %cst_46 = arith.constant 1.000000e+00 : f32
    %124 = vector.broadcast %cst_46 : f32 to vector<2x32xf32>
    %125 = arith.addf %124, %123 : vector<2x32xf32>
    %126 = arith.divf %124, %125 : vector<2x32xf32>
    %127 = arith.mulf %118, %97 : vector<2x32xf32>
    %128 = arith.mulf %112, %120 : vector<2x32xf32>
    %129 = arith.addf %127, %128 : vector<2x32xf32>
    %130 = math.tanh %129 : vector<2x32xf32>
    %131 = arith.mulf %126, %130 : vector<2x32xf32>
    %c0_47 = arith.constant 0 : index
    %c3_48 = arith.constant 3 : index
    %c0_49 = arith.constant 0 : index
    %c0_50 = arith.constant 0 : index
    %132 = vector.load %arg4[%c0_47, %c3_48, %c0_49, %c0_50] : memref<1x8x2x32xf32, #tpu.memory_space<vmem>>, vector<1x1x2x32xf32>
    %133 = vector.shape_cast %132 : vector<1x1x2x32xf32> to vector<2x32xf32>
    %134 = vector.shape_cast %131 : vector<2x32xf32> to vector<1x1x2x32xf32>
    tpu.vector_store %arg4[%c0_47, %c3_48, %c0_49, %c0_50], %134 {strides = array<i32>} : memref<1x8x2x32xf32, #tpu.memory_space<vmem>>, vector<1x1x2x32xf32>,
    %c0_51 = arith.constant 0 : index
    %c4 = arith.constant 4 : index
    %c0_52 = arith.constant 0 : index
    %c0_53 = arith.constant 0 : index
    %135 = vector.load %arg2[%c0_51, %c4, %c0_52, %c0_53] : memref<1x8x2x128xf32, #tpu.memory_space<vmem>>, vector<1x1x2x128xf32>
    %136 = vector.shape_cast %135 : vector<1x1x2x128xf32> to vector<2x128xf32>
    %cst_54 = arith.constant dense<0.000000e+00> : vector<2x128xf32>
    %137 = tpu.matmul %131, %4, %cst_54 {dimension_numbers = #tpu.dot_dimension_numbers<[1], [0], [0], [1], [0, 0, 1, 1], [], []>} : vector<2x32xf32>, vector<32x128xf32>, vector<2x128xf32> -> vector<2x128xf32>
    %138 = arith.addf %136, %137 : vector<2x128xf32>
    %139 = vector.extract_strided_slice %138 {offsets = [0, 0], sizes = [2, 32], strides = [1, 1]} : vector<2x128xf32> to vector<2x32xf32>
    %140 = arith.negf %139 : vector<2x32xf32>
    %141 = math.exp %140 : vector<2x32xf32>
    %cst_55 = arith.constant 1.000000e+00 : f32
    %142 = vector.broadcast %cst_55 : f32 to vector<2x32xf32>
    %143 = arith.addf %142, %141 : vector<2x32xf32>
    %144 = arith.divf %142, %143 : vector<2x32xf32>
    %145 = vector.extract_strided_slice %138 {offsets = [0, 32], sizes = [2, 32], strides = [1, 1]} : vector<2x128xf32> to vector<2x32xf32>
    %146 = arith.negf %145 : vector<2x32xf32>
    %147 = math.exp %146 : vector<2x32xf32>
    %cst_56 = arith.constant 1.000000e+00 : f32
    %148 = vector.broadcast %cst_56 : f32 to vector<2x32xf32>
    %149 = arith.addf %148, %147 : vector<2x32xf32>
    %150 = arith.divf %148, %149 : vector<2x32xf32>
    %151 = vector.extract_strided_slice %138 {offsets = [0, 64], sizes = [2, 32], strides = [1, 1]} : vector<2x128xf32> to vector<2x32xf32>
    %152 = math.tanh %151 : vector<2x32xf32>
    %153 = vector.extract_strided_slice %138 {offsets = [0, 96], sizes = [2, 32], strides = [1, 1]} : vector<2x128xf32> to vector<2x32xf32>
    %154 = arith.negf %153 : vector<2x32xf32>
    %155 = math.exp %154 : vector<2x32xf32>
    %cst_57 = arith.constant 1.000000e+00 : f32
    %156 = vector.broadcast %cst_57 : f32 to vector<2x32xf32>
    %157 = arith.addf %156, %155 : vector<2x32xf32>
    %158 = arith.divf %156, %157 : vector<2x32xf32>
    %159 = arith.mulf %150, %129 : vector<2x32xf32>
    %160 = arith.mulf %144, %152 : vector<2x32xf32>
    %161 = arith.addf %159, %160 : vector<2x32xf32>
    %162 = math.tanh %161 : vector<2x32xf32>
    %163 = arith.mulf %158, %162 : vector<2x32xf32>
    %c0_58 = arith.constant 0 : index
    %c4_59 = arith.constant 4 : index
    %c0_60 = arith.constant 0 : index
    %c0_61 = arith.constant 0 : index
    %164 = vector.load %arg4[%c0_58, %c4_59, %c0_60, %c0_61] : memref<1x8x2x32xf32, #tpu.memory_space<vmem>>, vector<1x1x2x32xf32>
    %165 = vector.shape_cast %164 : vector<1x1x2x32xf32> to vector<2x32xf32>
    %166 = vector.shape_cast %163 : vector<2x32xf32> to vector<1x1x2x32xf32>
    tpu.vector_store %arg4[%c0_58, %c4_59, %c0_60, %c0_61], %166 {strides = array<i32>} : memref<1x8x2x32xf32, #tpu.memory_space<vmem>>, vector<1x1x2x32xf32>,
    %c0_62 = arith.constant 0 : index
    %c5 = arith.constant 5 : index
    %c0_63 = arith.constant 0 : index
    %c0_64 = arith.constant 0 : index
    %167 = vector.load %arg2[%c0_62, %c5, %c0_63, %c0_64] : memref<1x8x2x128xf32, #tpu.memory_space<vmem>>, vector<1x1x2x128xf32>
    %168 = vector.shape_cast %167 : vector<1x1x2x128xf32> to vector<2x128xf32>
    %cst_65 = arith.constant dense<0.000000e+00> : vector<2x128xf32>
    %169 = tpu.matmul %163, %4, %cst_65 {dimension_numbers = #tpu.dot_dimension_numbers<[1], [0], [0], [1], [0, 0, 1, 1], [], []>} : vector<2x32xf32>, vector<32x128xf32>, vector<2x128xf32> -> vector<2x128xf32>
    %170 = arith.addf %168, %169 : vector<2x128xf32>
    %171 = vector.extract_strided_slice %170 {offsets = [0, 0], sizes = [2, 32], strides = [1, 1]} : vector<2x128xf32> to vector<2x32xf32>
    %172 = arith.negf %171 : vector<2x32xf32>
    %173 = math.exp %172 : vector<2x32xf32>
    %cst_66 = arith.constant 1.000000e+00 : f32
    %174 = vector.broadcast %cst_66 : f32 to vector<2x32xf32>
    %175 = arith.addf %174, %173 : vector<2x32xf32>
    %176 = arith.divf %174, %175 : vector<2x32xf32>
    %177 = vector.extract_strided_slice %170 {offsets = [0, 32], sizes = [2, 32], strides = [1, 1]} : vector<2x128xf32> to vector<2x32xf32>
    %178 = arith.negf %177 : vector<2x32xf32>
    %179 = math.exp %178 : vector<2x32xf32>
    %cst_67 = arith.constant 1.000000e+00 : f32
    %180 = vector.broadcast %cst_67 : f32 to vector<2x32xf32>
    %181 = arith.addf %180, %179 : vector<2x32xf32>
    %182 = arith.divf %180, %181 : vector<2x32xf32>
    %183 = vector.extract_strided_slice %170 {offsets = [0, 64], sizes = [2, 32], strides = [1, 1]} : vector<2x128xf32> to vector<2x32xf32>
    %184 = math.tanh %183 : vector<2x32xf32>
    %185 = vector.extract_strided_slice %170 {offsets = [0, 96], sizes = [2, 32], strides = [1, 1]} : vector<2x128xf32> to vector<2x32xf32>
    %186 = arith.negf %185 : vector<2x32xf32>
    %187 = math.exp %186 : vector<2x32xf32>
    %cst_68 = arith.constant 1.000000e+00 : f32
    %188 = vector.broadcast %cst_68 : f32 to vector<2x32xf32>
    %189 = arith.addf %188, %187 : vector<2x32xf32>
    %190 = arith.divf %188, %189 : vector<2x32xf32>
    %191 = arith.mulf %182, %161 : vector<2x32xf32>
    %192 = arith.mulf %176, %184 : vector<2x32xf32>
    %193 = arith.addf %191, %192 : vector<2x32xf32>
    %194 = math.tanh %193 : vector<2x32xf32>
    %195 = arith.mulf %190, %194 : vector<2x32xf32>
    %c0_69 = arith.constant 0 : index
    %c5_70 = arith.constant 5 : index
    %c0_71 = arith.constant 0 : index
    %c0_72 = arith.constant 0 : index
    %196 = vector.load %arg4[%c0_69, %c5_70, %c0_71, %c0_72] : memref<1x8x2x32xf32, #tpu.memory_space<vmem>>, vector<1x1x2x32xf32>
    %197 = vector.shape_cast %196 : vector<1x1x2x32xf32> to vector<2x32xf32>
    %198 = vector.shape_cast %195 : vector<2x32xf32> to vector<1x1x2x32xf32>
    tpu.vector_store %arg4[%c0_69, %c5_70, %c0_71, %c0_72], %198 {strides = array<i32>} : memref<1x8x2x32xf32, #tpu.memory_space<vmem>>, vector<1x1x2x32xf32>,
    %c0_73 = arith.constant 0 : index
    %c6 = arith.constant 6 : index
    %c0_74 = arith.constant 0 : index
    %c0_75 = arith.constant 0 : index
    %199 = vector.load %arg2[%c0_73, %c6, %c0_74, %c0_75] : memref<1x8x2x128xf32, #tpu.memory_space<vmem>>, vector<1x1x2x128xf32>
    %200 = vector.shape_cast %199 : vector<1x1x2x128xf32> to vector<2x128xf32>
    %cst_76 = arith.constant dense<0.000000e+00> : vector<2x128xf32>
    %201 = tpu.matmul %195, %4, %cst_76 {dimension_numbers = #tpu.dot_dimension_numbers<[1], [0], [0], [1], [0, 0, 1, 1], [], []>} : vector<2x32xf32>, vector<32x128xf32>, vector<2x128xf32> -> vector<2x128xf32>
    %202 = arith.addf %200, %201 : vector<2x128xf32>
    %203 = vector.extract_strided_slice %202 {offsets = [0, 0], sizes = [2, 32], strides = [1, 1]} : vector<2x128xf32> to vector<2x32xf32>
    %204 = arith.negf %203 : vector<2x32xf32>
    %205 = math.exp %204 : vector<2x32xf32>
    %cst_77 = arith.constant 1.000000e+00 : f32
    %206 = vector.broadcast %cst_77 : f32 to vector<2x32xf32>
    %207 = arith.addf %206, %205 : vector<2x32xf32>
    %208 = arith.divf %206, %207 : vector<2x32xf32>
    %209 = vector.extract_strided_slice %202 {offsets = [0, 32], sizes = [2, 32], strides = [1, 1]} : vector<2x128xf32> to vector<2x32xf32>
    %210 = arith.negf %209 : vector<2x32xf32>
    %211 = math.exp %210 : vector<2x32xf32>
    %cst_78 = arith.constant 1.000000e+00 : f32
    %212 = vector.broadcast %cst_78 : f32 to vector<2x32xf32>
    %213 = arith.addf %212, %211 : vector<2x32xf32>
    %214 = arith.divf %212, %213 : vector<2x32xf32>
    %215 = vector.extract_strided_slice %202 {offsets = [0, 64], sizes = [2, 32], strides = [1, 1]} : vector<2x128xf32> to vector<2x32xf32>
    %216 = math.tanh %215 : vector<2x32xf32>
    %217 = vector.extract_strided_slice %202 {offsets = [0, 96], sizes = [2, 32], strides = [1, 1]} : vector<2x128xf32> to vector<2x32xf32>
    %218 = arith.negf %217 : vector<2x32xf32>
    %219 = math.exp %218 : vector<2x32xf32>
    %cst_79 = arith.constant 1.000000e+00 : f32
    %220 = vector.broadcast %cst_79 : f32 to vector<2x32xf32>
    %221 = arith.addf %220, %219 : vector<2x32xf32>
    %222 = arith.divf %220, %221 : vector<2x32xf32>
    %223 = arith.mulf %214, %193 : vector<2x32xf32>
    %224 = arith.mulf %208, %216 : vector<2x32xf32>
    %225 = arith.addf %223, %224 : vector<2x32xf32>
    %226 = math.tanh %225 : vector<2x32xf32>
    %227 = arith.mulf %222, %226 : vector<2x32xf32>
    %c0_80 = arith.constant 0 : index
    %c6_81 = arith.constant 6 : index
    %c0_82 = arith.constant 0 : index
    %c0_83 = arith.constant 0 : index
    %228 = vector.load %arg4[%c0_80, %c6_81, %c0_82, %c0_83] : memref<1x8x2x32xf32, #tpu.memory_space<vmem>>, vector<1x1x2x32xf32>
    %229 = vector.shape_cast %228 : vector<1x1x2x32xf32> to vector<2x32xf32>
    %230 = vector.shape_cast %227 : vector<2x32xf32> to vector<1x1x2x32xf32>
    tpu.vector_store %arg4[%c0_80, %c6_81, %c0_82, %c0_83], %230 {strides = array<i32>} : memref<1x8x2x32xf32, #tpu.memory_space<vmem>>, vector<1x1x2x32xf32>,
    %c0_84 = arith.constant 0 : index
    %c7 = arith.constant 7 : index
    %c0_85 = arith.constant 0 : index
    %c0_86 = arith.constant 0 : index
    %231 = vector.load %arg2[%c0_84, %c7, %c0_85, %c0_86] : memref<1x8x2x128xf32, #tpu.memory_space<vmem>>, vector<1x1x2x128xf32>
    %232 = vector.shape_cast %231 : vector<1x1x2x128xf32> to vector<2x128xf32>
    %cst_87 = arith.constant dense<0.000000e+00> : vector<2x128xf32>
    %233 = tpu.matmul %227, %4, %cst_87 {dimension_numbers = #tpu.dot_dimension_numbers<[1], [0], [0], [1], [0, 0, 1, 1], [], []>} : vector<2x32xf32>, vector<32x128xf32>, vector<2x128xf32> -> vector<2x128xf32>
    %234 = arith.addf %232, %233 : vector<2x128xf32>
    %235 = vector.extract_strided_slice %234 {offsets = [0, 0], sizes = [2, 32], strides = [1, 1]} : vector<2x128xf32> to vector<2x32xf32>
    %236 = arith.negf %235 : vector<2x32xf32>
    %237 = math.exp %236 : vector<2x32xf32>
    %cst_88 = arith.constant 1.000000e+00 : f32
    %238 = vector.broadcast %cst_88 : f32 to vector<2x32xf32>
    %239 = arith.addf %238, %237 : vector<2x32xf32>
    %240 = arith.divf %238, %239 : vector<2x32xf32>
    %241 = vector.extract_strided_slice %234 {offsets = [0, 32], sizes = [2, 32], strides = [1, 1]} : vector<2x128xf32> to vector<2x32xf32>
    %242 = arith.negf %241 : vector<2x32xf32>
    %243 = math.exp %242 : vector<2x32xf32>
    %cst_89 = arith.constant 1.000000e+00 : f32
    %244 = vector.broadcast %cst_89 : f32 to vector<2x32xf32>
    %245 = arith.addf %244, %243 : vector<2x32xf32>
    %246 = arith.divf %244, %245 : vector<2x32xf32>
    %247 = vector.extract_strided_slice %234 {offsets = [0, 64], sizes = [2, 32], strides = [1, 1]} : vector<2x128xf32> to vector<2x32xf32>
    %248 = math.tanh %247 : vector<2x32xf32>
    %249 = vector.extract_strided_slice %234 {offsets = [0, 96], sizes = [2, 32], strides = [1, 1]} : vector<2x128xf32> to vector<2x32xf32>
    %250 = arith.negf %249 : vector<2x32xf32>
    %251 = math.exp %250 : vector<2x32xf32>
    %cst_90 = arith.constant 1.000000e+00 : f32
    %252 = vector.broadcast %cst_90 : f32 to vector<2x32xf32>
    %253 = arith.addf %252, %251 : vector<2x32xf32>
    %254 = arith.divf %252, %253 : vector<2x32xf32>
    %255 = arith.mulf %246, %225 : vector<2x32xf32>
    %256 = arith.mulf %240, %248 : vector<2x32xf32>
    %257 = arith.addf %255, %256 : vector<2x32xf32>
    %258 = math.tanh %257 : vector<2x32xf32>
    %259 = arith.mulf %254, %258 : vector<2x32xf32>
    %c0_91 = arith.constant 0 : index
    %c7_92 = arith.constant 7 : index
    %c0_93 = arith.constant 0 : index
    %c0_94 = arith.constant 0 : index
    %260 = vector.load %arg4[%c0_91, %c7_92, %c0_93, %c0_94] : memref<1x8x2x32xf32, #tpu.memory_space<vmem>>, vector<1x1x2x32xf32>
    %261 = vector.shape_cast %260 : vector<1x1x2x32xf32> to vector<2x32xf32>
    %262 = vector.shape_cast %259 : vector<2x32xf32> to vector<1x1x2x32xf32>
    tpu.vector_store %arg4[%c0_91, %c7_92, %c0_93, %c0_94], %262 {strides = array<i32>} : memref<1x8x2x32xf32, #tpu.memory_space<vmem>>, vector<1x1x2x32xf32>,
    %c0_95 = arith.constant 0 : index
    %c0_96 = arith.constant 0 : index
    %263 = vector.load %arg5[%c0_95, %c0_96] : memref<2x32xf32, #tpu.memory_space<vmem>>, vector<2x32xf32>
    tpu.vector_store %arg5[%c0_95, %c0_96], %259 {strides = array<i32>} : memref<2x32xf32, #tpu.memory_space<vmem>>, vector<2x32xf32>,
    %c0_97 = arith.constant 0 : index
    %c0_98 = arith.constant 0 : index
    %264 = vector.load %arg6[%c0_97, %c0_98] : memref<2x32xf32, #tpu.memory_space<vmem>>, vector<2x32xf32>
    tpu.vector_store %arg6[%c0_97, %c0_98], %257 {strides = array<i32>} : memref<2x32xf32, #tpu.memory_space<vmem>>, vector<2x32xf32>,
    return
  }
  func.func @transform_0(%arg0: i32, %arg1: i32) -> (i32, i32, i32, i32) {
    %c0_i32 = arith.constant 0 : i32
    %c0_i32_0 = arith.constant 0 : i32
    %c0_i32_1 = arith.constant 0 : i32
    return %arg0, %arg1, %c0_i32, %c0_i32_0 : i32, i32, i32, i32
  }
  func.func @transform_1(%arg0: i32, %arg1: i32) -> (i32, i32, i32) {
    %c0_i32 = arith.constant 0 : i32
    %c0_i32_0 = arith.constant 0 : i32
    %c0_i32_1 = arith.constant 0 : i32
    return %arg0, %c0_i32, %c0_i32_0 : i32, i32, i32
  }
  func.func @transform_2(%arg0: i32, %arg1: i32) -> (i32, i32, i32, i32) {
    %c0_i32 = arith.constant 0 : i32
    %c0_i32_0 = arith.constant 0 : i32
    %c0_i32_1 = arith.constant 0 : i32
    return %arg0, %arg1, %c0_i32, %c0_i32_0 : i32, i32, i32, i32
  }
}

module attributes {stable_mosaic.version = 11 : i64} {
  func.func @_batched_linear_kernel(%arg0: i32, %arg1: memref<1x16x64xf32, #tpu.memory_space<vmem>>, %arg2: memref<1x64x64xf32, #tpu.memory_space<vmem>>, %arg3: memref<1x1x64xf32, #tpu.memory_space<vmem>>, %arg4: memref<1x16x64xf32, #tpu.memory_space<vmem>>) attributes {dimension_semantics = [#tpu.dimension_semantics<parallel>], iteration_bounds = array<i64: 1>, scalar_prefetch = 0 : i64, scratch_operands = 0 : i64, tpu.core_type = #tpu.core_type<tc>, window_params = [{transform_indices = @transform_0, window_bounds = array<i64: 1, 16, 64>}, {transform_indices = @transform_1, window_bounds = array<i64: 1, 64, 64>}, {transform_indices = @transform_2, window_bounds = array<i64: 1, 1, 64>}, {transform_indices = @transform_3, window_bounds = array<i64: 1, 16, 64>}]} {
    %c0 = arith.constant 0 : index
    %c0_0 = arith.constant 0 : index
    %c0_1 = arith.constant 0 : index
    %0 = vector.load %arg1[%c0, %c0_0, %c0_1] : memref<1x16x64xf32, #tpu.memory_space<vmem>>, vector<1x16x64xf32>
    %1 = vector.shape_cast %0 : vector<1x16x64xf32> to vector<16x64xf32>
    %c0_2 = arith.constant 0 : index
    %c0_3 = arith.constant 0 : index
    %c0_4 = arith.constant 0 : index
    %2 = vector.load %arg2[%c0_2, %c0_3, %c0_4] : memref<1x64x64xf32, #tpu.memory_space<vmem>>, vector<1x64x64xf32>
    %3 = vector.shape_cast %2 : vector<1x64x64xf32> to vector<64x64xf32>
    %cst = arith.constant dense<0.000000e+00> : vector<16x64xf32>
    %4 = tpu.matmul %1, %3, %cst {dimension_numbers = #tpu.dot_dimension_numbers<[1], [0], [0], [1], [0, 0, 1, 1], [], []>} : vector<16x64xf32>, vector<64x64xf32>, vector<16x64xf32> -> vector<16x64xf32>
    %c0_5 = arith.constant 0 : index
    %c0_6 = arith.constant 0 : index
    %c0_7 = arith.constant 0 : index
    %5 = vector.load %arg3[%c0_5, %c0_6, %c0_7] : memref<1x1x64xf32, #tpu.memory_space<vmem>>, vector<1x1x64xf32>
    %6 = vector.shape_cast %5 : vector<1x1x64xf32> to vector<1x64xf32>
    %7 = vector.broadcast %6 : vector<1x64xf32> to vector<16x64xf32>
    %8 = arith.addf %4, %7 : vector<16x64xf32>
    %c0_8 = arith.constant 0 : index
    %c0_9 = arith.constant 0 : index
    %c0_10 = arith.constant 0 : index
    %9 = vector.load %arg4[%c0_8, %c0_9, %c0_10] : memref<1x16x64xf32, #tpu.memory_space<vmem>>, vector<1x16x64xf32>
    %10 = vector.shape_cast %9 : vector<1x16x64xf32> to vector<16x64xf32>
    %11 = vector.shape_cast %8 : vector<16x64xf32> to vector<1x16x64xf32>
    tpu.vector_store %arg4[%c0_8, %c0_9, %c0_10], %11 {strides = array<i32>} : memref<1x16x64xf32, #tpu.memory_space<vmem>>, vector<1x16x64xf32>,
    return
  }
  func.func @transform_0(%arg0: i32) -> (i32, i32, i32) {
    %c0_i32 = arith.constant 0 : i32
    %c0_i32_0 = arith.constant 0 : i32
    %c0_i32_1 = arith.constant 0 : i32
    return %arg0, %c0_i32, %c0_i32_0 : i32, i32, i32
  }
  func.func @transform_1(%arg0: i32) -> (i32, i32, i32) {
    %c0_i32 = arith.constant 0 : i32
    %c0_i32_0 = arith.constant 0 : i32
    %c0_i32_1 = arith.constant 0 : i32
    return %arg0, %c0_i32, %c0_i32_0 : i32, i32, i32
  }
  func.func @transform_2(%arg0: i32) -> (i32, i32, i32) {
    %c0_i32 = arith.constant 0 : i32
    %c0_i32_0 = arith.constant 0 : i32
    %c0_i32_1 = arith.constant 0 : i32
    return %arg0, %c0_i32, %c0_i32_0 : i32, i32, i32
  }
  func.func @transform_3(%arg0: i32) -> (i32, i32, i32) {
    %c0_i32 = arith.constant 0 : i32
    %c0_i32_0 = arith.constant 0 : i32
    %c0_i32_1 = arith.constant 0 : i32
    return %arg0, %c0_i32, %c0_i32_0 : i32, i32, i32
  }
}

module attributes {stable_mosaic.version = 11 : i64} {
  func.func @_lstm_fused_kernel(%arg0: i32, %arg1: i32, %arg2: memref<1x8x2x128xf32, #tpu.memory_space<vmem>>, %arg3: memref<1x32x128xf32, #tpu.memory_space<vmem>>, %arg4: memref<1x8x2x32xf32, #tpu.memory_space<vmem>>, %arg5: memref<2x32xf32, #tpu.memory_space<vmem>>, %arg6: memref<2x32xf32, #tpu.memory_space<vmem>>) attributes {dimension_semantics = [#tpu.dimension_semantics<parallel>, #tpu.dimension_semantics<arbitrary>], iteration_bounds = array<i64: 2, 1>, scalar_prefetch = 0 : i64, scratch_operands = 2 : i64, tpu.core_type = #tpu.core_type<tc>, window_params = [{transform_indices = @transform_0, window_bounds = array<i64: 1, 8, 2, 128>}, {transform_indices = @transform_1, window_bounds = array<i64: 1, 32, 128>}, {transform_indices = @transform_2, window_bounds = array<i64: 1, 8, 2, 32>}]} {
    %c0_i32 = arith.constant 0 : i32
    %0 = arith.cmpi eq, %arg1, %c0_i32 : i32
    %1 = arith.extui %0 : i1 to i32
    %c0_i32_0 = arith.constant 0 : i32
    %2 = arith.cmpi ne, %1, %c0_i32_0 : i32
    scf.if %2 {
      %cst_99 = arith.constant 0.000000e+00 : f32
      %265 = vector.broadcast %cst_99 : f32 to vector<2x32xf32>
      %c0_100 = arith.constant 0 : index
      %c0_101 = arith.constant 0 : index
      %266 = vector.load %arg5[%c0_100, %c0_101] : memref<2x32xf32, #tpu.memory_space<vmem>>, vector<2x32xf32>
      tpu.vector_store %arg5[%c0_100, %c0_101], %265 {strides = array<i32>} : memref<2x32xf32, #tpu.memory_space<vmem>>, vector<2x32xf32>,
      %cst_102 = arith.constant 0.000000e+00 : f32
      %267 = vector.broadcast %cst_102 : f32 to vector<2x32xf32>
      %c0_103 = arith.constant 0 : index
      %c0_104 = arith.constant 0 : index
      %268 = vector.load %arg6[%c0_103, %c0_104] : memref<2x32xf32, #tpu.memory_space<vmem>>, vector<2x32xf32>
      tpu.vector_store %arg6[%c0_103, %c0_104], %267 {strides = array<i32>} : memref<2x32xf32, #tpu.memory_space<vmem>>, vector<2x32xf32>,
    } else {
    }
    %c0 = arith.constant 0 : index
    %c0_1 = arith.constant 0 : index
    %c0_2 = arith.constant 0 : index
    %3 = vector.load %arg3[%c0, %c0_1, %c0_2] : memref<1x32x128xf32, #tpu.memory_space<vmem>>, vector<1x32x128xf32>
    %4 = vector.shape_cast %3 : vector<1x32x128xf32> to vector<32x128xf32>
    %c0_3 = arith.constant 0 : index
    %c0_4 = arith.constant 0 : index
    %5 = vector.load %arg5[%c0_3, %c0_4] : memref<2x32xf32, #tpu.memory_space<vmem>>, vector<2x32xf32>
    %c0_5 = arith.constant 0 : index
    %c0_6 = arith.constant 0 : index
    %6 = vector.load %arg6[%c0_5, %c0_6] : memref<2x32xf32, #tpu.memory_space<vmem>>, vector<2x32xf32>
    %c0_7 = arith.constant 0 : index
    %c0_8 = arith.constant 0 : index
    %c0_9 = arith.constant 0 : index
    %c0_10 = arith.constant 0 : index
    %7 = vector.load %arg2[%c0_7, %c0_8, %c0_9, %c0_10] : memref<1x8x2x128xf32, #tpu.memory_space<vmem>>, vector<1x1x2x128xf32>
    %8 = vector.shape_cast %7 : vector<1x1x2x128xf32> to vector<2x128xf32>
    %cst = arith.constant dense<0.000000e+00> : vector<2x128xf32>
    %9 = tpu.matmul %5, %4, %cst {dimension_numbers = #tpu.dot_dimension_numbers<[1], [0], [0], [1], [0, 0, 1, 1], [], []>} : vector<2x32xf32>, vector<32x128xf32>, vector<2x128xf32> -> vector<2x128xf32>
    %10 = arith.addf %8, %9 : vector<2x128xf32>
    %11 = vector.extract_strided_slice %10 {offsets = [0, 0], sizes = [2, 32], strides = [1, 1]} : vector<2x128xf32> to vector<2x32xf32>
    %12 = arith.negf %11 : vector<2x32xf32>
    %13 = math.exp %12 : vector<2x32xf32>
    %cst_11 = arith.constant 1.000000e+00 : f32
    %14 = vector.broadcast %cst_11 : f32 to vector<2x32xf32>
    %15 = arith.addf %14, %13 : vector<2x32xf32>
    %16 = arith.divf %14, %15 : vector<2x32xf32>
    %17 = vector.extract_strided_slice %10 {offsets = [0, 32], sizes = [2, 32], strides = [1, 1]} : vector<2x128xf32> to vector<2x32xf32>
    %18 = arith.negf %17 : vector<2x32xf32>
    %19 = math.exp %18 : vector<2x32xf32>
    %cst_12 = arith.constant 1.000000e+00 : f32
    %20 = vector.broadcast %cst_12 : f32 to vector<2x32xf32>
    %21 = arith.addf %20, %19 : vector<2x32xf32>
    %22 = arith.divf %20, %21 : vector<2x32xf32>
    %23 = vector.extract_strided_slice %10 {offsets = [0, 64], sizes = [2, 32], strides = [1, 1]} : vector<2x128xf32> to vector<2x32xf32>
    %24 = math.tanh %23 : vector<2x32xf32>
    %25 = vector.extract_strided_slice %10 {offsets = [0, 96], sizes = [2, 32], strides = [1, 1]} : vector<2x128xf32> to vector<2x32xf32>
    %26 = arith.negf %25 : vector<2x32xf32>
    %27 = math.exp %26 : vector<2x32xf32>
    %cst_13 = arith.constant 1.000000e+00 : f32
    %28 = vector.broadcast %cst_13 : f32 to vector<2x32xf32>
    %29 = arith.addf %28, %27 : vector<2x32xf32>
    %30 = arith.divf %28, %29 : vector<2x32xf32>
    %31 = arith.mulf %22, %6 : vector<2x32xf32>
    %32 = arith.mulf %16, %24 : vector<2x32xf32>
    %33 = arith.addf %31, %32 : vector<2x32xf32>
    %34 = math.tanh %33 : vector<2x32xf32>
    %35 = arith.mulf %30, %34 : vector<2x32xf32>
    %c0_14 = arith.constant 0 : index
    %c0_15 = arith.constant 0 : index
    %c0_16 = arith.constant 0 : index
    %c0_17 = arith.constant 0 : index
    %36 = vector.load %arg4[%c0_14, %c0_15, %c0_16, %c0_17] : memref<1x8x2x32xf32, #tpu.memory_space<vmem>>, vector<1x1x2x32xf32>
    %37 = vector.shape_cast %36 : vector<1x1x2x32xf32> to vector<2x32xf32>
    %38 = vector.shape_cast %35 : vector<2x32xf32> to vector<1x1x2x32xf32>
    tpu.vector_store %arg4[%c0_14, %c0_15, %c0_16, %c0_17], %38 {strides = array<i32>} : memref<1x8x2x32xf32, #tpu.memory_space<vmem>>, vector<1x1x2x32xf32>,
    %c0_18 = arith.constant 0 : index
    %c1 = arith.constant 1 : index
    %c0_19 = arith.constant 0 : index
    %c0_20 = arith.constant 0 : index
    %39 = vector.load %arg2[%c0_18, %c1, %c0_19, %c0_20] : memref<1x8x2x128xf32, #tpu.memory_space<vmem>>, vector<1x1x2x128xf32>
    %40 = vector.shape_cast %39 : vector<1x1x2x128xf32> to vector<2x128xf32>
    %cst_21 = arith.constant dense<0.000000e+00> : vector<2x128xf32>
    %41 = tpu.matmul %35, %4, %cst_21 {dimension_numbers = #tpu.dot_dimension_numbers<[1], [0], [0], [1], [0, 0, 1, 1], [], []>} : vector<2x32xf32>, vector<32x128xf32>, vector<2x128xf32> -> vector<2x128xf32>
    %42 = arith.addf %40, %41 : vector<2x128xf32>
    %43 = vector.extract_strided_slice %42 {offsets = [0, 0], sizes = [2, 32], strides = [1, 1]} : vector<2x128xf32> to vector<2x32xf32>
    %44 = arith.negf %43 : vector<2x32xf32>
    %45 = math.exp %44 : vector<2x32xf32>
    %cst_22 = arith.constant 1.000000e+00 : f32
    %46 = vector.broadcast %cst_22 : f32 to vector<2x32xf32>
    %47 = arith.addf %46, %45 : vector<2x32xf32>
    %48 = arith.divf %46, %47 : vector<2x32xf32>
    %49 = vector.extract_strided_slice %42 {offsets = [0, 32], sizes = [2, 32], strides = [1, 1]} : vector<2x128xf32> to vector<2x32xf32>
    %50 = arith.negf %49 : vector<2x32xf32>
    %51 = math.exp %50 : vector<2x32xf32>
    %cst_23 = arith.constant 1.000000e+00 : f32
    %52 = vector.broadcast %cst_23 : f32 to vector<2x32xf32>
    %53 = arith.addf %52, %51 : vector<2x32xf32>
    %54 = arith.divf %52, %53 : vector<2x32xf32>
    %55 = vector.extract_strided_slice %42 {offsets = [0, 64], sizes = [2, 32], strides = [1, 1]} : vector<2x128xf32> to vector<2x32xf32>
    %56 = math.tanh %55 : vector<2x32xf32>
    %57 = vector.extract_strided_slice %42 {offsets = [0, 96], sizes = [2, 32], strides = [1, 1]} : vector<2x128xf32> to vector<2x32xf32>
    %58 = arith.negf %57 : vector<2x32xf32>
    %59 = math.exp %58 : vector<2x32xf32>
    %cst_24 = arith.constant 1.000000e+00 : f32
    %60 = vector.broadcast %cst_24 : f32 to vector<2x32xf32>
    %61 = arith.addf %60, %59 : vector<2x32xf32>
    %62 = arith.divf %60, %61 : vector<2x32xf32>
    %63 = arith.mulf %54, %33 : vector<2x32xf32>
    %64 = arith.mulf %48, %56 : vector<2x32xf32>
    %65 = arith.addf %63, %64 : vector<2x32xf32>
    %66 = math.tanh %65 : vector<2x32xf32>
    %67 = arith.mulf %62, %66 : vector<2x32xf32>
    %c0_25 = arith.constant 0 : index
    %c1_26 = arith.constant 1 : index
    %c0_27 = arith.constant 0 : index
    %c0_28 = arith.constant 0 : index
    %68 = vector.load %arg4[%c0_25, %c1_26, %c0_27, %c0_28] : memref<1x8x2x32xf32, #tpu.memory_space<vmem>>, vector<1x1x2x32xf32>
    %69 = vector.shape_cast %68 : vector<1x1x2x32xf32> to vector<2x32xf32>
    %70 = vector.shape_cast %67 : vector<2x32xf32> to vector<1x1x2x32xf32>
    tpu.vector_store %arg4[%c0_25, %c1_26, %c0_27, %c0_28], %70 {strides = array<i32>} : memref<1x8x2x32xf32, #tpu.memory_space<vmem>>, vector<1x1x2x32xf32>,
    %c0_29 = arith.constant 0 : index
    %c2 = arith.constant 2 : index
    %c0_30 = arith.constant 0 : index
    %c0_31 = arith.constant 0 : index
    %71 = vector.load %arg2[%c0_29, %c2, %c0_30, %c0_31] : memref<1x8x2x128xf32, #tpu.memory_space<vmem>>, vector<1x1x2x128xf32>
    %72 = vector.shape_cast %71 : vector<1x1x2x128xf32> to vector<2x128xf32>
    %cst_32 = arith.constant dense<0.000000e+00> : vector<2x128xf32>
    %73 = tpu.matmul %67, %4, %cst_32 {dimension_numbers = #tpu.dot_dimension_numbers<[1], [0], [0], [1], [0, 0, 1, 1], [], []>} : vector<2x32xf32>, vector<32x128xf32>, vector<2x128xf32> -> vector<2x128xf32>
    %74 = arith.addf %72, %73 : vector<2x128xf32>
    %75 = vector.extract_strided_slice %74 {offsets = [0, 0], sizes = [2, 32], strides = [1, 1]} : vector<2x128xf32> to vector<2x32xf32>
    %76 = arith.negf %75 : vector<2x32xf32>
    %77 = math.exp %76 : vector<2x32xf32>
    %cst_33 = arith.constant 1.000000e+00 : f32
    %78 = vector.broadcast %cst_33 : f32 to vector<2x32xf32>
    %79 = arith.addf %78, %77 : vector<2x32xf32>
    %80 = arith.divf %78, %79 : vector<2x32xf32>
    %81 = vector.extract_strided_slice %74 {offsets = [0, 32], sizes = [2, 32], strides = [1, 1]} : vector<2x128xf32> to vector<2x32xf32>
    %82 = arith.negf %81 : vector<2x32xf32>
    %83 = math.exp %82 : vector<2x32xf32>
    %cst_34 = arith.constant 1.000000e+00 : f32
    %84 = vector.broadcast %cst_34 : f32 to vector<2x32xf32>
    %85 = arith.addf %84, %83 : vector<2x32xf32>
    %86 = arith.divf %84, %85 : vector<2x32xf32>
    %87 = vector.extract_strided_slice %74 {offsets = [0, 64], sizes = [2, 32], strides = [1, 1]} : vector<2x128xf32> to vector<2x32xf32>
    %88 = math.tanh %87 : vector<2x32xf32>
    %89 = vector.extract_strided_slice %74 {offsets = [0, 96], sizes = [2, 32], strides = [1, 1]} : vector<2x128xf32> to vector<2x32xf32>
    %90 = arith.negf %89 : vector<2x32xf32>
    %91 = math.exp %90 : vector<2x32xf32>
    %cst_35 = arith.constant 1.000000e+00 : f32
    %92 = vector.broadcast %cst_35 : f32 to vector<2x32xf32>
    %93 = arith.addf %92, %91 : vector<2x32xf32>
    %94 = arith.divf %92, %93 : vector<2x32xf32>
    %95 = arith.mulf %86, %65 : vector<2x32xf32>
    %96 = arith.mulf %80, %88 : vector<2x32xf32>
    %97 = arith.addf %95, %96 : vector<2x32xf32>
    %98 = math.tanh %97 : vector<2x32xf32>
    %99 = arith.mulf %94, %98 : vector<2x32xf32>
    %c0_36 = arith.constant 0 : index
    %c2_37 = arith.constant 2 : index
    %c0_38 = arith.constant 0 : index
    %c0_39 = arith.constant 0 : index
    %100 = vector.load %arg4[%c0_36, %c2_37, %c0_38, %c0_39] : memref<1x8x2x32xf32, #tpu.memory_space<vmem>>, vector<1x1x2x32xf32>
    %101 = vector.shape_cast %100 : vector<1x1x2x32xf32> to vector<2x32xf32>
    %102 = vector.shape_cast %99 : vector<2x32xf32> to vector<1x1x2x32xf32>
    tpu.vector_store %arg4[%c0_36, %c2_37, %c0_38, %c0_39], %102 {strides = array<i32>} : memref<1x8x2x32xf32, #tpu.memory_space<vmem>>, vector<1x1x2x32xf32>,
    %c0_40 = arith.constant 0 : index
    %c3 = arith.constant 3 : index
    %c0_41 = arith.constant 0 : index
    %c0_42 = arith.constant 0 : index
    %103 = vector.load %arg2[%c0_40, %c3, %c0_41, %c0_42] : memref<1x8x2x128xf32, #tpu.memory_space<vmem>>, vector<1x1x2x128xf32>
    %104 = vector.shape_cast %103 : vector<1x1x2x128xf32> to vector<2x128xf32>
    %cst_43 = arith.constant dense<0.000000e+00> : vector<2x128xf32>
    %105 = tpu.matmul %99, %4, %cst_43 {dimension_numbers = #tpu.dot_dimension_numbers<[1], [0], [0], [1], [0, 0, 1, 1], [], []>} : vector<2x32xf32>, vector<32x128xf32>, vector<2x128xf32> -> vector<2x128xf32>
    %106 = arith.addf %104, %105 : vector<2x128xf32>
    %107 = vector.extract_strided_slice %106 {offsets = [0, 0], sizes = [2, 32], strides = [1, 1]} : vector<2x128xf32> to vector<2x32xf32>
    %108 = arith.negf %107 : vector<2x32xf32>
    %109 = math.exp %108 : vector<2x32xf32>
    %cst_44 = arith.constant 1.000000e+00 : f32
    %110 = vector.broadcast %cst_44 : f32 to vector<2x32xf32>
    %111 = arith.addf %110, %109 : vector<2x32xf32>
    %112 = arith.divf %110, %111 : vector<2x32xf32>
    %113 = vector.extract_strided_slice %106 {offsets = [0, 32], sizes = [2, 32], strides = [1, 1]} : vector<2x128xf32> to vector<2x32xf32>
    %114 = arith.negf %113 : vector<2x32xf32>
    %115 = math.exp %114 : vector<2x32xf32>
    %cst_45 = arith.constant 1.000000e+00 : f32
    %116 = vector.broadcast %cst_45 : f32 to vector<2x32xf32>
    %117 = arith.addf %116, %115 : vector<2x32xf32>
    %118 = arith.divf %116, %117 : vector<2x32xf32>
    %119 = vector.extract_strided_slice %106 {offsets = [0, 64], sizes = [2, 32], strides = [1, 1]} : vector<2x128xf32> to vector<2x32xf32>
    %120 = math.tanh %119 : vector<2x32xf32>
    %121 = vector.extract_strided_slice %106 {offsets = [0, 96], sizes = [2, 32], strides = [1, 1]} : vector<2x128xf32> to vector<2x32xf32>
    %122 = arith.negf %121 : vector<2x32xf32>
    %123 = math.exp %122 : vector<2x32xf32>
    %cst_46 = arith.constant 1.000000e+00 : f32
    %124 = vector.broadcast %cst_46 : f32 to vector<2x32xf32>
    %125 = arith.addf %124, %123 : vector<2x32xf32>
    %126 = arith.divf %124, %125 : vector<2x32xf32>
    %127 = arith.mulf %118, %97 : vector<2x32xf32>
    %128 = arith.mulf %112, %120 : vector<2x32xf32>
    %129 = arith.addf %127, %128 : vector<2x32xf32>
    %130 = math.tanh %129 : vector<2x32xf32>
    %131 = arith.mulf %126, %130 : vector<2x32xf32>
    %c0_47 = arith.constant 0 : index
    %c3_48 = arith.constant 3 : index
    %c0_49 = arith.constant 0 : index
    %c0_50 = arith.constant 0 : index
    %132 = vector.load %arg4[%c0_47, %c3_48, %c0_49, %c0_50] : memref<1x8x2x32xf32, #tpu.memory_space<vmem>>, vector<1x1x2x32xf32>
    %133 = vector.shape_cast %132 : vector<1x1x2x32xf32> to vector<2x32xf32>
    %134 = vector.shape_cast %131 : vector<2x32xf32> to vector<1x1x2x32xf32>
    tpu.vector_store %arg4[%c0_47, %c3_48, %c0_49, %c0_50], %134 {strides = array<i32>} : memref<1x8x2x32xf32, #tpu.memory_space<vmem>>, vector<1x1x2x32xf32>,
    %c0_51 = arith.constant 0 : index
    %c4 = arith.constant 4 : index
    %c0_52 = arith.constant 0 : index
    %c0_53 = arith.constant 0 : index
    %135 = vector.load %arg2[%c0_51, %c4, %c0_52, %c0_53] : memref<1x8x2x128xf32, #tpu.memory_space<vmem>>, vector<1x1x2x128xf32>
    %136 = vector.shape_cast %135 : vector<1x1x2x128xf32> to vector<2x128xf32>
    %cst_54 = arith.constant dense<0.000000e+00> : vector<2x128xf32>
    %137 = tpu.matmul %131, %4, %cst_54 {dimension_numbers = #tpu.dot_dimension_numbers<[1], [0], [0], [1], [0, 0, 1, 1], [], []>} : vector<2x32xf32>, vector<32x128xf32>, vector<2x128xf32> -> vector<2x128xf32>
    %138 = arith.addf %136, %137 : vector<2x128xf32>
    %139 = vector.extract_strided_slice %138 {offsets = [0, 0], sizes = [2, 32], strides = [1, 1]} : vector<2x128xf32> to vector<2x32xf32>
    %140 = arith.negf %139 : vector<2x32xf32>
    %141 = math.exp %140 : vector<2x32xf32>
    %cst_55 = arith.constant 1.000000e+00 : f32
    %142 = vector.broadcast %cst_55 : f32 to vector<2x32xf32>
    %143 = arith.addf %142, %141 : vector<2x32xf32>
    %144 = arith.divf %142, %143 : vector<2x32xf32>
    %145 = vector.extract_strided_slice %138 {offsets = [0, 32], sizes = [2, 32], strides = [1, 1]} : vector<2x128xf32> to vector<2x32xf32>
    %146 = arith.negf %145 : vector<2x32xf32>
    %147 = math.exp %146 : vector<2x32xf32>
    %cst_56 = arith.constant 1.000000e+00 : f32
    %148 = vector.broadcast %cst_56 : f32 to vector<2x32xf32>
    %149 = arith.addf %148, %147 : vector<2x32xf32>
    %150 = arith.divf %148, %149 : vector<2x32xf32>
    %151 = vector.extract_strided_slice %138 {offsets = [0, 64], sizes = [2, 32], strides = [1, 1]} : vector<2x128xf32> to vector<2x32xf32>
    %152 = math.tanh %151 : vector<2x32xf32>
    %153 = vector.extract_strided_slice %138 {offsets = [0, 96], sizes = [2, 32], strides = [1, 1]} : vector<2x128xf32> to vector<2x32xf32>
    %154 = arith.negf %153 : vector<2x32xf32>
    %155 = math.exp %154 : vector<2x32xf32>
    %cst_57 = arith.constant 1.000000e+00 : f32
    %156 = vector.broadcast %cst_57 : f32 to vector<2x32xf32>
    %157 = arith.addf %156, %155 : vector<2x32xf32>
    %158 = arith.divf %156, %157 : vector<2x32xf32>
    %159 = arith.mulf %150, %129 : vector<2x32xf32>
    %160 = arith.mulf %144, %152 : vector<2x32xf32>
    %161 = arith.addf %159, %160 : vector<2x32xf32>
    %162 = math.tanh %161 : vector<2x32xf32>
    %163 = arith.mulf %158, %162 : vector<2x32xf32>
    %c0_58 = arith.constant 0 : index
    %c4_59 = arith.constant 4 : index
    %c0_60 = arith.constant 0 : index
    %c0_61 = arith.constant 0 : index
    %164 = vector.load %arg4[%c0_58, %c4_59, %c0_60, %c0_61] : memref<1x8x2x32xf32, #tpu.memory_space<vmem>>, vector<1x1x2x32xf32>
    %165 = vector.shape_cast %164 : vector<1x1x2x32xf32> to vector<2x32xf32>
    %166 = vector.shape_cast %163 : vector<2x32xf32> to vector<1x1x2x32xf32>
    tpu.vector_store %arg4[%c0_58, %c4_59, %c0_60, %c0_61], %166 {strides = array<i32>} : memref<1x8x2x32xf32, #tpu.memory_space<vmem>>, vector<1x1x2x32xf32>,
    %c0_62 = arith.constant 0 : index
    %c5 = arith.constant 5 : index
    %c0_63 = arith.constant 0 : index
    %c0_64 = arith.constant 0 : index
    %167 = vector.load %arg2[%c0_62, %c5, %c0_63, %c0_64] : memref<1x8x2x128xf32, #tpu.memory_space<vmem>>, vector<1x1x2x128xf32>
    %168 = vector.shape_cast %167 : vector<1x1x2x128xf32> to vector<2x128xf32>
    %cst_65 = arith.constant dense<0.000000e+00> : vector<2x128xf32>
    %169 = tpu.matmul %163, %4, %cst_65 {dimension_numbers = #tpu.dot_dimension_numbers<[1], [0], [0], [1], [0, 0, 1, 1], [], []>} : vector<2x32xf32>, vector<32x128xf32>, vector<2x128xf32> -> vector<2x128xf32>
    %170 = arith.addf %168, %169 : vector<2x128xf32>
    %171 = vector.extract_strided_slice %170 {offsets = [0, 0], sizes = [2, 32], strides = [1, 1]} : vector<2x128xf32> to vector<2x32xf32>
    %172 = arith.negf %171 : vector<2x32xf32>
    %173 = math.exp %172 : vector<2x32xf32>
    %cst_66 = arith.constant 1.000000e+00 : f32
    %174 = vector.broadcast %cst_66 : f32 to vector<2x32xf32>
    %175 = arith.addf %174, %173 : vector<2x32xf32>
    %176 = arith.divf %174, %175 : vector<2x32xf32>
    %177 = vector.extract_strided_slice %170 {offsets = [0, 32], sizes = [2, 32], strides = [1, 1]} : vector<2x128xf32> to vector<2x32xf32>
    %178 = arith.negf %177 : vector<2x32xf32>
    %179 = math.exp %178 : vector<2x32xf32>
    %cst_67 = arith.constant 1.000000e+00 : f32
    %180 = vector.broadcast %cst_67 : f32 to vector<2x32xf32>
    %181 = arith.addf %180, %179 : vector<2x32xf32>
    %182 = arith.divf %180, %181 : vector<2x32xf32>
    %183 = vector.extract_strided_slice %170 {offsets = [0, 64], sizes = [2, 32], strides = [1, 1]} : vector<2x128xf32> to vector<2x32xf32>
    %184 = math.tanh %183 : vector<2x32xf32>
    %185 = vector.extract_strided_slice %170 {offsets = [0, 96], sizes = [2, 32], strides = [1, 1]} : vector<2x128xf32> to vector<2x32xf32>
    %186 = arith.negf %185 : vector<2x32xf32>
    %187 = math.exp %186 : vector<2x32xf32>
    %cst_68 = arith.constant 1.000000e+00 : f32
    %188 = vector.broadcast %cst_68 : f32 to vector<2x32xf32>
    %189 = arith.addf %188, %187 : vector<2x32xf32>
    %190 = arith.divf %188, %189 : vector<2x32xf32>
    %191 = arith.mulf %182, %161 : vector<2x32xf32>
    %192 = arith.mulf %176, %184 : vector<2x32xf32>
    %193 = arith.addf %191, %192 : vector<2x32xf32>
    %194 = math.tanh %193 : vector<2x32xf32>
    %195 = arith.mulf %190, %194 : vector<2x32xf32>
    %c0_69 = arith.constant 0 : index
    %c5_70 = arith.constant 5 : index
    %c0_71 = arith.constant 0 : index
    %c0_72 = arith.constant 0 : index
    %196 = vector.load %arg4[%c0_69, %c5_70, %c0_71, %c0_72] : memref<1x8x2x32xf32, #tpu.memory_space<vmem>>, vector<1x1x2x32xf32>
    %197 = vector.shape_cast %196 : vector<1x1x2x32xf32> to vector<2x32xf32>
    %198 = vector.shape_cast %195 : vector<2x32xf32> to vector<1x1x2x32xf32>
    tpu.vector_store %arg4[%c0_69, %c5_70, %c0_71, %c0_72], %198 {strides = array<i32>} : memref<1x8x2x32xf32, #tpu.memory_space<vmem>>, vector<1x1x2x32xf32>,
    %c0_73 = arith.constant 0 : index
    %c6 = arith.constant 6 : index
    %c0_74 = arith.constant 0 : index
    %c0_75 = arith.constant 0 : index
    %199 = vector.load %arg2[%c0_73, %c6, %c0_74, %c0_75] : memref<1x8x2x128xf32, #tpu.memory_space<vmem>>, vector<1x1x2x128xf32>
    %200 = vector.shape_cast %199 : vector<1x1x2x128xf32> to vector<2x128xf32>
    %cst_76 = arith.constant dense<0.000000e+00> : vector<2x128xf32>
    %201 = tpu.matmul %195, %4, %cst_76 {dimension_numbers = #tpu.dot_dimension_numbers<[1], [0], [0], [1], [0, 0, 1, 1], [], []>} : vector<2x32xf32>, vector<32x128xf32>, vector<2x128xf32> -> vector<2x128xf32>
    %202 = arith.addf %200, %201 : vector<2x128xf32>
    %203 = vector.extract_strided_slice %202 {offsets = [0, 0], sizes = [2, 32], strides = [1, 1]} : vector<2x128xf32> to vector<2x32xf32>
    %204 = arith.negf %203 : vector<2x32xf32>
    %205 = math.exp %204 : vector<2x32xf32>
    %cst_77 = arith.constant 1.000000e+00 : f32
    %206 = vector.broadcast %cst_77 : f32 to vector<2x32xf32>
    %207 = arith.addf %206, %205 : vector<2x32xf32>
    %208 = arith.divf %206, %207 : vector<2x32xf32>
    %209 = vector.extract_strided_slice %202 {offsets = [0, 32], sizes = [2, 32], strides = [1, 1]} : vector<2x128xf32> to vector<2x32xf32>
    %210 = arith.negf %209 : vector<2x32xf32>
    %211 = math.exp %210 : vector<2x32xf32>
    %cst_78 = arith.constant 1.000000e+00 : f32
    %212 = vector.broadcast %cst_78 : f32 to vector<2x32xf32>
    %213 = arith.addf %212, %211 : vector<2x32xf32>
    %214 = arith.divf %212, %213 : vector<2x32xf32>
    %215 = vector.extract_strided_slice %202 {offsets = [0, 64], sizes = [2, 32], strides = [1, 1]} : vector<2x128xf32> to vector<2x32xf32>
    %216 = math.tanh %215 : vector<2x32xf32>
    %217 = vector.extract_strided_slice %202 {offsets = [0, 96], sizes = [2, 32], strides = [1, 1]} : vector<2x128xf32> to vector<2x32xf32>
    %218 = arith.negf %217 : vector<2x32xf32>
    %219 = math.exp %218 : vector<2x32xf32>
    %cst_79 = arith.constant 1.000000e+00 : f32
    %220 = vector.broadcast %cst_79 : f32 to vector<2x32xf32>
    %221 = arith.addf %220, %219 : vector<2x32xf32>
    %222 = arith.divf %220, %221 : vector<2x32xf32>
    %223 = arith.mulf %214, %193 : vector<2x32xf32>
    %224 = arith.mulf %208, %216 : vector<2x32xf32>
    %225 = arith.addf %223, %224 : vector<2x32xf32>
    %226 = math.tanh %225 : vector<2x32xf32>
    %227 = arith.mulf %222, %226 : vector<2x32xf32>
    %c0_80 = arith.constant 0 : index
    %c6_81 = arith.constant 6 : index
    %c0_82 = arith.constant 0 : index
    %c0_83 = arith.constant 0 : index
    %228 = vector.load %arg4[%c0_80, %c6_81, %c0_82, %c0_83] : memref<1x8x2x32xf32, #tpu.memory_space<vmem>>, vector<1x1x2x32xf32>
    %229 = vector.shape_cast %228 : vector<1x1x2x32xf32> to vector<2x32xf32>
    %230 = vector.shape_cast %227 : vector<2x32xf32> to vector<1x1x2x32xf32>
    tpu.vector_store %arg4[%c0_80, %c6_81, %c0_82, %c0_83], %230 {strides = array<i32>} : memref<1x8x2x32xf32, #tpu.memory_space<vmem>>, vector<1x1x2x32xf32>,
    %c0_84 = arith.constant 0 : index
    %c7 = arith.constant 7 : index
    %c0_85 = arith.constant 0 : index
    %c0_86 = arith.constant 0 : index
    %231 = vector.load %arg2[%c0_84, %c7, %c0_85, %c0_86] : memref<1x8x2x128xf32, #tpu.memory_space<vmem>>, vector<1x1x2x128xf32>
    %232 = vector.shape_cast %231 : vector<1x1x2x128xf32> to vector<2x128xf32>
    %cst_87 = arith.constant dense<0.000000e+00> : vector<2x128xf32>
    %233 = tpu.matmul %227, %4, %cst_87 {dimension_numbers = #tpu.dot_dimension_numbers<[1], [0], [0], [1], [0, 0, 1, 1], [], []>} : vector<2x32xf32>, vector<32x128xf32>, vector<2x128xf32> -> vector<2x128xf32>
    %234 = arith.addf %232, %233 : vector<2x128xf32>
    %235 = vector.extract_strided_slice %234 {offsets = [0, 0], sizes = [2, 32], strides = [1, 1]} : vector<2x128xf32> to vector<2x32xf32>
    %236 = arith.negf %235 : vector<2x32xf32>
    %237 = math.exp %236 : vector<2x32xf32>
    %cst_88 = arith.constant 1.000000e+00 : f32
    %238 = vector.broadcast %cst_88 : f32 to vector<2x32xf32>
    %239 = arith.addf %238, %237 : vector<2x32xf32>
    %240 = arith.divf %238, %239 : vector<2x32xf32>
    %241 = vector.extract_strided_slice %234 {offsets = [0, 32], sizes = [2, 32], strides = [1, 1]} : vector<2x128xf32> to vector<2x32xf32>
    %242 = arith.negf %241 : vector<2x32xf32>
    %243 = math.exp %242 : vector<2x32xf32>
    %cst_89 = arith.constant 1.000000e+00 : f32
    %244 = vector.broadcast %cst_89 : f32 to vector<2x32xf32>
    %245 = arith.addf %244, %243 : vector<2x32xf32>
    %246 = arith.divf %244, %245 : vector<2x32xf32>
    %247 = vector.extract_strided_slice %234 {offsets = [0, 64], sizes = [2, 32], strides = [1, 1]} : vector<2x128xf32> to vector<2x32xf32>
    %248 = math.tanh %247 : vector<2x32xf32>
    %249 = vector.extract_strided_slice %234 {offsets = [0, 96], sizes = [2, 32], strides = [1, 1]} : vector<2x128xf32> to vector<2x32xf32>
    %250 = arith.negf %249 : vector<2x32xf32>
    %251 = math.exp %250 : vector<2x32xf32>
    %cst_90 = arith.constant 1.000000e+00 : f32
    %252 = vector.broadcast %cst_90 : f32 to vector<2x32xf32>
    %253 = arith.addf %252, %251 : vector<2x32xf32>
    %254 = arith.divf %252, %253 : vector<2x32xf32>
    %255 = arith.mulf %246, %225 : vector<2x32xf32>
    %256 = arith.mulf %240, %248 : vector<2x32xf32>
    %257 = arith.addf %255, %256 : vector<2x32xf32>
    %258 = math.tanh %257 : vector<2x32xf32>
    %259 = arith.mulf %254, %258 : vector<2x32xf32>
    %c0_91 = arith.constant 0 : index
    %c7_92 = arith.constant 7 : index
    %c0_93 = arith.constant 0 : index
    %c0_94 = arith.constant 0 : index
    %260 = vector.load %arg4[%c0_91, %c7_92, %c0_93, %c0_94] : memref<1x8x2x32xf32, #tpu.memory_space<vmem>>, vector<1x1x2x32xf32>
    %261 = vector.shape_cast %260 : vector<1x1x2x32xf32> to vector<2x32xf32>
    %262 = vector.shape_cast %259 : vector<2x32xf32> to vector<1x1x2x32xf32>
    tpu.vector_store %arg4[%c0_91, %c7_92, %c0_93, %c0_94], %262 {strides = array<i32>} : memref<1x8x2x32xf32, #tpu.memory_space<vmem>>, vector<1x1x2x32xf32>,
    %c0_95 = arith.constant 0 : index
    %c0_96 = arith.constant 0 : index
    %263 = vector.load %arg5[%c0_95, %c0_96] : memref<2x32xf32, #tpu.memory_space<vmem>>, vector<2x32xf32>
    tpu.vector_store %arg5[%c0_95, %c0_96], %259 {strides = array<i32>} : memref<2x32xf32, #tpu.memory_space<vmem>>, vector<2x32xf32>,
    %c0_97 = arith.constant 0 : index
    %c0_98 = arith.constant 0 : index
    %264 = vector.load %arg6[%c0_97, %c0_98] : memref<2x32xf32, #tpu.memory_space<vmem>>, vector<2x32xf32>
    tpu.vector_store %arg6[%c0_97, %c0_98], %257 {strides = array<i32>} : memref<2x32xf32, #tpu.memory_space<vmem>>, vector<2x32xf32>,
    return
  }
  func.func @transform_0(%arg0: i32, %arg1: i32) -> (i32, i32, i32, i32) {
    %c0_i32 = arith.constant 0 : i32
    %c0_i32_0 = arith.constant 0 : i32
    %c0_i32_1 = arith.constant 0 : i32
    return %arg0, %arg1, %c0_i32, %c0_i32_0 : i32, i32, i32, i32
  }
  func.func @transform_1(%arg0: i32, %arg1: i32) -> (i32, i32, i32) {
    %c0_i32 = arith.constant 0 : i32
    %c0_i32_0 = arith.constant 0 : i32
    %c0_i32_1 = arith.constant 0 : i32
    return %arg0, %c0_i32, %c0_i32_0 : i32, i32, i32
  }
  func.func @transform_2(%arg0: i32, %arg1: i32) -> (i32, i32, i32, i32) {
    %c0_i32 = arith.constant 0 : i32
    %c0_i32_0 = arith.constant 0 : i32
    %c0_i32_1 = arith.constant 0 : i32
    return %arg0, %arg1, %c0_i32, %c0_i32_0 : i32, i32, i32, i32
  }
}

module attributes {stable_mosaic.version = 11 : i64} {
  func.func @_batched_linear_kernel(%arg0: i32, %arg1: memref<1x16x64xf32, #tpu.memory_space<vmem>>, %arg2: memref<1x64x128xf32, #tpu.memory_space<vmem>>, %arg3: memref<1x1x128xf32, #tpu.memory_space<vmem>>, %arg4: memref<1x16x128xf32, #tpu.memory_space<vmem>>) attributes {dimension_semantics = [#tpu.dimension_semantics<parallel>], iteration_bounds = array<i64: 2>, scalar_prefetch = 0 : i64, scratch_operands = 0 : i64, tpu.core_type = #tpu.core_type<tc>, window_params = [{transform_indices = @transform_0, window_bounds = array<i64: 1, 16, 64>}, {transform_indices = @transform_1, window_bounds = array<i64: 1, 64, 128>}, {transform_indices = @transform_2, window_bounds = array<i64: 1, 1, 128>}, {transform_indices = @transform_3, window_bounds = array<i64: 1, 16, 128>}]} {
    %c0 = arith.constant 0 : index
    %c0_0 = arith.constant 0 : index
    %c0_1 = arith.constant 0 : index
    %0 = vector.load %arg1[%c0, %c0_0, %c0_1] : memref<1x16x64xf32, #tpu.memory_space<vmem>>, vector<1x16x64xf32>
    %1 = vector.shape_cast %0 : vector<1x16x64xf32> to vector<16x64xf32>
    %c0_2 = arith.constant 0 : index
    %c0_3 = arith.constant 0 : index
    %c0_4 = arith.constant 0 : index
    %2 = vector.load %arg2[%c0_2, %c0_3, %c0_4] : memref<1x64x128xf32, #tpu.memory_space<vmem>>, vector<1x64x128xf32>
    %3 = vector.shape_cast %2 : vector<1x64x128xf32> to vector<64x128xf32>
    %cst = arith.constant dense<0.000000e+00> : vector<16x128xf32>
    %4 = tpu.matmul %1, %3, %cst {dimension_numbers = #tpu.dot_dimension_numbers<[1], [0], [0], [1], [0, 0, 1, 1], [], []>} : vector<16x64xf32>, vector<64x128xf32>, vector<16x128xf32> -> vector<16x128xf32>
    %c0_5 = arith.constant 0 : index
    %c0_6 = arith.constant 0 : index
    %c0_7 = arith.constant 0 : index
    %5 = vector.load %arg3[%c0_5, %c0_6, %c0_7] : memref<1x1x128xf32, #tpu.memory_space<vmem>>, vector<1x1x128xf32>
    %6 = vector.shape_cast %5 : vector<1x1x128xf32> to vector<1x128xf32>
    %7 = vector.broadcast %6 : vector<1x128xf32> to vector<16x128xf32>
    %8 = arith.addf %4, %7 : vector<16x128xf32>
    %c0_8 = arith.constant 0 : index
    %c0_9 = arith.constant 0 : index
    %c0_10 = arith.constant 0 : index
    %9 = vector.load %arg4[%c0_8, %c0_9, %c0_10] : memref<1x16x128xf32, #tpu.memory_space<vmem>>, vector<1x16x128xf32>
    %10 = vector.shape_cast %9 : vector<1x16x128xf32> to vector<16x128xf32>
    %11 = vector.shape_cast %8 : vector<16x128xf32> to vector<1x16x128xf32>
    tpu.vector_store %arg4[%c0_8, %c0_9, %c0_10], %11 {strides = array<i32>} : memref<1x16x128xf32, #tpu.memory_space<vmem>>, vector<1x16x128xf32>,
    return
  }
  func.func @transform_0(%arg0: i32) -> (i32, i32, i32) {
    %c0_i32 = arith.constant 0 : i32
    %c0_i32_0 = arith.constant 0 : i32
    %c0_i32_1 = arith.constant 0 : i32
    return %arg0, %c0_i32, %c0_i32_0 : i32, i32, i32
  }
  func.func @transform_1(%arg0: i32) -> (i32, i32, i32) {
    %c0_i32 = arith.constant 0 : i32
    %c0_i32_0 = arith.constant 0 : i32
    %c0_i32_1 = arith.constant 0 : i32
    return %arg0, %c0_i32, %c0_i32_0 : i32, i32, i32
  }
  func.func @transform_2(%arg0: i32) -> (i32, i32, i32) {
    %c0_i32 = arith.constant 0 : i32
    %c0_i32_0 = arith.constant 0 : i32
    %c0_i32_1 = arith.constant 0 : i32
    return %arg0, %c0_i32, %c0_i32_0 : i32, i32, i32
  }
  func.func @transform_3(%arg0: i32) -> (i32, i32, i32) {
    %c0_i32 = arith.constant 0 : i32
    %c0_i32_0 = arith.constant 0 : i32
    %c0_i32_1 = arith.constant 0 : i32
    return %arg0, %c0_i32, %c0_i32_0 : i32, i32, i32
  }
}

module attributes {stable_mosaic.version = 11 : i64} {
  func.func @_head_kernel(%arg0: i32, %arg1: memref<16x64xf32, #tpu.memory_space<vmem>>, %arg2: memref<64x10xf32, #tpu.memory_space<vmem>>, %arg3: memref<1x10xf32, #tpu.memory_space<vmem>>, %arg4: memref<16x1xf32, #tpu.memory_space<vmem>>, %arg5: memref<16x1xi32, #tpu.memory_space<vmem>>) attributes {dimension_semantics = [#tpu.dimension_semantics<arbitrary>], iteration_bounds = array<i64: 1>, scalar_prefetch = 0 : i64, scratch_operands = 0 : i64, tpu.core_type = #tpu.core_type<tc>, window_params = [{pipeline_mode = #tpu.pipeline_mode<synchronous>, transform_indices = @transform_0, window_bounds = array<i64: 16, 64>}, {pipeline_mode = #tpu.pipeline_mode<synchronous>, transform_indices = @transform_1, window_bounds = array<i64: 64, 10>}, {pipeline_mode = #tpu.pipeline_mode<synchronous>, transform_indices = @transform_2, window_bounds = array<i64: 1, 10>}, {pipeline_mode = #tpu.pipeline_mode<synchronous>, transform_indices = @transform_3, window_bounds = array<i64: 16, 1>}, {pipeline_mode = #tpu.pipeline_mode<synchronous>, transform_indices = @transform_4, window_bounds = array<i64: 16, 1>}]} {
    %c0 = arith.constant 0 : index
    %c0_0 = arith.constant 0 : index
    %0 = vector.load %arg1[%c0, %c0_0] : memref<16x64xf32, #tpu.memory_space<vmem>>, vector<16x64xf32>
    %c0_1 = arith.constant 0 : index
    %c0_2 = arith.constant 0 : index
    %1 = vector.load %arg2[%c0_1, %c0_2] : memref<64x10xf32, #tpu.memory_space<vmem>>, vector<64x10xf32>
    %cst = arith.constant dense<0.000000e+00> : vector<16x10xf32>
    %2 = tpu.matmul %0, %1, %cst {dimension_numbers = #tpu.dot_dimension_numbers<[1], [0], [0], [1], [0, 0, 1, 1], [], []>} : vector<16x64xf32>, vector<64x10xf32>, vector<16x10xf32> -> vector<16x10xf32>
    %c0_3 = arith.constant 0 : index
    %c0_4 = arith.constant 0 : index
    %3 = vector.load %arg3[%c0_3, %c0_4] : memref<1x10xf32, #tpu.memory_space<vmem>>, vector<1x10xf32>
    %4 = vector.broadcast %3 : vector<1x10xf32> to vector<16x10xf32>
    %5 = arith.addf %2, %4 : vector<16x10xf32>
    %cst_5 = arith.constant dense<0xFF800000> : vector<16xf32>
    %6 = vector.multi_reduction <maximumf>, %5, %cst_5 [1] : vector<16x10xf32> to vector<16xf32>
    %7 = vector.shape_cast %6 : vector<16xf32> to vector<16x1xf32>
    %8 = vector.broadcast %7 : vector<16x1xf32> to vector<16x10xf32>
    %9 = arith.subf %5, %8 : vector<16x10xf32>
    %10 = math.exp %9 : vector<16x10xf32>
    %cst_6 = arith.constant dense<0.000000e+00> : vector<16xf32>
    %11 = vector.multi_reduction <add>, %10, %cst_6 [1] : vector<16x10xf32> to vector<16xf32>
    %12 = vector.shape_cast %11 : vector<16xf32> to vector<16x1xf32>
    %13 = tpu.reciprocal %12 : vector<16x1xf32> -> vector<16x1xf32>
    %c0_7 = arith.constant 0 : index
    %c0_8 = arith.constant 0 : index
    %14 = vector.load %arg4[%c0_7, %c0_8] : memref<16x1xf32, #tpu.memory_space<vmem>>, vector<16x1xf32>
    tpu.vector_store %arg4[%c0_7, %c0_8], %13 {strides = array<i32>} : memref<16x1xf32, #tpu.memory_space<vmem>>, vector<16x1xf32>,
    %15 = tpu.iota {dimensions = array<i32: 1>} : vector<16x10xi32>
    %16 = vector.broadcast %7 : vector<16x1xf32> to vector<16x10xf32>
    %17 = arith.cmpf oeq, %5, %16 : vector<16x10xf32>
    %c10_i32 = arith.constant 10 : i32
    %18 = vector.broadcast %c10_i32 : i32 to vector<16x10xi32>
    %19 = arith.select %17, %15, %18 : vector<16x10xi1>, vector<16x10xi32>
    %cst_9 = arith.constant dense<2147483647> : vector<16xi32>
    %20 = vector.multi_reduction <minsi>, %19, %cst_9 [1] : vector<16x10xi32> to vector<16xi32>
    %21 = vector.shape_cast %20 : vector<16xi32> to vector<16x1xi32>
    %c0_10 = arith.constant 0 : index
    %c0_11 = arith.constant 0 : index
    %22 = vector.load %arg5[%c0_10, %c0_11] : memref<16x1xi32, #tpu.memory_space<vmem>>, vector<16x1xi32>
    tpu.vector_store %arg5[%c0_10, %c0_11], %21 {strides = array<i32>} : memref<16x1xi32, #tpu.memory_space<vmem>>, vector<16x1xi32>,
    return
  }
  func.func @transform_0(%arg0: i32) -> (i32, i32) {
    %c0_i32 = arith.constant 0 : i32
    %c0_i32_0 = arith.constant 0 : i32
    %c0_i32_1 = arith.constant 0 : i32
    return %c0_i32, %c0_i32_0 : i32, i32
  }
  func.func @transform_1(%arg0: i32) -> (i32, i32) {
    %c0_i32 = arith.constant 0 : i32
    %c0_i32_0 = arith.constant 0 : i32
    %c0_i32_1 = arith.constant 0 : i32
    return %c0_i32, %c0_i32_0 : i32, i32
  }
  func.func @transform_2(%arg0: i32) -> (i32, i32) {
    %c0_i32 = arith.constant 0 : i32
    %c0_i32_0 = arith.constant 0 : i32
    %c0_i32_1 = arith.constant 0 : i32
    return %c0_i32, %c0_i32_0 : i32, i32
  }
  func.func @transform_3(%arg0: i32) -> (i32, i32) {
    %c0_i32 = arith.constant 0 : i32
    %c0_i32_0 = arith.constant 0 : i32
    %c0_i32_1 = arith.constant 0 : i32
    return %c0_i32, %c0_i32_0 : i32, i32
  }
  func.func @transform_4(%arg0: i32) -> (i32, i32) {
    %c0_i32 = arith.constant 0 : i32
    %c0_i32_0 = arith.constant 0 : i32
    %c0_i32_1 = arith.constant 0 : i32
    return %c0_i32, %c0_i32_0 : i32, i32
  }
}

</mosaic_0001>

<bundles_post_ra>
// kernel: export_model_forward.7
= control target key start
LH: loop header
LB: loop body
LE: loop exit
PB: predicated region body
PF: predicated region fallthrough
CT: control target
= control target key end

     0   :  { %s475_s12 = smov 0   ;;  %s502_s0 = inlined_call_operand.vmem [shape: f32[2,32,16], index: 0, kind: input, shape index: {}]   ;;  %s503_s1 = inlined_call_operand.vmem [shape: f32[2,16,128], index: 1, kind: input, shape index: {}]   ;;  %s504_s2 = inlined_call_operand.vmem [shape: f32[2,1,128], index: 2, kind: input, shape index: {}]   ;;  %s505_s3 = inlined_call_operand.vmem [shape: f32[2,32,128], index: 3, kind: output, shape index: {}]  }
   0x1 LB: > { %s396_s13 = sadd.s32 4294967295, %s453_s12   ;;  %p400_p0 = scmp.ge.s32.totalorder %s453_s12, 1  ;;  %s453_s12 = sphi %s475_s12, %s13_s12  }
   0x2   : > { %p155_p1 = scmp.lt.s32.totalorder %s453_s12, 3 }
   0x4   : > { %p156_p2 = pnand %p400_p0, %p155_p1 }
   0x5   : > { %p187_p3 = scmp.lt.s32.totalorder (!%p156_p2), %s396_s13, 1  ;;  %vm218_vm0 = vcmask (!%p156_p2), 130048  }
   0x6   : > { %159 = sbr.rel (%p156_p2) target bundleno = 239 (0xef), region = 32 }
   0xd   : > { %s507_s13 = smov (!%p187_p3, %s396_s13), 1 }
   0xe   : > { %s415_s14 = sshll.u32 %s507_s13, 4  ;;  %s414_s15 = sshll.u32 %s507_s13, 5 }
   0xf   : > { %s196_s18 = scalar_lea.vmem %s503_s1, %s415_s14  ;;  %s191_s21 = scalar_lea.vmem %s502_s0, %s414_s15 }
  0x10   : > { %v209_v0 = vld [vmem:[%s196_s18] sm:$0xff]  ;;  %v210_v1 = vld [vmem:[%s196_s18 + $0x8] sm:$0xff]  ;;  %v207_v4 = vld [vmem:[%s191_s21 + $0x10] sm:$0xff]  ;;  %s199_s24 = scalar_lea.vmem %s504_s2, %s507_s13  ;;  %s204_s27 = scalar_lea.vmem %s505_s3, %s414_s15 }
  0x11   : > { %v205_v2 = vld [vmem:[%s191_s21] sm:$0xff]  ;;  %v433_v3 = vpack.c.bf16 %v210_v1, %v209_v0  ;;  %430 = vmatprep.mubr.msk.f32.mxu1 %vm218_vm0, %v207_v4  ;;  %v206_v5 = vld [vmem:[%s191_s21 + $0x8] sm:$0xff]  ;;  %v208_v6 = vld [vmem:[%s191_s21 + $0x18] sm:$0xff] }
  0x12   : > { %427 = vmatprep.mubr.msk.f32.mxu0 %vm218_vm0, %v205_v2  ;;  %v407_v7 = vld [vmem:[%s199_s24] ss:$0 sm:$0xff] }
  0x13   : > { %434 = vmatprep.subr.bf16.mxu0 %v433_v3  ;;  %437 = vmatprep.subr.bf16.mxu1 %v433_v3 }
  0x14   : > { %436 = vmatpush3.bf16.msra.mxu0 %v433_v3  ;;  %438 = vmatpush3.bf16.msra.mxu1 %v433_v3 }
  0x17   : > { %428 = vmatmul.mubr.msk.f32.vlgmr.msra.gmra.mrb[0].mxu0 %vm218_vm0, %v206_v5  ;;  %431 = vmatmul.mubr.msk.f32.vlgmr.msra.gmra.mrb[0].mxu1 %vm218_vm0, %v208_v6 }
  0xea   : > { %v429_v8 = vpop.f32.mrb[0].mxu0  ;;  %v432_v9 = vpop.f32.mrb[0].mxu1 }
  0xeb   : > { %v303_v10 = vadd.f32 %v429_v8, %v407_v7  ;;  %v313_v11 = vadd.f32 %v432_v9, %v407_v7  ;;  %v297_v12 = vpop.f32.mrb[1].mxu0  ;;  %v307_v13 = vpop.f32.mrb[1].mxu1 }
  0xec   : > { %v298_v14 = vadd.f32 %v407_v7, %v297_v12  ;;  %v308_v15 = vadd.f32 %v407_v7, %v307_v13 }
  0xed   : > { %317 = vst [vmem:[%s204_s27 + $0x8] sm:$0xff] %v303_v10  ;;  %319 = vst [vmem:[%s204_s27 + $0x18] sm:$0xff] %v313_v11 }
  0xee   : > { %316 = vst [vmem:[%s204_s27] sm:$0xff] %v298_v14  ;;  %318 = vst [vmem:[%s204_s27 + $0x10] sm:$0xff] %v308_v15 }
  0xef PF: > { %s13_s12 = sadd.s32 1, %s453_s12  }
  0xf0   : > { %p10_p4 = scmp.ge.s32.totalorder %s13_s12, 4  }
  0xf2   :  { %12 = sbr.rel (!%p10_p4) target bundleno = 1 (0x1), region = 68 }

// kernel: export_model_forward.9
= control target key start
LH: loop header
LB: loop body
LE: loop exit
PB: predicated region body
PF: predicated region fallthrough
CT: control target
= control target key end

     0   :  { %s489_s12 = smov 0   ;;  %s520_s0 = inlined_call_operand.vmem [shape: f32[2,32,32], index: 0, kind: input, shape index: {}]   ;;  %s521_s1 = inlined_call_operand.vmem [shape: f32[2,32,32], index: 1, kind: input, shape index: {}]   ;;  %s522_s2 = inlined_call_operand.vmem [shape: f32[2,1,32], index: 2, kind: input, shape index: {}]   ;;  %s523_s3 = inlined_call_operand.vmem [shape: f32[2,32,32], index: 3, kind: output, shape index: {}]  }
   0x1 LB: > { %s398_s13 = sadd.s32 4294967295, %s467_s12   ;;  %p402_p0 = scmp.ge.s32.totalorder %s467_s12, 1  ;;  %s467_s12 = sphi %s489_s12, %s13_s12  }
   0x2   : > { %p155_p1 = scmp.lt.s32.totalorder %s467_s12, 3 }
   0x4   : > { %p156_p2 = pnand %p402_p0, %p155_p1 }
   0x5   : > { %p187_p3 = scmp.lt.s32.totalorder (!%p156_p2), %s398_s13, 1  ;;  %vm220_vm0 = vcmask (!%p156_p2), 261120  }
   0x6   : > { %159 = sbr.rel (%p156_p2) target bundleno = 243 (0xf3), region = 32 }
   0xd   : > { %s525_s13 = smov (!%p187_p3, %s398_s13), 1 }
   0xe   : > { %s416_s14 = sshll.u32 %s525_s13, 5  ;;  %s199_s23 = scalar_lea.vmem %s522_s2, %s525_s13 }
   0xf   : > { %s196_s17 = scalar_lea.vmem %s521_s1, %s416_s14  ;;  %s191_s20 = scalar_lea.vmem %s520_s0, %s416_s14  ;;  %v409_v10 = vld [vmem:[%s199_s23] ss:$0 sm:$0xff] }
  0x10   : > { %v209_v0 = vld [vmem:[%s196_s17] sm:$0xff]  ;;  %v210_v1 = vld [vmem:[%s196_s17 + $0x8] sm:$0xff]  ;;  %v211_v2 = vld [vmem:[%s196_s17 + $0x10] sm:$0xff]  ;;  %s204_s26 = scalar_lea.vmem %s523_s3, %s416_s14 }
  0x11   : > { %v441_v3 = vpack.c.bf16 %v210_v1, %v209_v0  ;;  %v212_v4 = vld [vmem:[%s196_s17 + $0x18] sm:$0xff]  ;;  %v205_v5 = vld [vmem:[%s191_s20] sm:$0xff]  ;;  %v207_v6 = vld [vmem:[%s191_s20 + $0x10] sm:$0xff] }
  0x12   : > { %v445_v7 = vpack.c.bf16 %v212_v4, %v211_v2  ;;  %435 = vmatprep.mubr.msk.f32.mxu0 %vm220_vm0, %v205_v5  ;;  %438 = vmatprep.mubr.msk.f32.mxu1 %vm220_vm0, %v207_v6  ;;  %v206_v8 = vld [vmem:[%s191_s20 + $0x8] sm:$0xff]  ;;  %v208_v9 = vld [vmem:[%s191_s20 + $0x18] sm:$0xff] }
  0x13   : > { %442 = vmatprep.subr.bf16.mxu0 %v441_v3  ;;  %449 = vmatprep.subr.bf16.mxu1 %v441_v3 }
  0x14   : > { %444 = vmatpush3.bf16.msra.mxu0 %v441_v3  ;;  %451 = vmatpush3.bf16.msra.mxu1 %v441_v3 }
  0x15   : > { %446 = vmatprep.subr.bf16.mxu0 %v445_v7  ;;  %450 = vmatprep.subr.bf16.mxu1 %v445_v7 }
  0x18   : > { %448 = vmatpush3.bf16.msra.mxu0 %v445_v7  ;;  %452 = vmatpush3.bf16.msra.mxu1 %v445_v7 }
  0x1b   : > { %436 = vmatmul.mubr.msk.f32.vlgmr.msra.gmra.mrb[0].mxu0 %vm220_vm0, %v206_v8  ;;  %439 = vmatmul.mubr.msk.f32.vlgmr.msra.gmra.mrb[0].mxu1 %vm220_vm0, %v208_v9 }
  0xee   : > { %v437_v11 = vpop.f32.mrb[0].mxu0  ;;  %v440_v12 = vpop.f32.mrb[0].mxu1 }
  0xef   : > { %v305_v13 = vadd.f32 %v437_v11, %v409_v10  ;;  %v315_v14 = vadd.f32 %v440_v12, %v409_v10  ;;  %v299_v15 = vpop.f32.mrb[1].mxu0  ;;  %v309_v16 = vpop.f32.mrb[1].mxu1 }
  0xf0   : > { %v300_v17 = vadd.f32 %v409_v10, %v299_v15  ;;  %v310_v18 = vadd.f32 %v409_v10, %v309_v16 }
  0xf1   : > { %319 = vst.msk [vmem:[%s204_s26 + $0x8] sm:$0xff] %vm220_vm0, %v305_v13  ;;  %321 = vst.msk [vmem:[%s204_s26 + $0x18] sm:$0xff] %vm220_vm0, %v315_v14 }
  0xf2   : > { %318 = vst.msk [vmem:[%s204_s26] sm:$0xff] %vm220_vm0, %v300_v17  ;;  %320 = vst.msk [vmem:[%s204_s26 + $0x10] sm:$0xff] %vm220_vm0, %v310_v18 }
  0xf3 PF: > { %s13_s12 = sadd.s32 1, %s467_s12  }
  0xf4   : > { %p10_p4 = scmp.ge.s32.totalorder %s13_s12, 4  }
  0xf6   :  { %12 = sbr.rel (!%p10_p4) target bundleno = 1 (0x1), region = 68 }

// kernel: export_model_forward.8
= control target key start
LH: loop header
LB: loop body
LE: loop exit
PB: predicated region body
PF: predicated region fallthrough
CT: control target
= control target key end

     0   :  { %s1565_s9 = smov 0   ;;  %s1567_s10 = smov 0   ;;  %s1742_s0 = inlined_call_operand.vmem [shape: f32[2,16,2,128], index: 0, kind: input, shape index: {}]   ;;  %s1743_s1 = inlined_call_operand.vmem [shape: f32[2,32,128], index: 1, kind: input, shape index: {}]   ;;  %s1744_s2 = inlined_call_operand.vmem [shape: f32[2,16,2,32], index: 2, kind: output, shape index: {}]  }
   0x1   :  { %s1569_s11 = smov 0   ;;  %s1571_s12 = smov 0  }
   0x2   :  { %s1573_s13 = smov 0  }
   0x3 LB: > { %s21_s14 = sadd.s32 1, %s1533_s11  ;;  %s24_s15 = sadd.s32 1, %s1537_s12  ;;  %s1541_s13 = sphi %s1573_s13, %s12_s13   ;;  %s1537_s12 = sphi %s1571_s12, %s1748_s12   ;;  %s1533_s11 = sphi %s1569_s11, %s1747_s11   ;;  %s1529_s10 = sphi %s1567_s10, %s1746_s10   ;;  %s1525_s9 = sphi %s1565_s9, %s1745_s9  }
   0x4   : > { %p22_p0 = scmp.ge.s32.totalorder %s21_s14, 2  ;;  %p1173_p1 = scmp.ge.s32.totalorder %s1541_s13, 1 }
   0x5   : > { %p143_p2 = scmp.lt.s32.totalorder %s1541_s13, 5 }
   0x6   : > { %s1750_s14 = smov (%p22_p0, %s21_s14), 0  ;;  %s1752_s15 = smov (!%p22_p0, %s24_s15), %s1537_s12 }
   0x7   : > { %p144_p3 = pnand %p1173_p1, %p143_p2  ;;  %p26_p4 = scmp.ge.s32.totalorder %s1752_s15, 2 }
   0x8   : > { %s1174_s16 = sshll.u32 (!%p144_p3), %s1525_s9, 3  ;;  %p179_p5 = scmp.lt.s32.totalorder (!%p144_p3), %s1529_s10, 1 }
   0x9   : > { %s1754_s15 = smov (%p26_p4, %s1752_s15), 0  ;;  %147 = sbr.rel (%p144_p3) target bundleno = 5653 (0x1615), region = 28 }
   0xa   : > { %p181_p6 = scmp.lt.s32.totalorder (!%p144_p3), %s1174_s16, 15  ;;  %p1182_p7 = scmp.ne.s32.totalorder (!%p144_p3), %s1525_s9, 0 }
  0x10   : > { %s1756_s10 = smov (!%p179_p5, %s1529_s10), 1  ;;  %s1758_s16 = smov (!%p181_p6, %s1174_s16), 15 }
  0x11   : > { %s1175_s17 = sshll.u32 %s1756_s10, 4  ;;  %s1215_s18 = sshll.u32 %s1756_s10, 5  ;;  %vm207_vm0 = vcmask (!%p1182_p7), 254976   ;;  %v1543_v0 = vmov (!%p1182_p7), 0.0  }
  0x12   : > { %s184_s19 = sadd.s32 %s1175_s17, %s1758_s16  ;;  %s192_s22 = scalar_lea.vmem %s1743_s1, %s1215_s18  ;;  %208 = vst.msk [vmem:[#allocation2] sm:$0x3] (!%p1182_p7), %vm207_vm0, %v1543_v0  ;;  %209 = vst.msk [vmem:[#allocation3] sm:$0x3] (!%p1182_p7), %vm207_vm0, %v1543_v0 }
  0x13   : > { %s1176_s23 = sshll.u32 %s184_s19, 1  ;;  %206 = sbr.rel (%p1182_p7) target bundleno = 26 (0x1a), region = 32 }
  0x14   : > { %s1601_s26 = scalar_lea.vmem %s1742_s0, %s1176_s23  ;;  %s1606_s29 = scalar_lea.vmem %s1744_s2, %s1176_s23 }
  0x1a PF: > { %v210_v1 = vld [vmem:[%s192_s22] sm:$0xff]  ;;  %v211_v2 = vld [vmem:[%s192_s22 + $0x8] sm:$0xff]  ;;  %v212_v3 = vld [vmem:[%s192_s22 + $0x10] sm:$0xff]  ;;  %v1544_v4 = vmov 0.0|0.0   ;;  %vm1545_vm1 = vmmov 0   ;;  %v1546_v7 = vmov 0.0  }
  0x1b   : > { %1344 = vmatprep.subr.bf16.mxu0 %v1544_v4  ;;  %v1609_v5 = vpack.c.bf16 %v211_v2, %v210_v1  ;;  %v213_v6 = vld [vmem:[%s192_s22 + $0x18] sm:$0xff]  ;;  %1264 = vmatprep.mubr.msk.f32.mxu0 %vm1545_vm1, %v1546_v7  ;;  %v214_v9 = vld [vmem:[#allocation2] sm:$0x3]  ;;  %vm217_vm2 = vcmask 261120   ;;  %s1547_s30 = smov 64   ;;  %s1548_s3 = smov 32  }
  0x1c   : > { %1350 = vmatprep.subr.bf16.mxu1 %v1544_v4  ;;  %1275 = vmatprep.mubr.msk.f32.mxu1 %vm1545_vm1, %v1546_v7  ;;  %v1617_v8 = vpack.c.bf16 %v213_v6, %v212_v3  ;;  %v216_v10 = vld [vmem:[%s1601_s26] sm:$0x3]  ;;  %v215_v15 = vld [vmem:[#allocation3] sm:$0x3]  ;;  %vm324_vm3 = vcmask 254976   ;;  %s1549_s4 = smov 96  }
  0x1d   : > { %1346 = vmatpush3.bf16.msra.mxu0 %v1609_v5  ;;  %1352 = vmatpush3.bf16.msra.mxu1 %v1609_v5  ;;  %v1185_v30 = vld [vmem:[%s1601_s26 + $0x2] sm:$0x3]  ;;  %v1189_v48 = vld [vmem:[%s1601_s26 + $0x4] sm:$0x3]  ;;  %v1193_v2 = vld [vmem:[%s1601_s26 + $0x6] sm:$0x3] }
  0x1e   : > { %1347 = vmatprep.subr.bf16.mxu0 %v1544_v4  ;;  %1353 = vmatprep.subr.bf16.mxu1 %v1544_v4 }
  0x21   : > { %1349 = vmatpush3.bf16.msra.mxu0 %v1617_v8  ;;  %1355 = vmatpush3.bf16.msra.mxu1 %v1617_v8 }
  0x22   : > { %1356 = vmatprep.subr.bf16.mxu0 %v1544_v4  ;;  %1362 = vmatprep.subr.bf16.mxu1 %v1544_v4 }
  0x24   : > { %1265 = vmatmul.mubr.msk.f32.vlgmr.msra.gmra.mrb[0].mxu0 %vm217_vm2, %v214_v9 }
  0x25   : > { %1358 = vmatpush3.bf16.msra.mxu0 %v1609_v5  ;;  %1286 = vmatprep.mubr.msk.f32.mxu0 %vm1545_vm1, %v1546_v7 }
  0x26   : > { %1359 = vmatprep.subr.bf16.mxu0 %v1544_v4 }
  0x29   : > { %1361 = vmatpush3.bf16.msra.mxu0 %v1617_v8 }
  0x2a   : > { %1368 = vmatprep.subr.bf16.mxu0 %v1544_v4 }
  0xf7   : > { %v287_v11 = vpop.f32.mrb[0].mxu0 }
  0xf8   : > { %v291_v12 = vadd.f32 %v287_v11, %v216_v10  ;;  %v1266_v13 = vpop.f32.mrb[1].mxu0 }
  0xfa   : > { %1439 = vtanh.f32 %v291_v12  ;;  %v1184_v16 = vmul.f32 -1.442695, %v291_v12 }
  0xfc   : > { %1441 = vpow2.f32 %v1184_v16 }
 0x104   : > { %v1440_v14 = vpop.eup %1439 }
 0x105   : > { %305 = vrot.lane.b32.xlu0 %v1440_v14, %s1547_s30 }
 0x106   : > { %v1442_v17 = vpop.eup %1441 }
 0x107   : > { %v295_v18 = vadd.f32 1.0, %v1442_v17 }
 0x109   : > { %300 = vrot.lane.b32.xlu0 %v215_v15, %s1548_s3  ;;  %1443 = vrcp.f32 %v295_v18 }
 0x113   : > { %v1444_v19 = vpop.eup %1443 }
 0x177   : > { %v306_v20 = vpop.permute.xlu0 %305 }
 0x178   : > { %v308_v21 = vmul.f32 %v1444_v19, %v306_v20 }
 0x17a   : > { %310 = vrot.lane.b32.xlu1 %v308_v21, %s1548_s3 }
 0x17b   : > { %v301_v22 = vpop.permute.xlu0 %300 }
 0x17c   : > { %v303_v23 = vmul.f32 %v1444_v19, %v301_v22 }
 0x1ec   : > { %v311_v24 = vpop.permute.xlu1 %310 }
 0x1ed   : > { %v313_v25 = vadd.f32 %v311_v24, %v303_v23  ;;  %v1197_v24 = vld [vmem:[%s1601_s26 + $0x8] sm:$0x3] }
 0x1ef   : > { %1445 = vtanh.f32 %v313_v25 }
 0x1f9   : > { %v1446_v26 = vpop.eup %1445 }
 0x1fa   : > { %316 = vrot.lane.b32.xlu1 %v1446_v26, %s1547_s30 }
 0x26c   : > { %v317_v27 = vpop.permute.xlu1 %316 }
 0x26d   : > { %v319_v28 = vmul.f32 %v1444_v19, %v317_v27 }
 0x26f   : > { %321 = vrot.lane.b32.xlu0 %v319_v28, %s1548_s3 }
 0x2e1   : > { %v322_v29 = vpop.permute.xlu0 %321 }
 0x2e2   : > { %325 = vst.msk [vmem:[%s1606_s29] sm:$0x3] %vm324_vm3, %v322_v29  ;;  %1276 = vmatmul.mubr.msk.f32.vlgmr.msra.gmra.mrb[0].mxu1 %vm217_vm2, %v322_v29 }
 0x2e3   : > { %1364 = vmatpush3.bf16.msra.mxu1 %v1609_v5  ;;  %1297 = vmatprep.mubr.msk.f32.mxu1 %vm1545_vm1, %v1546_v7 }
 0x2e4   : > { %1365 = vmatprep.subr.bf16.mxu1 %v1544_v4 }
 0x2e7   : > { %1367 = vmatpush3.bf16.msra.mxu1 %v1617_v8 }
 0x2e8   : > { %1374 = vmatprep.subr.bf16.mxu1 %v1544_v4 }
 0x3b5   : > { %v396_v31 = vpop.f32.mrb[0].mxu1 }
 0x3b6   : > { %v400_v32 = vadd.f32 %v1185_v30, %v396_v31  ;;  %v1277_v33 = vpop.f32.mrb[1].mxu1 }
 0x3b8   : > { %1447 = vtanh.f32 %v400_v32  ;;  %v1187_v35 = vmul.f32 -1.442695, %v400_v32 }
 0x3ba   : > { %1449 = vpow2.f32 %v1187_v35 }
 0x3c2   : > { %v1448_v34 = vpop.eup %1447 }
 0x3c3   : > { %410 = vrot.lane.b32.xlu1 %v1448_v34, %s1547_s30 }
 0x3c4   : > { %v1450_v36 = vpop.eup %1449 }
 0x3c5   : > { %v404_v37 = vadd.f32 1.0, %v1450_v36 }
 0x3c7   : > { %1451 = vrcp.f32 %v404_v37 }
 0x3d1   : > { %v1452_v38 = vpop.eup %1451 }
 0x3d2   : > { %v408_v41 = vmul.f32 %v1452_v38, %v313_v25 }
 0x435   : > { %v411_v39 = vpop.permute.xlu1 %410 }
 0x436   : > { %v413_v40 = vmul.f32 %v1452_v38, %v411_v39 }
 0x438   : > { %415 = vrot.lane.b32.xlu0 %v413_v40, %s1548_s3 }
 0x4aa   : > { %v416_v42 = vpop.permute.xlu0 %415 }
 0x4ab   : > { %v418_v43 = vadd.f32 %v416_v42, %v408_v41  ;;  %v1201_v42 = vld [vmem:[%s1601_s26 + $0xa] sm:$0x3] }
 0x4ad   : > { %1453 = vtanh.f32 %v418_v43 }
 0x4b7   : > { %v1454_v44 = vpop.eup %1453 }
 0x4b8   : > { %421 = vrot.lane.b32.xlu1 %v1454_v44, %s1547_s30 }
 0x52a   : > { %v422_v45 = vpop.permute.xlu1 %421 }
 0x52b   : > { %v424_v46 = vmul.f32 %v1452_v38, %v422_v45 }
 0x52d   : > { %426 = vrot.lane.b32.xlu0 %v424_v46, %s1548_s3 }
 0x59f   : > { %v427_v47 = vpop.permute.xlu0 %426 }
 0x5a0   : > { %1188 = vst.msk [vmem:[%s1606_s29 + $0x2] sm:$0x3] %vm324_vm3, %v427_v47  ;;  %1287 = vmatmul.mubr.msk.f32.vlgmr.msra.gmra.mrb[2].mxu0 %vm217_vm2, %v427_v47 }
 0x5a1   : > { %1370 = vmatpush3.bf16.msra.mxu0 %v1609_v5  ;;  %1308 = vmatprep.mubr.msk.f32.mxu0 %vm1545_vm1, %v1546_v7 }
 0x5a2   : > { %1371 = vmatprep.subr.bf16.mxu0 %v1544_v4 }
 0x5a5   : > { %1373 = vmatpush3.bf16.msra.mxu0 %v1617_v8 }
 0x5a6   : > { %1380 = vmatprep.subr.bf16.mxu0 %v1544_v4 }
 0x673   : > { %v501_v49 = vpop.f32.mrb[2].mxu0 }
 0x674   : > { %v505_v50 = vadd.f32 %v1189_v48, %v501_v49  ;;  %v1288_v51 = vpop.f32.mrb[3].mxu0 }
 0x676   : > { %1455 = vtanh.f32 %v505_v50  ;;  %v1191_v53 = vmul.f32 -1.442695, %v505_v50 }
 0x678   : > { %1457 = vpow2.f32 %v1191_v53 }
 0x680   : > { %v1456_v52 = vpop.eup %1455 }
 0x681   : > { %515 = vrot.lane.b32.xlu1 %v1456_v52, %s1547_s30 }
 0x682   : > { %v1458_v54 = vpop.eup %1457 }
 0x683   : > { %v509_v55 = vadd.f32 1.0, %v1458_v54 }
 0x685   : > { %1459 = vrcp.f32 %v509_v55 }
 0x68f   : > { %v1460_v56 = vpop.eup %1459 }
 0x690   : > { %v513_v59 = vmul.f32 %v1460_v56, %v418_v43 }
 0x6f3   : > { %v516_v57 = vpop.permute.xlu1 %515 }
 0x6f4   : > { %v518_v58 = vmul.f32 %v1460_v56, %v516_v57 }
 0x6f6   : > { %520 = vrot.lane.b32.xlu0 %v518_v58, %s1548_s3 }
 0x768   : > { %v521_v60 = vpop.permute.xlu0 %520 }
 0x769   : > { %v523_v61 = vadd.f32 %v521_v60, %v513_v59 }
 0x76b   : > { %1461 = vtanh.f32 %v523_v61 }
 0x775   : > { %v1462_v62 = vpop.eup %1461 }
 0x776   : > { %526 = vrot.lane.b32.xlu1 %v1462_v62, %s1547_s30 }
 0x7e8   : > { %v527_v63 = vpop.permute.xlu1 %526 }
 0x7e9   : > { %v529_v0 = vmul.f32 %v1460_v56, %v527_v63  ;;  %v1205_v56 = vld [vmem:[%s1601_s26 + $0xc] sm:$0x3] }
 0x7eb   : > { %531 = vrot.lane.b32.xlu0 %v529_v0, %s1548_s3 }
 0x85d   : > { %v532_v1 = vpop.permute.xlu0 %531 }
 0x85e   : > { %1192 = vst.msk [vmem:[%s1606_s29 + $0x4] sm:$0x3] %vm324_vm3, %v532_v1  ;;  %1298 = vmatmul.mubr.msk.f32.vlgmr.msra.gmra.mrb[2].mxu1 %vm217_vm2, %v532_v1 }
 0x85f   : > { %1376 = vmatpush3.bf16.msra.mxu1 %v1609_v5  ;;  %1319 = vmatprep.mubr.msk.f32.mxu1 %vm1545_vm1, %v1546_v7 }
 0x860   : > { %1377 = vmatprep.subr.bf16.mxu1 %v1544_v4 }
 0x863   : > { %1379 = vmatpush3.bf16.msra.mxu1 %v1617_v8 }
 0x864   : > { %1386 = vmatprep.subr.bf16.mxu1 %v1544_v4 }
 0x931   : > { %v606_v3 = vpop.f32.mrb[2].mxu1 }
 0x932   : > { %v610_v6 = vadd.f32 %v1193_v2, %v606_v3  ;;  %v1299_v9 = vpop.f32.mrb[3].mxu1 }
 0x934   : > { %1463 = vtanh.f32 %v610_v6  ;;  %v1195_v11 = vmul.f32 -1.442695, %v610_v6 }
 0x936   : > { %1465 = vpow2.f32 %v1195_v11 }
 0x93e   : > { %v1464_v10 = vpop.eup %1463 }
 0x93f   : > { %620 = vrot.lane.b32.xlu1 %v1464_v10, %s1547_s30 }
 0x940   : > { %v1466_v12 = vpop.eup %1465 }
 0x941   : > { %v614_v13 = vadd.f32 1.0, %v1466_v12 }
 0x943   : > { %1467 = vrcp.f32 %v614_v13 }
 0x94d   : > { %v1468_v14 = vpop.eup %1467 }
 0x94e   : > { %v618_v17 = vmul.f32 %v1468_v14, %v523_v61 }
 0x9b1   : > { %v621_v15 = vpop.permute.xlu1 %620 }
 0x9b2   : > { %v623_v16 = vmul.f32 %v1468_v14, %v621_v15 }
 0x9b4   : > { %625 = vrot.lane.b32.xlu0 %v623_v16, %s1548_s3 }
 0xa26   : > { %v626_v18 = vpop.permute.xlu0 %625 }
 0xa27   : > { %v628_v19 = vadd.f32 %v626_v18, %v618_v17 }
 0xa29   : > { %1469 = vtanh.f32 %v628_v19 }
 0xa33   : > { %v1470_v20 = vpop.eup %1469 }
 0xa34   : > { %631 = vrot.lane.b32.xlu1 %v1470_v20, %s1547_s30 }
 0xaa6   : > { %v632_v21 = vpop.permute.xlu1 %631 }
 0xaa7   : > { %v634_v22 = vmul.f32 %v1468_v14, %v632_v21  ;;  %v1209_v14 = vld [vmem:[%s1601_s26 + $0xe] sm:$0x3] }
 0xaa9   : > { %636 = vrot.lane.b32.xlu0 %v634_v22, %s1548_s3 }
 0xb1b   : > { %v637_v23 = vpop.permute.xlu0 %636 }
 0xb1c   : > { %1196 = vst.msk [vmem:[%s1606_s29 + $0x6] sm:$0x3] %vm324_vm3, %v637_v23  ;;  %1309 = vmatmul.mubr.msk.f32.vlgmr.msra.gmra.mrb[4].mxu0 %vm217_vm2, %v637_v23 }
 0xb1d   : > { %1382 = vmatpush3.bf16.msra.mxu0 %v1609_v5  ;;  %1330 = vmatprep.mubr.msk.f32.mxu0 %vm1545_vm1, %v1546_v7 }
 0xb1e   : > { %1383 = vmatprep.subr.bf16.mxu0 %v1544_v4 }
 0xb21   : > { %1385 = vmatpush3.bf16.msra.mxu0 %v1617_v8 }
 0xbef   : > { %v711_v25 = vpop.f32.mrb[4].mxu0 }
 0xbf0   : > { %v715_v26 = vadd.f32 %v1197_v24, %v711_v25  ;;  %v1310_v27 = vpop.f32.mrb[5].mxu0 }
 0xbf2   : > { %1471 = vtanh.f32 %v715_v26  ;;  %v1199_v29 = vmul.f32 -1.442695, %v715_v26 }
 0xbf4   : > { %1473 = vpow2.f32 %v1199_v29 }
 0xbfc   : > { %v1472_v28 = vpop.eup %1471 }
 0xbfd   : > { %725 = vrot.lane.b32.xlu1 %v1472_v28, %s1547_s30 }
 0xbfe   : > { %v1474_v30 = vpop.eup %1473 }
 0xbff   : > { %v719_v31 = vadd.f32 1.0, %v1474_v30 }
 0xc01   : > { %1475 = vrcp.f32 %v719_v31 }
 0xc0b   : > { %v1476_v32 = vpop.eup %1475 }
 0xc0c   : > { %v723_v35 = vmul.f32 %v1476_v32, %v628_v19 }
 0xc6f   : > { %v726_v33 = vpop.permute.xlu1 %725 }
 0xc70   : > { %v728_v34 = vmul.f32 %v1476_v32, %v726_v33 }
 0xc72   : > { %730 = vrot.lane.b32.xlu0 %v728_v34, %s1548_s3 }
 0xce4   : > { %v731_v36 = vpop.permute.xlu0 %730 }
 0xce5   : > { %v733_v37 = vadd.f32 %v731_v36, %v723_v35 }
 0xce7   : > { %1477 = vtanh.f32 %v733_v37 }
 0xcf1   : > { %v1478_v38 = vpop.eup %1477 }
 0xcf2   : > { %736 = vrot.lane.b32.xlu1 %v1478_v38, %s1547_s30 }
 0xd64   : > { %v737_v39 = vpop.permute.xlu1 %736 }
 0xd65   : > { %v739_v40 = vmul.f32 %v1476_v32, %v737_v39 }
 0xd67   : > { %741 = vrot.lane.b32.xlu0 %v739_v40, %s1548_s3 }
 0xdd9   : > { %v742_v41 = vpop.permute.xlu0 %741 }
 0xdda   : > { %1200 = vst.msk [vmem:[%s1606_s29 + $0x8] sm:$0x3] %vm324_vm3, %v742_v41  ;;  %1320 = vmatmul.mubr.msk.f32.vlgmr.msra.gmra.mrb[4].mxu1 %vm217_vm2, %v742_v41 }
 0xddb   : > { %1388 = vmatpush3.bf16.msra.mxu1 %v1609_v5  ;;  %1341 = vmatprep.mubr.msk.f32.mxu1 %vm1545_vm1, %v1546_v7 }
 0xddc   : > { %1389 = vmatprep.subr.bf16.mxu1 %v1544_v4 }
 0xddf   : > { %1391 = vmatpush3.bf16.msra.mxu1 %v1617_v8 }
 0xead   : > { %v816_v43 = vpop.f32.mrb[4].mxu1 }
 0xeae   : > { %v820_v44 = vadd.f32 %v1201_v42, %v816_v43  ;;  %v1321_v45 = vpop.f32.mrb[5].mxu1 }
 0xeb0   : > { %1479 = vtanh.f32 %v820_v44  ;;  %v1203_v47 = vmul.f32 -1.442695, %v820_v44 }
 0xeb2   : > { %1481 = vpow2.f32 %v1203_v47 }
 0xeba   : > { %v1480_v46 = vpop.eup %1479 }
 0xebb   : > { %830 = vrot.lane.b32.xlu1 %v1480_v46, %s1547_s30 }
 0xebc   : > { %v1482_v48 = vpop.eup %1481 }
 0xebd   : > { %v824_v49 = vadd.f32 1.0, %v1482_v48 }
 0xebf   : > { %1483 = vrcp.f32 %v824_v49 }
 0xec9   : > { %v1484_v5 = vpop.eup %1483 }
 0xeca   : > { %v828_v8 = vmul.f32 %v1484_v5, %v733_v37 }
 0xf2d   : > { %v831_v7 = vpop.permute.xlu1 %830 }
 0xf2e   : > { %v833_v4 = vmul.f32 %v1484_v5, %v831_v7 }
 0xf30   : > { %835 = vrot.lane.b32.xlu0 %v833_v4, %s1548_s3 }
 0xfa2   : > { %v836_v50 = vpop.permute.xlu0 %835 }
 0xfa3   : > { %v838_v51 = vadd.f32 %v836_v50, %v828_v8 }
 0xfa5   : > { %1485 = vtanh.f32 %v838_v51 }
 0xfaf   : > { %v1486_v52 = vpop.eup %1485 }
 0xfb0   : > { %841 = vrot.lane.b32.xlu1 %v1486_v52, %s1547_s30 }
0x1022   : > { %v842_v53 = vpop.permute.xlu1 %841 }
0x1023   : > { %v844_v54 = vmul.f32 %v1484_v5, %v842_v53 }
0x1025   : > { %846 = vrot.lane.b32.xlu0 %v844_v54, %s1548_s3 }
0x1097   : > { %v847_v55 = vpop.permute.xlu0 %846 }
0x1098   : > { %1204 = vst.msk [vmem:[%s1606_s29 + $0xa] sm:$0x3] %vm324_vm3, %v847_v55  ;;  %1331 = vmatmul.mubr.msk.f32.vlgmr.msra.gmra.mrb[6].mxu0 %vm217_vm2, %v847_v55 }
0x116b   : > { %v921_v57 = vpop.f32.mrb[6].mxu0 }
0x116c   : > { %v925_v58 = vadd.f32 %v1205_v56, %v921_v57  ;;  %v1332_v59 = vpop.f32.mrb[7].mxu0 }
0x116e   : > { %1487 = vtanh.f32 %v925_v58  ;;  %v1207_v61 = vmul.f32 -1.442695, %v925_v58 }
0x1170   : > { %1489 = vpow2.f32 %v1207_v61 }
0x1178   : > { %v1488_v60 = vpop.eup %1487 }
0x1179   : > { %935 = vrot.lane.b32.xlu1 %v1488_v60, %s1547_s30 }
0x117a   : > { %v1490_v62 = vpop.eup %1489 }
0x117b   : > { %v929_v63 = vadd.f32 1.0, %v1490_v62 }
0x117d   : > { %1491 = vrcp.f32 %v929_v63 }
0x1187   : > { %v1492_v0 = vpop.eup %1491 }
0x1188   : > { %v933_v3 = vmul.f32 %v1492_v0, %v838_v51 }
0x11eb   : > { %v936_v1 = vpop.permute.xlu1 %935 }
0x11ec   : > { %v938_v2 = vmul.f32 %v1492_v0, %v936_v1 }
0x11ee   : > { %940 = vrot.lane.b32.xlu0 %v938_v2, %s1548_s3 }
0x1260   : > { %v941_v6 = vpop.permute.xlu0 %940 }
0x1261   : > { %v943_v9 = vadd.f32 %v941_v6, %v933_v3 }
0x1263   : > { %1493 = vtanh.f32 %v943_v9 }
0x126d   : > { %v1494_v10 = vpop.eup %1493 }
0x126e   : > { %946 = vrot.lane.b32.xlu1 %v1494_v10, %s1547_s30 }
0x12e0   : > { %v947_v11 = vpop.permute.xlu1 %946 }
0x12e1   : > { %v949_v12 = vmul.f32 %v1492_v0, %v947_v11 }
0x12e3   : > { %951 = vrot.lane.b32.xlu0 %v949_v12, %s1548_s3 }
0x1355   : > { %v952_v13 = vpop.permute.xlu0 %951 }
0x1356   : > { %1208 = vst.msk [vmem:[%s1606_s29 + $0xc] sm:$0x3] %vm324_vm3, %v952_v13  ;;  %1342 = vmatmul.mubr.msk.f32.vlgmr.msra.gmra.mrb[6].mxu1 %vm217_vm2, %v952_v13 }
0x1429   : > { %v1026_v15 = vpop.f32.mrb[6].mxu1 }
0x142a   : > { %v1030_v16 = vadd.f32 %v1209_v14, %v1026_v15  ;;  %v1343_v17 = vpop.f32.mrb[7].mxu1 }
0x142c   : > { %1495 = vtanh.f32 %v1030_v16  ;;  %v1211_v19 = vmul.f32 -1.442695, %v1030_v16 }
0x142e   : > { %1497 = vpow2.f32 %v1211_v19 }
0x1436   : > { %v1496_v18 = vpop.eup %1495 }
0x1437   : > { %1040 = vrot.lane.b32.xlu1 %v1496_v18, %s1547_s30 }
0x1438   : > { %v1498_v20 = vpop.eup %1497 }
0x1439   : > { %v1034_v21 = vadd.f32 1.0, %v1498_v20 }
0x143b   : > { %1499 = vrcp.f32 %v1034_v21 }
0x1445   : > { %v1500_v22 = vpop.eup %1499 }
0x1446   : > { %v1038_v25 = vmul.f32 %v1500_v22, %v943_v9 }
0x14a9   : > { %v1041_v23 = vpop.permute.xlu1 %1040 }
0x14aa   : > { %v1043_v24 = vmul.f32 %v1500_v22, %v1041_v23 }
0x14ac   : > { %1045 = vrot.lane.b32.xlu0 %v1043_v24, %s1548_s3 }
0x151e   : > { %v1046_v26 = vpop.permute.xlu0 %1045 }
0x151f   : > { %v1048_v27 = vadd.f32 %v1046_v26, %v1038_v25 }
0x1521   : > { %1501 = vtanh.f32 %v1048_v27 }
0x152b   : > { %v1502_v28 = vpop.eup %1501 }
0x152c   : > { %1051 = vrot.lane.b32.xlu1 %v1502_v28, %s1547_s30 }
0x1530   : > { %1063 = vrot.lane.b32.xlu1 %v1048_v27, %s1549_s4 }
0x159e   : > { %v1052_v29 = vpop.permute.xlu1 %1051 }
0x159f   : > { %v1054_v30 = vmul.f32 %v1500_v22, %v1052_v29 }
0x15a1   : > { %1056 = vrot.lane.b32.xlu0 %v1054_v30, %s1548_s3 }
0x15a2   : > { %v1064_v31 = vpop.permute.xlu1 %1063 }
0x15a3   : > { %1066 = vst.msk [vmem:[#allocation3] sm:$0x3] %vm324_vm3, %v1064_v31 }
0x1613   : > { %v1057_v32 = vpop.permute.xlu0 %1056 }
0x1614   : > { %1212 = vst.msk [vmem:[%s1606_s29 + $0xe] sm:$0x3] %vm324_vm3, %v1057_v32  ;;  %1061 = vst.msk [vmem:[#allocation2] sm:$0x3] %vm324_vm3, %v1057_v32 }
0x1615 PF: > { %s12_s13 = sadd.s32 1, %s1541_s13   ;;  %s1745_s9 = smov %s1533_s11 }
0x1616   : > { %p9_p8 = scmp.ge.s32.totalorder %s12_s13, 6   ;;  %s1746_s10 = smov %s1537_s12 }
0x1617   : > { %s1747_s11 = smov %s1750_s14  ;;  %s1748_s12 = smov %s1754_s15 }
0x1618   :  { %11 = sbr.rel (!%p9_p8) target bundleno = 3 (0x3), region = 79 }

// kernel: export_model_forward.10
= control target key start
LH: loop header
LB: loop body
LE: loop exit
PB: predicated region body
PF: predicated region fallthrough
CT: control target
= control target key end

     0   :  { %vm31_vm0 = vcmask 523264   ;;  %s230_s1 = inlined_call_operand.vmem [shape: f32[1,64,64], index: 1, kind: input, shape index: {}]   ;;  %s231_s0 = inlined_call_operand.vmem [shape: f32[1,16,64], index: 0, kind: input, shape index: {}]   ;;  %s232_s2 = inlined_call_operand.vmem [shape: f32[1,1,64], index: 2, kind: input, shape index: {}]   ;;  %s233_s3 = inlined_call_operand.vmem [shape: f32[1,16,64], index: 3, kind: output, shape index: {}]  }
   0x1   :  { %v16_v0 = vld [vmem:[%s230_s1] sm:$0xff]  ;;  %v17_v1 = vld [vmem:[%s230_s1 + $0x8] sm:$0xff]  ;;  %v18_v2 = vld [vmem:[%s230_s1 + $0x10] sm:$0xff] }
   0x2   :  { %v151_v3 = vpack.c.bf16 %v17_v1, %v16_v0  ;;  %v19_v4 = vld [vmem:[%s230_s1 + $0x18] sm:$0xff]  ;;  %v20_v6 = vld [vmem:[%s230_s1 + $0x20] sm:$0xff]  ;;  %v21_v7 = vld [vmem:[%s230_s1 + $0x28] sm:$0xff] }
   0x3   :  { %v155_v5 = vpack.c.bf16 %v19_v4, %v18_v2  ;;  %v14_v8 = vld [vmem:[%s231_s0] sm:$0xff]  ;;  %v159_v9 = vpack.c.bf16 %v21_v7, %v20_v6  ;;  %v22_v10 = vld [vmem:[%s230_s1 + $0x30] sm:$0xff]  ;;  %v23_v11 = vld [vmem:[%s230_s1 + $0x38] sm:$0xff] }
   0x4   :  { %152 = vmatprep.subr.bf16.mxu0 %v151_v3  ;;  %148 = vmatprep.mubr.msk.f32.mxu0 %vm31_vm0, %v14_v8  ;;  %v163_v12 = vpack.c.bf16 %v23_v11, %v22_v10  ;;  %v15_v13 = vld [vmem:[%s231_s0 + $0x8] sm:$0xff]  ;;  %v119_v14 = vld [vmem:[%s232_s2] ss:$0 sm:$0xff] }
   0x5   :  { %154 = vmatpush3.bf16.msra.mxu0 %v151_v3 }
   0x6   :  { %156 = vmatprep.subr.bf16.mxu0 %v155_v5 }
   0x9   :  { %158 = vmatpush3.bf16.msra.mxu0 %v155_v5 }
   0xa   :  { %160 = vmatprep.subr.bf16.mxu0 %v159_v9 }
   0xd   :  { %162 = vmatpush3.bf16.msra.mxu0 %v159_v9 }
   0xe   :  { %164 = vmatprep.subr.bf16.mxu0 %v163_v12 }
  0x11   :  { %166 = vmatpush3.bf16.msra.mxu0 %v163_v12 }
  0x14   :  { %149 = vmatmul.mubr.msk.f32.vlgmr.msra.gmra.mrb[0].mxu0 %vm31_vm0, %v15_v13 }
  0xe7   :  { %v150_v15 = vpop.f32.mrb[0].mxu0 }
  0xe8   :  { %v110_v16 = vadd.f32 %v150_v15, %v119_v14  ;;  %v104_v17 = vpop.f32.mrb[1].mxu0 }
  0xe9   :  { %v105_v18 = vadd.f32 %v119_v14, %v104_v17 }
  0xea   :  { %114 = vst.msk [vmem:[%s233_s3 + $0x8] sm:$0xff] %vm31_vm0, %v110_v16 }
  0xeb   :  { %113 = vst.msk [vmem:[%s233_s3] sm:$0xff] %vm31_vm0, %v105_v18 }

// kernel: export_model_forward.11
= control target key start
LH: loop header
LB: loop body
LE: loop exit
PB: predicated region body
PF: predicated region fallthrough
CT: control target
= control target key end

     0   :  { %s482_s12 = smov 0   ;;  %s516_s0 = inlined_call_operand.vmem [shape: f32[2,16,64], index: 0, kind: input, shape index: {}]   ;;  %s517_s1 = inlined_call_operand.vmem [shape: f32[2,64,128], index: 1, kind: input, shape index: {}]   ;;  %s518_s2 = inlined_call_operand.vmem [shape: f32[2,1,128], index: 2, kind: input, shape index: {}]   ;;  %s519_s3 = inlined_call_operand.vmem [shape: f32[2,16,128], index: 3, kind: output, shape index: {}]  }
   0x1 LB: > { %s382_s13 = sadd.s32 4294967295, %s460_s12   ;;  %p386_p0 = scmp.ge.s32.totalorder %s460_s12, 1  ;;  %s460_s12 = sphi %s482_s12, %s13_s12  }
   0x2   : > { %p155_p1 = scmp.lt.s32.totalorder %s460_s12, 3 }
   0x4   : > { %p156_p2 = pnand %p386_p0, %p155_p1 }
   0x5   : > { %p187_p3 = scmp.lt.s32.totalorder (!%p156_p2), %s382_s13, 1  ;;  %vm222_vm0 = vcmask (!%p156_p2), 523264  }
   0x6   : > { %159 = sbr.rel (%p156_p2) target bundleno = 251 (0xfb), region = 32 }
   0xd   : > { %s521_s13 = smov (!%p187_p3, %s382_s13), 1 }
   0xe   : > { %s399_s14 = sshll.u32 %s521_s13, 6  ;;  %s398_s15 = sshll.u32 %s521_s13, 4 }
   0xf   : > { %s196_s18 = scalar_lea.vmem %s517_s1, %s399_s14  ;;  %s191_s21 = scalar_lea.vmem %s516_s0, %s398_s15 }
  0x10   : > { %v207_v0 = vld [vmem:[%s196_s18] sm:$0xff]  ;;  %v208_v1 = vld [vmem:[%s196_s18 + $0x8] sm:$0xff]  ;;  %v209_v2 = vld [vmem:[%s196_s18 + $0x10] sm:$0xff]  ;;  %s199_s24 = scalar_lea.vmem %s518_s2, %s521_s13  ;;  %s204_s27 = scalar_lea.vmem %s519_s3, %s398_s15 }
  0x11   : > { %v430_v3 = vpack.c.bf16 %v208_v1, %v207_v0  ;;  %v210_v4 = vld [vmem:[%s196_s18 + $0x18] sm:$0xff]  ;;  %v211_v6 = vld [vmem:[%s196_s18 + $0x20] sm:$0xff]  ;;  %v212_v7 = vld [vmem:[%s196_s18 + $0x28] sm:$0xff] }
  0x12   : > { %v434_v5 = vpack.c.bf16 %v210_v4, %v209_v2  ;;  %v205_v8 = vld [vmem:[%s191_s21] sm:$0xff]  ;;  %v438_v9 = vpack.c.bf16 %v212_v7, %v211_v6  ;;  %v213_v10 = vld [vmem:[%s196_s18 + $0x30] sm:$0xff]  ;;  %v214_v11 = vld [vmem:[%s196_s18 + $0x38] sm:$0xff] }
  0x13   : > { %431 = vmatprep.subr.bf16.mxu0 %v430_v3  ;;  %427 = vmatprep.mubr.msk.f32.mxu0 %vm222_vm0, %v205_v8  ;;  %v442_v12 = vpack.c.bf16 %v214_v11, %v213_v10  ;;  %v206_v13 = vld [vmem:[%s191_s21 + $0x8] sm:$0xff]  ;;  %v393_v14 = vld [vmem:[%s199_s24] ss:$0 sm:$0xff] }
  0x14   : > { %433 = vmatpush3.bf16.msra.mxu0 %v430_v3 }
  0x15   : > { %435 = vmatprep.subr.bf16.mxu0 %v434_v5 }
  0x18   : > { %437 = vmatpush3.bf16.msra.mxu0 %v434_v5 }
  0x19   : > { %439 = vmatprep.subr.bf16.mxu0 %v438_v9 }
  0x1c   : > { %441 = vmatpush3.bf16.msra.mxu0 %v438_v9 }
  0x1d   : > { %443 = vmatprep.subr.bf16.mxu0 %v442_v12 }
  0x20   : > { %445 = vmatpush3.bf16.msra.mxu0 %v442_v12 }
  0x23   : > { %428 = vmatmul.mubr.msk.f32.vlgmr.msra.gmra.mrb[0].mxu0 %vm222_vm0, %v206_v13 }
  0xf6   : > { %v429_v15 = vpop.f32.mrb[0].mxu0 }
  0xf7   : > { %v301_v16 = vadd.f32 %v429_v15, %v393_v14  ;;  %v295_v17 = vpop.f32.mrb[1].mxu0 }
  0xf8   : > { %v296_v18 = vadd.f32 %v393_v14, %v295_v17 }
  0xf9   : > { %305 = vst [vmem:[%s204_s27 + $0x8] sm:$0xff] %v301_v16 }
  0xfa   : > { %304 = vst [vmem:[%s204_s27] sm:$0xff] %v296_v18 }
  0xfb PF: > { %s13_s12 = sadd.s32 1, %s460_s12  }
  0xfc   : > { %p10_p4 = scmp.ge.s32.totalorder %s13_s12, 4  }
  0xfe   :  { %12 = sbr.rel (!%p10_p4) target bundleno = 1 (0x1), region = 68 }

// kernel: export_model_forward.12
= control target key start
LH: loop header
LB: loop body
LE: loop exit
PB: predicated region body
PF: predicated region fallthrough
CT: control target
= control target key end

     0   :  { %s1527_s9 = smov 0   ;;  %s1529_s10 = smov 0   ;;  %s1698_s0 = inlined_call_operand.vmem [shape: f32[2,8,2,128], index: 0, kind: input, shape index: {}]   ;;  %s1699_s1 = inlined_call_operand.vmem [shape: f32[2,32,128], index: 1, kind: input, shape index: {}]   ;;  %s1700_s2 = inlined_call_operand.vmem [shape: f32[2,8,2,32], index: 2, kind: output, shape index: {}]  }
   0x1   :  { %s1531_s11 = smov 0  }
   0x2 LB: > { %s24_s12 = sadd.s32 1, %s1500_s10  ;;  %p1170_p0 = scmp.ge.s32.totalorder %s1504_s11, 1  ;;  %s1504_s11 = sphi %s1531_s11, %s12_s11   ;;  %s1500_s10 = sphi %s1529_s10, %s1702_s10   ;;  %s1496_s9 = sphi %s1527_s9, %s1701_s9  }
   0x3   : > { %p26_p1 = scmp.ge.s32.totalorder %s24_s12, 2  ;;  %p143_p2 = scmp.lt.s32.totalorder %s1504_s11, 3 }
   0x5   : > { %s1704_s12 = smov (%p26_p1, %s24_s12), 0  ;;  %p144_p3 = pnand %p1170_p0, %p143_p2 }
   0x6   : > { %p179_p4 = scmp.lt.s32.totalorder (!%p144_p3), %s1496_s9, 1  ;;  %vm207_vm0 = vcmask (!%p144_p3), 254976   ;;  %v1506_v0 = vmov (!%p144_p3), 0.0|0.0   ;;  %vm1507_vm1 = vmmov (!%p144_p3), 0   ;;  %v1508_v1 = vmov (!%p144_p3), 0.0   ;;  %s1509_s21 = smov (!%p144_p3), 64  }
   0x7   : > { %147 = sbr.rel (%p144_p3) target bundleno = 5644 (0x160c), region = 28  ;;  %1340 = vmatprep.subr.bf16.mxu0 (!%p144_p3), %v1506_v0  ;;  %1260 = vmatprep.mubr.msk.f32.mxu0 (!%p144_p3), %vm1507_vm1, %v1508_v1  ;;  %208 = vst.msk [vmem:[#allocation2] sm:$0x3] (!%p144_p3), %vm207_vm0, %v1508_v1  ;;  %209 = vst.msk [vmem:[#allocation3] sm:$0x3] (!%p144_p3), %vm207_vm0, %v1508_v1  ;;  %vm217_vm2 = vcmask (!%p144_p3), 261120  }
   0x8   : > { %1346 = vmatprep.subr.bf16.mxu1 (!%p144_p3), %v1506_v0  ;;  %1271 = vmatprep.mubr.msk.f32.mxu1 (!%p144_p3), %vm1507_vm1, %v1508_v1  ;;  %s1510_s22 = smov (!%p144_p3), 32   ;;  %s1511_s26 = smov (!%p144_p3), 96  }
   0xe   : > { %s1706_s9 = smov (!%p179_p4, %s1496_s9), 1  ;;  %v214_v8 = vld [vmem:[#allocation2] sm:$0x3]  ;;  %v215_v14 = vld [vmem:[#allocation3] sm:$0x3] }
   0xf   : > { %s1210_s13 = sshll.u32 %s1706_s9, 5  ;;  %s1209_s17 = sshll.u32 %s1706_s9, 4 }
  0x10   : > { %s192_s16 = scalar_lea.vmem %s1699_s1, %s1210_s13  ;;  %s1586_s20 = scalar_lea.vmem %s1698_s0, %s1209_s17 }
  0x11   : > { %v210_v2 = vld [vmem:[%s192_s16] sm:$0xff]  ;;  %v211_v3 = vld [vmem:[%s192_s16 + $0x8] sm:$0xff]  ;;  %v212_v4 = vld [vmem:[%s192_s16 + $0x10] sm:$0xff]  ;;  %s1599_s25 = scalar_lea.vmem %s1700_s2, %s1209_s17 }
  0x12   : > { %v1561_v5 = vpack.c.bf16 %v211_v3, %v210_v2  ;;  %v213_v6 = vld [vmem:[%s192_s16 + $0x18] sm:$0xff]  ;;  %v216_v9 = vld [vmem:[%s1586_s20] sm:$0x3]  ;;  %v1179_v29 = vld [vmem:[%s1586_s20 + $0x2] sm:$0x3] }
  0x13   : > { %v1564_v7 = vpack.c.bf16 %v213_v6, %v212_v4  ;;  %v1183_v47 = vld [vmem:[%s1586_s20 + $0x4] sm:$0x3]  ;;  %v1187_v3 = vld [vmem:[%s1586_s20 + $0x6] sm:$0x3] }
  0x14   : > { %1342 = vmatpush3.bf16.msra.mxu0 %v1561_v5  ;;  %1348 = vmatpush3.bf16.msra.mxu1 %v1561_v5 }
  0x15   : > { %1343 = vmatprep.subr.bf16.mxu0 %v1506_v0  ;;  %1349 = vmatprep.subr.bf16.mxu1 %v1506_v0 }
  0x18   : > { %1345 = vmatpush3.bf16.msra.mxu0 %v1564_v7  ;;  %1351 = vmatpush3.bf16.msra.mxu1 %v1564_v7 }
  0x19   : > { %1352 = vmatprep.subr.bf16.mxu0 %v1506_v0  ;;  %1358 = vmatprep.subr.bf16.mxu1 %v1506_v0 }
  0x1b   : > { %1261 = vmatmul.mubr.msk.f32.vlgmr.msra.gmra.mrb[0].mxu0 %vm217_vm2, %v214_v8 }
  0x1c   : > { %1354 = vmatpush3.bf16.msra.mxu0 %v1561_v5  ;;  %1282 = vmatprep.mubr.msk.f32.mxu0 %vm1507_vm1, %v1508_v1 }
  0x1d   : > { %1355 = vmatprep.subr.bf16.mxu0 %v1506_v0 }
  0x20   : > { %1357 = vmatpush3.bf16.msra.mxu0 %v1564_v7 }
  0x21   : > { %1364 = vmatprep.subr.bf16.mxu0 %v1506_v0 }
  0xee   : > { %v287_v10 = vpop.f32.mrb[0].mxu0 }
  0xef   : > { %v291_v11 = vadd.f32 %v287_v10, %v216_v9  ;;  %v1262_v12 = vpop.f32.mrb[1].mxu0 }
  0xf1   : > { %1418 = vtanh.f32 %v291_v11  ;;  %v1178_v15 = vmul.f32 -1.442695, %v291_v11 }
  0xf3   : > { %1420 = vpow2.f32 %v1178_v15 }
  0xfb   : > { %v1419_v13 = vpop.eup %1418 }
  0xfc   : > { %305 = vrot.lane.b32.xlu0 %v1419_v13, %s1509_s21 }
  0xfd   : > { %v1421_v16 = vpop.eup %1420 }
  0xfe   : > { %v295_v17 = vadd.f32 1.0, %v1421_v16 }
 0x100   : > { %300 = vrot.lane.b32.xlu0 %v215_v14, %s1510_s22  ;;  %1422 = vrcp.f32 %v295_v17 }
 0x10a   : > { %v1423_v18 = vpop.eup %1422 }
 0x16e   : > { %v306_v19 = vpop.permute.xlu0 %305 }
 0x16f   : > { %v308_v20 = vmul.f32 %v1423_v18, %v306_v19 }
 0x171   : > { %310 = vrot.lane.b32.xlu1 %v308_v20, %s1510_s22 }
 0x172   : > { %v301_v21 = vpop.permute.xlu0 %300 }
 0x173   : > { %v303_v22 = vmul.f32 %v1423_v18, %v301_v21 }
 0x1e3   : > { %v311_v23 = vpop.permute.xlu1 %310 }
 0x1e4   : > { %v313_v24 = vadd.f32 %v311_v23, %v303_v22  ;;  %v1191_v23 = vld [vmem:[%s1586_s20 + $0x8] sm:$0x3] }
 0x1e6   : > { %1424 = vtanh.f32 %v313_v24 }
 0x1f0   : > { %v1425_v25 = vpop.eup %1424 }
 0x1f1   : > { %316 = vrot.lane.b32.xlu1 %v1425_v25, %s1509_s21 }
 0x263   : > { %v317_v26 = vpop.permute.xlu1 %316 }
 0x264   : > { %v319_v27 = vmul.f32 %v1423_v18, %v317_v26 }
 0x266   : > { %321 = vrot.lane.b32.xlu0 %v319_v27, %s1510_s22 }
 0x2d8   : > { %v322_v28 = vpop.permute.xlu0 %321 }
 0x2d9   : > { %325 = vst.msk [vmem:[%s1599_s25] sm:$0x3] %vm207_vm0, %v322_v28  ;;  %1272 = vmatmul.mubr.msk.f32.vlgmr.msra.gmra.mrb[0].mxu1 %vm217_vm2, %v322_v28 }
 0x2da   : > { %1360 = vmatpush3.bf16.msra.mxu1 %v1561_v5  ;;  %1293 = vmatprep.mubr.msk.f32.mxu1 %vm1507_vm1, %v1508_v1 }
 0x2db   : > { %1361 = vmatprep.subr.bf16.mxu1 %v1506_v0 }
 0x2de   : > { %1363 = vmatpush3.bf16.msra.mxu1 %v1564_v7 }
 0x2df   : > { %1370 = vmatprep.subr.bf16.mxu1 %v1506_v0 }
 0x3ac   : > { %v396_v30 = vpop.f32.mrb[0].mxu1 }
 0x3ad   : > { %v400_v31 = vadd.f32 %v1179_v29, %v396_v30  ;;  %v1273_v32 = vpop.f32.mrb[1].mxu1 }
 0x3af   : > { %1426 = vtanh.f32 %v400_v31  ;;  %v1181_v34 = vmul.f32 -1.442695, %v400_v31 }
 0x3b1   : > { %1428 = vpow2.f32 %v1181_v34 }
 0x3b9   : > { %v1427_v33 = vpop.eup %1426 }
 0x3ba   : > { %410 = vrot.lane.b32.xlu1 %v1427_v33, %s1509_s21 }
 0x3bb   : > { %v1429_v35 = vpop.eup %1428 }
 0x3bc   : > { %v404_v36 = vadd.f32 1.0, %v1429_v35 }
 0x3be   : > { %1430 = vrcp.f32 %v404_v36 }
 0x3c8   : > { %v1431_v37 = vpop.eup %1430 }
 0x3c9   : > { %v408_v40 = vmul.f32 %v1431_v37, %v313_v24 }
 0x42c   : > { %v411_v38 = vpop.permute.xlu1 %410 }
 0x42d   : > { %v413_v39 = vmul.f32 %v1431_v37, %v411_v38 }
 0x42f   : > { %415 = vrot.lane.b32.xlu0 %v413_v39, %s1510_s22 }
 0x4a1   : > { %v416_v41 = vpop.permute.xlu0 %415 }
 0x4a2   : > { %v418_v42 = vadd.f32 %v416_v41, %v408_v40  ;;  %v1195_v41 = vld [vmem:[%s1586_s20 + $0xa] sm:$0x3] }
 0x4a4   : > { %1432 = vtanh.f32 %v418_v42 }
 0x4ae   : > { %v1433_v43 = vpop.eup %1432 }
 0x4af   : > { %421 = vrot.lane.b32.xlu1 %v1433_v43, %s1509_s21 }
 0x521   : > { %v422_v44 = vpop.permute.xlu1 %421 }
 0x522   : > { %v424_v45 = vmul.f32 %v1431_v37, %v422_v44 }
 0x524   : > { %426 = vrot.lane.b32.xlu0 %v424_v45, %s1510_s22 }
 0x596   : > { %v427_v46 = vpop.permute.xlu0 %426 }
 0x597   : > { %1182 = vst.msk [vmem:[%s1599_s25 + $0x2] sm:$0x3] %vm207_vm0, %v427_v46  ;;  %1283 = vmatmul.mubr.msk.f32.vlgmr.msra.gmra.mrb[2].mxu0 %vm217_vm2, %v427_v46 }
 0x598   : > { %1366 = vmatpush3.bf16.msra.mxu0 %v1561_v5  ;;  %1304 = vmatprep.mubr.msk.f32.mxu0 %vm1507_vm1, %v1508_v1 }
 0x599   : > { %1367 = vmatprep.subr.bf16.mxu0 %v1506_v0 }
 0x59c   : > { %1369 = vmatpush3.bf16.msra.mxu0 %v1564_v7 }
 0x59d   : > { %1376 = vmatprep.subr.bf16.mxu0 %v1506_v0 }
 0x66a   : > { %v501_v48 = vpop.f32.mrb[2].mxu0 }
 0x66b   : > { %v505_v49 = vadd.f32 %v1183_v47, %v501_v48  ;;  %v1284_v50 = vpop.f32.mrb[3].mxu0 }
 0x66d   : > { %1434 = vtanh.f32 %v505_v49  ;;  %v1185_v52 = vmul.f32 -1.442695, %v505_v49 }
 0x66f   : > { %1436 = vpow2.f32 %v1185_v52 }
 0x677   : > { %v1435_v51 = vpop.eup %1434 }
 0x678   : > { %515 = vrot.lane.b32.xlu1 %v1435_v51, %s1509_s21 }
 0x679   : > { %v1437_v53 = vpop.eup %1436 }
 0x67a   : > { %v509_v54 = vadd.f32 1.0, %v1437_v53 }
 0x67c   : > { %1438 = vrcp.f32 %v509_v54 }
 0x686   : > { %v1439_v55 = vpop.eup %1438 }
 0x687   : > { %v513_v58 = vmul.f32 %v1439_v55, %v418_v42 }
 0x6ea   : > { %v516_v56 = vpop.permute.xlu1 %515 }
 0x6eb   : > { %v518_v57 = vmul.f32 %v1439_v55, %v516_v56 }
 0x6ed   : > { %520 = vrot.lane.b32.xlu0 %v518_v57, %s1510_s22 }
 0x75f   : > { %v521_v59 = vpop.permute.xlu0 %520 }
 0x760   : > { %v523_v60 = vadd.f32 %v521_v59, %v513_v58 }
 0x762   : > { %1440 = vtanh.f32 %v523_v60 }
 0x76c   : > { %v1441_v61 = vpop.eup %1440 }
 0x76d   : > { %526 = vrot.lane.b32.xlu1 %v1441_v61, %s1509_s21 }
 0x7df   : > { %v527_v62 = vpop.permute.xlu1 %526 }
 0x7e0   : > { %v529_v63 = vmul.f32 %v1439_v55, %v527_v62  ;;  %v1199_v55 = vld [vmem:[%s1586_s20 + $0xc] sm:$0x3] }
 0x7e2   : > { %531 = vrot.lane.b32.xlu0 %v529_v63, %s1510_s22 }
 0x854   : > { %v532_v2 = vpop.permute.xlu0 %531 }
 0x855   : > { %1186 = vst.msk [vmem:[%s1599_s25 + $0x4] sm:$0x3] %vm207_vm0, %v532_v2  ;;  %1294 = vmatmul.mubr.msk.f32.vlgmr.msra.gmra.mrb[2].mxu1 %vm217_vm2, %v532_v2 }
 0x856   : > { %1372 = vmatpush3.bf16.msra.mxu1 %v1561_v5  ;;  %1315 = vmatprep.mubr.msk.f32.mxu1 %vm1507_vm1, %v1508_v1 }
 0x857   : > { %1373 = vmatprep.subr.bf16.mxu1 %v1506_v0 }
 0x85a   : > { %1375 = vmatpush3.bf16.msra.mxu1 %v1564_v7 }
 0x85b   : > { %1382 = vmatprep.subr.bf16.mxu1 %v1506_v0 }
 0x928   : > { %v606_v4 = vpop.f32.mrb[2].mxu1 }
 0x929   : > { %v610_v6 = vadd.f32 %v1187_v3, %v606_v4  ;;  %v1295_v8 = vpop.f32.mrb[3].mxu1 }
 0x92b   : > { %1442 = vtanh.f32 %v610_v6  ;;  %v1189_v10 = vmul.f32 -1.442695, %v610_v6 }
 0x92d   : > { %1444 = vpow2.f32 %v1189_v10 }
 0x935   : > { %v1443_v9 = vpop.eup %1442 }
 0x936   : > { %620 = vrot.lane.b32.xlu1 %v1443_v9, %s1509_s21 }
 0x937   : > { %v1445_v11 = vpop.eup %1444 }
 0x938   : > { %v614_v12 = vadd.f32 1.0, %v1445_v11 }
 0x93a   : > { %1446 = vrcp.f32 %v614_v12 }
 0x944   : > { %v1447_v13 = vpop.eup %1446 }
 0x945   : > { %v618_v16 = vmul.f32 %v1447_v13, %v523_v60 }
 0x9a8   : > { %v621_v14 = vpop.permute.xlu1 %620 }
 0x9a9   : > { %v623_v15 = vmul.f32 %v1447_v13, %v621_v14 }
 0x9ab   : > { %625 = vrot.lane.b32.xlu0 %v623_v15, %s1510_s22 }
 0xa1d   : > { %v626_v17 = vpop.permute.xlu0 %625 }
 0xa1e   : > { %v628_v18 = vadd.f32 %v626_v17, %v618_v16 }
 0xa20   : > { %1448 = vtanh.f32 %v628_v18 }
 0xa2a   : > { %v1449_v19 = vpop.eup %1448 }
 0xa2b   : > { %631 = vrot.lane.b32.xlu1 %v1449_v19, %s1509_s21 }
 0xa9d   : > { %v632_v20 = vpop.permute.xlu1 %631 }
 0xa9e   : > { %v634_v21 = vmul.f32 %v1447_v13, %v632_v20  ;;  %v1203_v13 = vld [vmem:[%s1586_s20 + $0xe] sm:$0x3] }
 0xaa0   : > { %636 = vrot.lane.b32.xlu0 %v634_v21, %s1510_s22 }
 0xb12   : > { %v637_v22 = vpop.permute.xlu0 %636 }
 0xb13   : > { %1190 = vst.msk [vmem:[%s1599_s25 + $0x6] sm:$0x3] %vm207_vm0, %v637_v22  ;;  %1305 = vmatmul.mubr.msk.f32.vlgmr.msra.gmra.mrb[4].mxu0 %vm217_vm2, %v637_v22 }
 0xb14   : > { %1378 = vmatpush3.bf16.msra.mxu0 %v1561_v5  ;;  %1326 = vmatprep.mubr.msk.f32.mxu0 %vm1507_vm1, %v1508_v1 }
 0xb15   : > { %1379 = vmatprep.subr.bf16.mxu0 %v1506_v0 }
 0xb18   : > { %1381 = vmatpush3.bf16.msra.mxu0 %v1564_v7 }
 0xbe6   : > { %v711_v24 = vpop.f32.mrb[4].mxu0 }
 0xbe7   : > { %v715_v25 = vadd.f32 %v1191_v23, %v711_v24  ;;  %v1306_v26 = vpop.f32.mrb[5].mxu0 }
 0xbe9   : > { %1450 = vtanh.f32 %v715_v25  ;;  %v1193_v28 = vmul.f32 -1.442695, %v715_v25 }
 0xbeb   : > { %1452 = vpow2.f32 %v1193_v28 }
 0xbf3   : > { %v1451_v27 = vpop.eup %1450 }
 0xbf4   : > { %725 = vrot.lane.b32.xlu1 %v1451_v27, %s1509_s21 }
 0xbf5   : > { %v1453_v29 = vpop.eup %1452 }
 0xbf6   : > { %v719_v30 = vadd.f32 1.0, %v1453_v29 }
 0xbf8   : > { %1454 = vrcp.f32 %v719_v30 }
 0xc02   : > { %v1455_v31 = vpop.eup %1454 }
 0xc03   : > { %v723_v34 = vmul.f32 %v1455_v31, %v628_v18 }
 0xc66   : > { %v726_v32 = vpop.permute.xlu1 %725 }
 0xc67   : > { %v728_v33 = vmul.f32 %v1455_v31, %v726_v32 }
 0xc69   : > { %730 = vrot.lane.b32.xlu0 %v728_v33, %s1510_s22 }
 0xcdb   : > { %v731_v35 = vpop.permute.xlu0 %730 }
 0xcdc   : > { %v733_v36 = vadd.f32 %v731_v35, %v723_v34 }
 0xcde   : > { %1456 = vtanh.f32 %v733_v36 }
 0xce8   : > { %v1457_v37 = vpop.eup %1456 }
 0xce9   : > { %736 = vrot.lane.b32.xlu1 %v1457_v37, %s1509_s21 }
 0xd5b   : > { %v737_v38 = vpop.permute.xlu1 %736 }
 0xd5c   : > { %v739_v39 = vmul.f32 %v1455_v31, %v737_v38 }
 0xd5e   : > { %741 = vrot.lane.b32.xlu0 %v739_v39, %s1510_s22 }
 0xdd0   : > { %v742_v40 = vpop.permute.xlu0 %741 }
 0xdd1   : > { %1194 = vst.msk [vmem:[%s1599_s25 + $0x8] sm:$0x3] %vm207_vm0, %v742_v40  ;;  %1316 = vmatmul.mubr.msk.f32.vlgmr.msra.gmra.mrb[4].mxu1 %vm217_vm2, %v742_v40 }
 0xdd2   : > { %1384 = vmatpush3.bf16.msra.mxu1 %v1561_v5  ;;  %1337 = vmatprep.mubr.msk.f32.mxu1 %vm1507_vm1, %v1508_v1 }
 0xdd3   : > { %1385 = vmatprep.subr.bf16.mxu1 %v1506_v0 }
 0xdd6   : > { %1387 = vmatpush3.bf16.msra.mxu1 %v1564_v7 }
 0xea4   : > { %v816_v42 = vpop.f32.mrb[4].mxu1 }
 0xea5   : > { %v820_v43 = vadd.f32 %v1195_v41, %v816_v42  ;;  %v1317_v44 = vpop.f32.mrb[5].mxu1 }
 0xea7   : > { %1458 = vtanh.f32 %v820_v43  ;;  %v1197_v46 = vmul.f32 -1.442695, %v820_v43 }
 0xea9   : > { %1460 = vpow2.f32 %v1197_v46 }
 0xeb1   : > { %v1459_v45 = vpop.eup %1458 }
 0xeb2   : > { %830 = vrot.lane.b32.xlu1 %v1459_v45, %s1509_s21 }
 0xeb3   : > { %v1461_v47 = vpop.eup %1460 }
 0xeb4   : > { %v824_v48 = vadd.f32 1.0, %v1461_v47 }
 0xeb6   : > { %1462 = vrcp.f32 %v824_v48 }
 0xec0   : > { %v1463_v5 = vpop.eup %1462 }
 0xec1   : > { %v828_v7 = vmul.f32 %v1463_v5, %v733_v36 }
 0xf24   : > { %v831_v1 = vpop.permute.xlu1 %830 }
 0xf25   : > { %v833_v0 = vmul.f32 %v1463_v5, %v831_v1 }
 0xf27   : > { %835 = vrot.lane.b32.xlu0 %v833_v0, %s1510_s22 }
 0xf99   : > { %v836_v49 = vpop.permute.xlu0 %835 }
 0xf9a   : > { %v838_v50 = vadd.f32 %v836_v49, %v828_v7 }
 0xf9c   : > { %1464 = vtanh.f32 %v838_v50 }
 0xfa6   : > { %v1465_v51 = vpop.eup %1464 }
 0xfa7   : > { %841 = vrot.lane.b32.xlu1 %v1465_v51, %s1509_s21 }
0x1019   : > { %v842_v52 = vpop.permute.xlu1 %841 }
0x101a   : > { %v844_v53 = vmul.f32 %v1463_v5, %v842_v52 }
0x101c   : > { %846 = vrot.lane.b32.xlu0 %v844_v53, %s1510_s22 }
0x108e   : > { %v847_v54 = vpop.permute.xlu0 %846 }
0x108f   : > { %1198 = vst.msk [vmem:[%s1599_s25 + $0xa] sm:$0x3] %vm207_vm0, %v847_v54  ;;  %1327 = vmatmul.mubr.msk.f32.vlgmr.msra.gmra.mrb[6].mxu0 %vm217_vm2, %v847_v54 }
0x1162   : > { %v921_v56 = vpop.f32.mrb[6].mxu0 }
0x1163   : > { %v925_v57 = vadd.f32 %v1199_v55, %v921_v56  ;;  %v1328_v58 = vpop.f32.mrb[7].mxu0 }
0x1165   : > { %1466 = vtanh.f32 %v925_v57  ;;  %v1201_v60 = vmul.f32 -1.442695, %v925_v57 }
0x1167   : > { %1468 = vpow2.f32 %v1201_v60 }
0x116f   : > { %v1467_v59 = vpop.eup %1466 }
0x1170   : > { %935 = vrot.lane.b32.xlu1 %v1467_v59, %s1509_s21 }
0x1171   : > { %v1469_v61 = vpop.eup %1468 }
0x1172   : > { %v929_v62 = vadd.f32 1.0, %v1469_v61 }
0x1174   : > { %1470 = vrcp.f32 %v929_v62 }
0x117e   : > { %v1471_v63 = vpop.eup %1470 }
0x117f   : > { %v933_v4 = vmul.f32 %v1471_v63, %v838_v50 }
0x11e2   : > { %v936_v2 = vpop.permute.xlu1 %935 }
0x11e3   : > { %v938_v3 = vmul.f32 %v1471_v63, %v936_v2 }
0x11e5   : > { %940 = vrot.lane.b32.xlu0 %v938_v3, %s1510_s22 }
0x1257   : > { %v941_v6 = vpop.permute.xlu0 %940 }
0x1258   : > { %v943_v8 = vadd.f32 %v941_v6, %v933_v4 }
0x125a   : > { %1472 = vtanh.f32 %v943_v8 }
0x1264   : > { %v1473_v9 = vpop.eup %1472 }
0x1265   : > { %946 = vrot.lane.b32.xlu1 %v1473_v9, %s1509_s21 }
0x12d7   : > { %v947_v10 = vpop.permute.xlu1 %946 }
0x12d8   : > { %v949_v11 = vmul.f32 %v1471_v63, %v947_v10 }
0x12da   : > { %951 = vrot.lane.b32.xlu0 %v949_v11, %s1510_s22 }
0x134c   : > { %v952_v12 = vpop.permute.xlu0 %951 }
0x134d   : > { %1202 = vst.msk [vmem:[%s1599_s25 + $0xc] sm:$0x3] %vm207_vm0, %v952_v12  ;;  %1338 = vmatmul.mubr.msk.f32.vlgmr.msra.gmra.mrb[6].mxu1 %vm217_vm2, %v952_v12 }
0x1420   : > { %v1026_v14 = vpop.f32.mrb[6].mxu1 }
0x1421   : > { %v1030_v15 = vadd.f32 %v1203_v13, %v1026_v14  ;;  %v1339_v16 = vpop.f32.mrb[7].mxu1 }
0x1423   : > { %1474 = vtanh.f32 %v1030_v15  ;;  %v1205_v18 = vmul.f32 -1.442695, %v1030_v15 }
0x1425   : > { %1476 = vpow2.f32 %v1205_v18 }
0x142d   : > { %v1475_v17 = vpop.eup %1474 }
0x142e   : > { %1040 = vrot.lane.b32.xlu1 %v1475_v17, %s1509_s21 }
0x142f   : > { %v1477_v19 = vpop.eup %1476 }
0x1430   : > { %v1034_v20 = vadd.f32 1.0, %v1477_v19 }
0x1432   : > { %1478 = vrcp.f32 %v1034_v20 }
0x143c   : > { %v1479_v21 = vpop.eup %1478 }
0x143d   : > { %v1038_v24 = vmul.f32 %v1479_v21, %v943_v8 }
0x14a0   : > { %v1041_v22 = vpop.permute.xlu1 %1040 }
0x14a1   : > { %v1043_v23 = vmul.f32 %v1479_v21, %v1041_v22 }
0x14a3   : > { %1045 = vrot.lane.b32.xlu0 %v1043_v23, %s1510_s22 }
0x1515   : > { %v1046_v25 = vpop.permute.xlu0 %1045 }
0x1516   : > { %v1048_v26 = vadd.f32 %v1046_v25, %v1038_v24 }
0x1518   : > { %1480 = vtanh.f32 %v1048_v26 }
0x1522   : > { %v1481_v27 = vpop.eup %1480 }
0x1523   : > { %1051 = vrot.lane.b32.xlu1 %v1481_v27, %s1509_s21 }
0x1527   : > { %1063 = vrot.lane.b32.xlu1 %v1048_v26, %s1511_s26 }
0x1595   : > { %v1052_v28 = vpop.permute.xlu1 %1051 }
0x1596   : > { %v1054_v29 = vmul.f32 %v1479_v21, %v1052_v28 }
0x1598   : > { %1056 = vrot.lane.b32.xlu0 %v1054_v29, %s1510_s22 }
0x1599   : > { %v1064_v30 = vpop.permute.xlu1 %1063 }
0x159a   : > { %1066 = vst.msk [vmem:[#allocation3] sm:$0x3] %vm207_vm0, %v1064_v30 }
0x160a   : > { %v1057_v31 = vpop.permute.xlu0 %1056 }
0x160b   : > { %1206 = vst.msk [vmem:[%s1599_s25 + $0xe] sm:$0x3] %vm207_vm0, %v1057_v31  ;;  %1061 = vst.msk [vmem:[#allocation2] sm:$0x3] %vm207_vm0, %v1057_v31 }
0x160c PF: > { %s12_s11 = sadd.s32 1, %s1504_s11   ;;  %s1701_s9 = smov %s1500_s10 }
0x160d   : > { %p9_p5 = scmp.ge.s32.totalorder %s12_s11, 4   ;;  %s1702_s10 = smov %s1704_s12 }
0x160f   :  { %11 = sbr.rel (!%p9_p5) target bundleno = 2 (0x2), region = 79 }

// kernel: export_model_forward.13
= control target key start
LH: loop header
LB: loop body
LE: loop exit
PB: predicated region body
PF: predicated region fallthrough
CT: control target
= control target key end

     0   :  { %vm33_vm0 = vcmask 523264   ;;  %vm115_vm1 = vcmask 80896   ;;  %v139_v21 = vlaneseq  ;;  %vm136_vm6 = vcmask 7168   ;;  %s323_s1 = inlined_call_operand.vmem [shape: f32[64,10], index: 1, kind: input, shape index: {}]   ;;  %s324_s0 = inlined_call_operand.vmem [shape: f32[16,64], index: 0, kind: input, shape index: {}]   ;;  %s325_s2 = inlined_call_operand.vmem [shape: f32[1,10], index: 2, kind: input, shape index: {}]   ;;  %s326_s3 = inlined_call_operand.vmem [shape: f32[16,1], index: 3, kind: output, shape index: {0}]   ;;  %s327_s4 = inlined_call_operand.vmem [shape: s32[16,1], index: 4, kind: output, shape index: {1}]  }
   0x1   :  { %v18_v0 = vld [vmem:[%s323_s1] sm:$0xff]  ;;  %v19_v1 = vld [vmem:[%s323_s1 + $0x8] sm:$0xff]  ;;  %v20_v2 = vld [vmem:[%s323_s1 + $0x10] sm:$0xff] }
   0x2   :  { %v217_v3 = vpack.c.bf16 %v19_v1, %v18_v0  ;;  %v21_v4 = vld [vmem:[%s323_s1 + $0x18] sm:$0xff]  ;;  %v22_v6 = vld [vmem:[%s323_s1 + $0x20] sm:$0xff]  ;;  %v23_v7 = vld [vmem:[%s323_s1 + $0x28] sm:$0xff]  ;;  %v140_v22 = vand.u32 127, %v139_v21 }
   0x3   :  { %v221_v5 = vpack.c.bf16 %v21_v4, %v20_v2  ;;  %v16_v8 = vld [vmem:[%s324_s0] sm:$0xff]  ;;  %v225_v9 = vpack.c.bf16 %v23_v7, %v22_v6  ;;  %v24_v10 = vld [vmem:[%s323_s1 + $0x30] sm:$0xff]  ;;  %v25_v11 = vld [vmem:[%s323_s1 + $0x38] sm:$0xff] }
   0x4   :  { %218 = vmatprep.subr.bf16.mxu0 %v217_v3  ;;  %214 = vmatprep.mubr.msk.f32.mxu0 %vm33_vm0, %v16_v8  ;;  %v229_v12 = vpack.c.bf16 %v25_v11, %v24_v10  ;;  %v17_v13 = vld [vmem:[%s324_s0 + $0x8] sm:$0xff]  ;;  %v185_v14 = vld [vmem:[%s325_s2] ss:$0 sm:$0xff] }
   0x5   :  { %220 = vmatpush3.bf16.msra.mxu0 %v217_v3 }
   0x6   :  { %222 = vmatprep.subr.bf16.mxu0 %v221_v5 }
   0x9   :  { %224 = vmatpush3.bf16.msra.mxu0 %v221_v5 }
   0xa   :  { %226 = vmatprep.subr.bf16.mxu0 %v225_v9 }
   0xd   :  { %228 = vmatpush3.bf16.msra.mxu0 %v225_v9 }
   0xe   :  { %230 = vmatprep.subr.bf16.mxu0 %v229_v12 }
  0x11   :  { %232 = vmatpush3.bf16.msra.mxu0 %v229_v12 }
  0x14   :  { %215 = vmatmul.mubr.msk.f32.vlgmr.msra.gmra.mrb[0].mxu0 %vm33_vm0, %v17_v13 }
  0xe7   :  { %v216_v15 = vpop.f32.mrb[0].mxu0 }
  0xe8   :  { %v106_v16 = vpop.f32.mrb[1].mxu0  ;;  %v112_v18 = vadd.f32 %v216_v15, %v185_v14 }
  0xe9   :  { %v107_v17 = vadd.f32 %v185_v14, %v106_v16 }
  0xea   :  { %v119_v20 = vsel %vm115_vm1, %v112_v18, -inf }
  0xeb   :  { %v116_v19 = vsel %vm115_vm1, %v107_v17, -inf }
  0xec   :  { %117 = vmax.xlane.f32.xlu0 %v116_v19 }
  0xf0   :  { %120 = vmax.xlane.f32.xlu0 %v119_v20 }
 0x179   :  { %v118_v23 = vpop.xlane.xlu0 %117 }
 0x17a   :  { %v122_v24 = vsub.f32 %v107_v17, %v118_v23  ;;  %vm141_vm2 = vcmp.eq.f32.partialorder %v107_v17, %v118_v23 }
 0x17b   :  { %v143_v25 = vsel %vm141_vm2, %v140_v22, 10 }
 0x17c   :  { %v124_v26 = vmul.f32 1.442695, %v122_v24  ;;  %v145_v27 = vsel %vm115_vm1, %v143_v25, 2147483647 }
 0x17d   :  { %v121_v28 = vpop.xlane.xlu0 %120  ;;  %v147_v29 = vshra.s32 %v145_v27, 16  ;;  %v146_v41 = vand.u32 65535, %v145_v27 }
 0x17e   :  { %233 = vpow2.f32 %v124_v26  ;;  %v123_v30 = vsub.f32 %v112_v18, %v121_v28  ;;  %vm142_vm3 = vcmp.eq.f32.partialorder %v112_v18, %v121_v28 }
 0x17f   :  { %v144_v31 = vsel %vm142_vm3, %v140_v22, 10  ;;  %v149_v32 = vcvt.s32.f32 %v147_v29  ;;  %v148_v43 = vcvt.s32.f32 %v146_v41 }
 0x180   :  { %v126_v33 = vmul.f32 1.442695, %v123_v30  ;;  %v160_v34 = vsel %vm115_vm1, %v144_v31, 2147483647 }
 0x181   :  { %150 = vmin.xlane.f32.xlu1 %v149_v32  ;;  %v162_v35 = vshra.s32 %v160_v34, 16  ;;  %v161_v44 = vand.u32 65535, %v160_v34 }
 0x182   :  { %235 = vpow2.f32 %v126_v33 }
 0x183   :  { %v164_v36 = vcvt.s32.f32 %v162_v35  ;;  %v163_v47 = vcvt.s32.f32 %v161_v44 }
 0x185   :  { %165 = vmin.xlane.f32.xlu1 %v164_v36 }
 0x188   :  { %v234_v37 = vpop.eup %233 }
 0x189   :  { %v128_v38 = vsel %vm115_vm1, %v234_v37, 0.0 }
 0x18a   :  { %129 = vadd.xlane.f32.xlu0 %v128_v38 }
 0x18c   :  { %v236_v39 = vpop.eup %235 }
 0x18d   :  { %v131_v40 = vsel %vm115_vm1, %v236_v39, 0.0 }
 0x18e   :  { %132 = vadd.xlane.f32.xlu1 %v131_v40 }
 0x20e   :  { %v151_v42 = vpop.xlane.xlu1 %150 }
 0x20f   :  { %vm152_vm4 = vcmp.eq.f32.partialorder %v149_v32, %v151_v42  ;;  %v157_v53 = vcvt.f32.s32 %v151_v42 }
 0x210   :  { %v153_v45 = vsel %vm152_vm4, %v148_v43, inf }
 0x211   :  { %154 = vmin.xlane.f32.xlu0 %v153_v45  ;;  %v158_v55 = vshll.u32 %v157_v53, 16 }
 0x212   :  { %v166_v46 = vpop.xlane.xlu1 %165 }
 0x213   :  { %vm167_vm5 = vcmp.eq.f32.partialorder %v164_v36, %v166_v46  ;;  %v172_v56 = vcvt.f32.s32 %v166_v46 }
 0x214   :  { %v168_v48 = vsel %vm167_vm5, %v163_v47, inf }
 0x215   :  { %169 = vmin.xlane.f32.xlu1 %v168_v48  ;;  %v173_v60 = vshll.u32 %v172_v56, 16 }
 0x217   :  { %v130_v49 = vpop.xlane.xlu0 %129 }
 0x218   :  { %237 = vrcp.f32 %v130_v49 }
 0x21b   :  { %v133_v50 = vpop.xlane.xlu1 %132 }
 0x21c   :  { %239 = vrcp.f32 %v133_v50 }
 0x222   :  { %v238_v51 = vpop.eup %237 }
 0x223   :  { %137 = vst.msk [vmem:[%s326_s3] sm:$0xff] %vm136_vm6, %v238_v51 }
 0x226   :  { %v240_v52 = vpop.eup %239 }
 0x227   :  { %138 = vst.msk [vmem:[%s326_s3 + $0x8] sm:$0xff] %vm136_vm6, %v240_v52 }
 0x29e   :  { %v155_v54 = vpop.xlane.xlu0 %154 }
 0x29f   :  { %v156_v57 = vcvt.f32.s32 %v155_v54 }
 0x2a1   :  { %v159_v58 = vadd.s32 %v158_v55, %v156_v57 }
 0x2a2   :  { %v170_v59 = vpop.xlane.xlu1 %169 }
 0x2a3   :  { %175 = vst.msk [vmem:[%s327_s4] sm:$0xff] %vm136_vm6, %v159_v58  ;;  %v171_v61 = vcvt.f32.s32 %v170_v59 }
 0x2a5   :  { %v174_v62 = vadd.s32 %v173_v60, %v171_v61 }
 0x2a7   :  { %176 = vst.msk [vmem:[%s327_s4 + $0x8] sm:$0xff] %vm136_vm6, %v174_v62 }

</bundles_post_ra>
